<compile_context>
chip_gen: v7x
topology: tpu7x:2x2x1
jax: 0.10.0
libtpu: 0.0.40
codegen_flags: <defaults>
</compile_context>

<pallas_src>
import functools
import math

import jax
import jax.numpy as jnp
import numpy as np
from jax.experimental import pallas as pl
from jax.experimental.pallas import tpu as pltpu

# ---------------- configuration (small, consistent with the module) ----------------
BATCH = 2
EMB_DIM = 32      # emb_dim (= channels C)
HEADS = 4         # heads, d_k = 8
MLP_DIM = 64      # mlp_dim (== 2*EMB_DIM, required by the weight packing below)
HEIGHT = 8        # height
WIDTH = 8         # width  -> N = 64 tokens
EPS = 1e-6


# =====================================================================================
# In-kernel math
# =====================================================================================
def _gelu(x):
    # exact (erf-based) GELU, same as torch.nn.GELU()
    return 0.5 * x * (1.0 + jax.lax.erf(x * (1.0 / math.sqrt(2.0))))


def _layer_norm_k(x, a, b, recip):
    # Matches the module's custom LayerNorm exactly:
    #   a * (x - mean) / (std + eps) + b, std unbiased (ddof=1), eps OUTSIDE sqrt.
    mean = jnp.mean(x, axis=-1, keepdims=True)
    var = jnp.sum((x - mean) ** 2, axis=-1, keepdims=True) * (1.0 / (x.shape[-1] - 1))
    std = jnp.sqrt(var)
    return a * (x - mean) * recip(std + EPS) + b


def _mha_masked(q_in, kv_in, wq_pad, bq_pad, wkv, bkv, wo_pad, bo,
                k_masks, v_masks, recip):
    """MultiHeadedAttention forward with packed K|V and lane-masked head selection.

    q_in:   (N, C)   query-side input
    kv_in:  (N, C)   key/value-side input
    wq_pad: (C, 2C) = [Wq*scale | 0],  bq_pad: (1, 2C) = [bq*scale | 0]
    wkv:    (C, 2C) = [Wk | Wv],       bkv:    (1, 2C) = [bk | bv]
    wo_pad: (2C, C) = [0 ; Wo],        bo:     (1, C)
    k_masks / v_masks: per-head (N, 2C) boolean lane masks (precomputed).
    Mathematically identical to the per-head slice + concat formulation.
    Dropout = identity (eval mode).
    """
    qp = jnp.dot(q_in, wq_pad, preferred_element_type=jnp.float32) + bq_pad   # (N, 2C)
    kv = jnp.dot(kv_in, wkv, preferred_element_type=jnp.float32) + bkv        # (N, 2C)=[K|V]

    acc = None
    for kmask, vmask in zip(k_masks, v_masks):           # static unroll over heads
        kh = jnp.where(kmask, kv, 0.0)                   # head-h K columns only
        vh = jnp.where(vmask, kv, 0.0)                   # head-h V columns only
        # scores_h = (Q_h*scale) @ K_h^T  (masked lanes contribute zero)
        scores = jax.lax.dot_general(
            qp, kh, (((1,), (1,)), ((), ())),
            preferred_element_type=jnp.float32)          # (N, N)
        m = jnp.max(scores, axis=-1, keepdims=True)
        e = jnp.exp(scores - m)
        p = e * recip(jnp.sum(e, axis=-1, keepdims=True))
        # P_h @ V_h lands directly at lanes [C + h*d_k, C + (h+1)*d_k) of acc.
        pv = jnp.dot(p, vh, preferred_element_type=jnp.float32)
        acc = pv if acc is None else acc + pv

    # Output projection; zero rows of wo_pad drop the unused first C lanes of acc.
    return jnp.dot(acc, wo_pad, preferred_element_type=jnp.float32) + bo       # (N, C)


def fusion_kernel(heads, n_tok, x_ref, wA_ref, wB_ref, b_ref, out_ref):
    recip = lambda v: pl.reciprocal(v, approx=True)          # EUP slot, otherwise idle

    c = out_ref.shape[-1]
    c2 = 2 * c
    d_k = c // heads

    x = x_ref[0]                                             # (2N, C): [ir ; rgb] tokens

    # Per-head lane masks, built once and shared by both cross-attentions.
    col = jax.lax.broadcasted_iota(jnp.int32, (n_tok, c2), 1)
    k_masks = [(col >= h * d_k) & (col < h * d_k + d_k) for h in range(heads)]
    v_masks = [(col >= c + h * d_k) & (col < c + h * d_k + d_k) for h in range(heads)]

    # LayerNorm1 on the stacked ir|rgb slab (shared weights -> one pass).
    xn = _layer_norm_k(x, b_ref[5:6, :c], b_ref[6:7, :c], recip)
    ir_n = xn[:n_tok]                                        # tile-aligned sublane slices
    rgb_n = xn[n_tok:]

    # cross_attention_1(query=ir_n, key=value=rgb_n)
    ir_att = _mha_masked(ir_n, rgb_n,
                         wA_ref[0], b_ref[0:1, :],
                         wA_ref[1], b_ref[1:2, :],
                         wB_ref[0], b_ref[9:10, :c],
                         k_masks, v_masks, recip)
    # cross_attention_2(query=rgb_n, key=value=ir_att)  -- consumes CA1's OUTPUT,
    # exactly like the PyTorch code which reassigns infrared_features first.
    rgb_att = _mha_masked(rgb_n, ir_att,
                          wA_ref[2], b_ref[2:3, :],
                          wA_ref[3], b_ref[3:4, :],
                          wB_ref[1], b_ref[10:11, :c],
                          k_masks, v_masks, recip)

    att = jnp.concatenate([ir_att, rgb_att], axis=0)         # (2N, C), sublane concat
    x2 = _layer_norm_k(att + x, b_ref[7:8, :c], b_ref[8:9, :c], recip)

    # Shared-weight MLP, run once on the stacked slab.
    h1 = _gelu(jnp.dot(x2, wA_ref[4], preferred_element_type=jnp.float32)
               + b_ref[4:5, :])
    h2 = jnp.dot(h1, wB_ref[2], preferred_element_type=jnp.float32) + b_ref[11:12, :c]

    out_ref[0] = x2 + h2

    # TODO(synk): dropout layers (attention p=0.1, block p=0.0) are identity (eval mode).


# =====================================================================================
# Wrapper: weight packing + pallas_call
# =====================================================================================
def _pack_params(p, heads):
    """Pack 24 small parameter tensors into 3 slabs (done once, outside the kernel)."""
    C = EMB_DIM
    assert MLP_DIM == 2 * C, "weight packing below assumes mlp_dim == 2*emb_dim"
    scale = 1.0 / math.sqrt(C // heads)          # folded into Wq / bq (pack-time, free)

    def qpad(w):    # (C,C) -> (C,2C) = [W*scale | 0]
        return jnp.concatenate([w * scale, jnp.zeros_like(w)], axis=1)

    def qbpad(b):   # (1,C) -> (1,2C) = [b*scale | 0]
        return jnp.concatenate([b * scale, jnp.zeros_like(b)], axis=1)

    def opad(w):    # (C,C) -> (2C,C) = [0 ; W]
        return jnp.concatenate([jnp.zeros_like(w), w], axis=0)

    def pad32(b):   # (1,C) -> (1,2C) = [b | 0]
        return jnp.concatenate([b, jnp.zeros_like(b)], axis=1)

    wA = jnp.stack([                                   # (5, C, 2C)
        qpad(p["ca1_qw"]),
        jnp.concatenate([p["ca1_kw"], p["ca1_vw"]], axis=1),
        qpad(p["ca2_qw"]),
        jnp.concatenate([p["ca2_kw"], p["ca2_vw"]], axis=1),
        p["mlp_w1"],
    ])
    wB = jnp.stack([opad(p["ca1_ow"]), opad(p["ca2_ow"]), p["mlp_w2"]])   # (3, 2C, C)
    biases = jnp.concatenate([                         # (12, 2C)
        qbpad(p["ca1_qb"]),                                         # 0
        jnp.concatenate([p["ca1_kb"], p["ca1_vb"]], axis=1),        # 1
        qbpad(p["ca2_qb"]),                                         # 2
        jnp.concatenate([p["ca2_kb"], p["ca2_vb"]], axis=1),        # 3
        p["mlp_b1"],                                                # 4
        pad32(p["n1_a"]), pad32(p["n1_b"]),                         # 5, 6
        pad32(p["n2_a"]), pad32(p["n2_b"]),                         # 7, 8
        pad32(p["ca1_ob"]), pad32(p["ca2_ob"]),                     # 9, 10
        pad32(p["mlp_b2"]),                                         # 11
    ], axis=0)
    return wA, wB, biases


def fusion_block(ir_nchw, rgb_nchw, params, heads):
    """Pallas-backed Fusion_Block.forward. Inputs / outputs are NCHW like PyTorch."""
    if ir_nchw.shape != rgb_nchw.shape:
        return ir_nchw, rgb_nchw

    B, C, H, W = ir_nchw.shape
    N = H * W
    # 'b c h w -> b (h w) c', then stack ir|rgb along the token axis.
    ir = jnp.transpose(ir_nchw, (0, 2, 3, 1)).reshape(B, N, C)
    rgb = jnp.transpose(rgb_nchw, (0, 2, 3, 1)).reshape(B, N, C)
    x = jnp.concatenate([ir, rgb], axis=1)                         # (B, 2N, C)

    wA, wB, biases = _pack_params(params, heads)

    seq_spec = pl.BlockSpec((1, 2 * N, C), lambda b: (b, 0, 0))

    out = pl.pallas_call(
        functools.partial(fusion_kernel, heads, N),
        out_shape=jax.ShapeDtypeStruct((B, 2 * N, C), jnp.float32),
        grid_spec=pltpu.PrefetchScalarGridSpec(
            num_scalar_prefetch=0,
            grid=(B,),
            in_specs=[
                seq_spec,
                pl.BlockSpec(wA.shape, lambda b: (0, 0, 0)),
                pl.BlockSpec(wB.shape, lambda b: (0, 0, 0)),
                pl.BlockSpec(biases.shape, lambda b: (0, 0)),
            ],
            out_specs=seq_spec,
        ),
        # "parallel" lets v7x shard the batch over its 2 TensorCores; on v5e/v6e
        # this is just a short serial loop (weight blocks don't move across steps).
        compiler_params=pltpu.CompilerParams(
            dimension_semantics=("parallel",)),
    )(x, wA, wB, biases)

    # split ir|rgb and 'b (h w) c -> b c h w'
    ir_out = out[:, :N].reshape(B, H, W, C).transpose(0, 3, 1, 2)
    rgb_out = out[:, N:].reshape(B, H, W, C).transpose(0, 3, 1, 2)
    return ir_out, rgb_out


# =====================================================================================
# Pure-JAX reference (direct translation of the PyTorch module, unpacked weights)
# =====================================================================================
def _layer_norm_ref(x, a, b):
    mean = jnp.mean(x, axis=-1, keepdims=True)
    var = jnp.sum((x - mean) ** 2, axis=-1, keepdims=True) / (x.shape[-1] - 1)
    std = jnp.sqrt(var)
    return a * (x - mean) / (std + EPS) + b


def _mha_ref(q_in, k_in, v_in, wq, bq, wk, bk, wv, bv, wo, bo, heads):
    n, c = q_in.shape
    d_k = c // heads
    q = (q_in @ wq + bq).reshape(n, heads, d_k).transpose(1, 0, 2)
    k = (k_in @ wk + bk).reshape(n, heads, d_k).transpose(1, 0, 2)
    v = (v_in @ wv + bv).reshape(n, heads, d_k).transpose(1, 0, 2)
    scores = jnp.einsum("hqd,hkd->hqk", q, k) / math.sqrt(d_k)
    p = jax.nn.softmax(scores, axis=-1)
    x = jnp.einsum("hqk,hkd->hqd", p, v).transpose(1, 0, 2).reshape(n, c)
    return x @ wo + bo


def _fusion_ref(ir_mem, rgb_mem, w, heads):
    ir_n = _layer_norm_ref(ir_mem, w["n1_a"], w["n1_b"])
    rgb_n = _layer_norm_ref(rgb_mem, w["n1_a"], w["n1_b"])
    ir_att = _mha_ref(ir_n, rgb_n, rgb_n,
                      w["ca1_qw"], w["ca1_qb"], w["ca1_kw"], w["ca1_kb"],
                      w["ca1_vw"], w["ca1_vb"], w["ca1_ow"], w["ca1_ob"], heads)
    rgb_att = _mha_ref(rgb_n, ir_att, ir_att,
                       w["ca2_qw"], w["ca2_qb"], w["ca2_kw"], w["ca2_kb"],
                       w["ca2_vw"], w["ca2_vb"], w["ca2_ow"], w["ca2_ob"], heads)
    ir2 = _layer_norm_ref(ir_att + ir_mem, w["n2_a"], w["n2_b"])
    rgb2 = _layer_norm_ref(rgb_att + rgb_mem, w["n2_a"], w["n2_b"])

    def mlp(z):
        h1 = jax.nn.gelu(z @ w["mlp_w1"] + w["mlp_b1"], approximate=False)
        return h1 @ w["mlp_w2"] + w["mlp_b2"]

    return ir2 + mlp(ir2), rgb2 + mlp(rgb2)


# ---------------- deterministic parameter init ----------------
def init_params(key):
    ks = iter(jax.random.split(key, 32))

    def linear(din, dout):
        w = jax.random.normal(next(ks), (din, dout), jnp.float32) * 0.05
        b = jax.random.normal(next(ks), (1, dout), jnp.float32) * 0.05
        return w, b

    p = {
        "n1_a": jnp.ones((1, EMB_DIM), jnp.float32),
        "n1_b": jnp.zeros((1, EMB_DIM), jnp.float32),
        "n2_a": jnp.ones((1, EMB_DIM), jnp.float32),
        "n2_b": jnp.zeros((1, EMB_DIM), jnp.float32),
    }
    for blk in ("ca1", "ca2"):
        for proj in ("q", "k", "v", "o"):
            w, b = linear(EMB_DIM, EMB_DIM)
            p[f"{blk}_{proj}w"] = w
            p[f"{blk}_{proj}b"] = b
    p["mlp_w1"], p["mlp_b1"] = linear(EMB_DIM, MLP_DIM)
    p["mlp_w2"], p["mlp_b2"] = linear(MLP_DIM, EMB_DIM)
    return p


# ---------------- main ----------------
if __name__ == "__main__":
    key = jax.random.PRNGKey(0)
    k_ir, k_rgb, k_p = jax.random.split(key, 3)
    ir = jax.random.normal(k_ir, (BATCH, EMB_DIM, HEIGHT, WIDTH), jnp.float32)
    rgb = jax.random.normal(k_rgb, (BATCH, EMB_DIM, HEIGHT, WIDTH), jnp.float32)
    params = init_params(k_p)

    ir_out, rgb_out = fusion_block(ir, rgb, params, HEADS)
    jax.block_until_ready((ir_out, rgb_out))
    assert ir_out.shape == ir.shape and rgb_out.shape == rgb.shape

    # Pure-JAX reference (per-head slice + concat formulation, exact division).
    ir_seq = jnp.transpose(ir, (0, 2, 3, 1)).reshape(BATCH, HEIGHT * WIDTH, EMB_DIM)
    rgb_seq = jnp.transpose(rgb, (0, 2, 3, 1)).reshape(BATCH, HEIGHT * WIDTH, EMB_DIM)
    ref_ir_seq, ref_rgb_seq = jax.vmap(
        lambda a, b: _fusion_ref(a, b, params, HEADS))(ir_seq, rgb_seq)
    ref_ir = ref_ir_seq.reshape(BATCH, HEIGHT, WIDTH, EMB_DIM).transpose(0, 3, 1, 2)
    ref_rgb = ref_rgb_seq.reshape(BATCH, HEIGHT, WIDTH, EMB_DIM).transpose(0, 3, 1, 2)

    np.testing.assert_allclose(np.asarray(ir_out), np.asarray(ref_ir), rtol=1e-2, atol=1e-2)
    np.testing.assert_allclose(np.asarray(rgb_out), np.asarray(ref_rgb), rtol=1e-2, atol=1e-2)

    print("KERNEL_OK")
</pallas_src>

<mosaic_0001>
module attributes {stable_mosaic.version = 11 : i64} {
  func.func @fusion_kernel(%arg0: i32, %arg1: memref<1x128x32xf32, #tpu.memory_space<vmem>>, %arg2: memref<5x32x64xf32, #tpu.memory_space<vmem>>, %arg3: memref<3x64x32xf32, #tpu.memory_space<vmem>>, %arg4: memref<12x64xf32, #tpu.memory_space<vmem>>, %arg5: memref<1x128x32xf32, #tpu.memory_space<vmem>>) attributes {dimension_semantics = [#tpu.dimension_semantics<parallel>], iteration_bounds = array<i64: 2>, scalar_prefetch = 0 : i64, scratch_operands = 0 : i64, tpu.core_type = #tpu.core_type<tc>, window_params = [{transform_indices = @transform_0, window_bounds = array<i64: 1, 128, 32>}, {pipeline_mode = #tpu.pipeline_mode<synchronous>, transform_indices = @transform_1, window_bounds = array<i64: 5, 32, 64>}, {pipeline_mode = #tpu.pipeline_mode<synchronous>, transform_indices = @transform_2, window_bounds = array<i64: 3, 64, 32>}, {pipeline_mode = #tpu.pipeline_mode<synchronous>, transform_indices = @transform_3, window_bounds = array<i64: 12, 64>}, {transform_indices = @transform_4, window_bounds = array<i64: 1, 128, 32>}]} {
    %c0 = arith.constant 0 : index
    %c0_0 = arith.constant 0 : index
    %c0_1 = arith.constant 0 : index
    %0 = vector.load %arg1[%c0, %c0_0, %c0_1] : memref<1x128x32xf32, #tpu.memory_space<vmem>>, vector<1x128x32xf32>
    %1 = vector.shape_cast %0 : vector<1x128x32xf32> to vector<128x32xf32>
    %2 = tpu.iota {dimensions = array<i32: 1>} : vector<64x64xi32>
    %c0_i32 = arith.constant 0 : i32
    %3 = vector.broadcast %c0_i32 : i32 to vector<64x64xi32>
    %4 = arith.cmpi sge, %2, %3 : vector<64x64xi32>
    %c8_i32 = arith.constant 8 : i32
    %5 = vector.broadcast %c8_i32 : i32 to vector<64x64xi32>
    %6 = arith.cmpi slt, %2, %5 : vector<64x64xi32>
    %7 = arith.andi %4, %6 : vector<64x64xi1>
    %c8_i32_2 = arith.constant 8 : i32
    %8 = vector.broadcast %c8_i32_2 : i32 to vector<64x64xi32>
    %9 = arith.cmpi sge, %2, %8 : vector<64x64xi32>
    %c16_i32 = arith.constant 16 : i32
    %10 = vector.broadcast %c16_i32 : i32 to vector<64x64xi32>
    %11 = arith.cmpi slt, %2, %10 : vector<64x64xi32>
    %12 = arith.andi %9, %11 : vector<64x64xi1>
    %c16_i32_3 = arith.constant 16 : i32
    %13 = vector.broadcast %c16_i32_3 : i32 to vector<64x64xi32>
    %14 = arith.cmpi sge, %2, %13 : vector<64x64xi32>
    %c24_i32 = arith.constant 24 : i32
    %15 = vector.broadcast %c24_i32 : i32 to vector<64x64xi32>
    %16 = arith.cmpi slt, %2, %15 : vector<64x64xi32>
    %17 = arith.andi %14, %16 : vector<64x64xi1>
    %c24_i32_4 = arith.constant 24 : i32
    %18 = vector.broadcast %c24_i32_4 : i32 to vector<64x64xi32>
    %19 = arith.cmpi sge, %2, %18 : vector<64x64xi32>
    %c32_i32 = arith.constant 32 : i32
    %20 = vector.broadcast %c32_i32 : i32 to vector<64x64xi32>
    %21 = arith.cmpi slt, %2, %20 : vector<64x64xi32>
    %22 = arith.andi %19, %21 : vector<64x64xi1>
    %c32_i32_5 = arith.constant 32 : i32
    %23 = vector.broadcast %c32_i32_5 : i32 to vector<64x64xi32>
    %24 = arith.cmpi sge, %2, %23 : vector<64x64xi32>
    %c40_i32 = arith.constant 40 : i32
    %25 = vector.broadcast %c40_i32 : i32 to vector<64x64xi32>
    %26 = arith.cmpi slt, %2, %25 : vector<64x64xi32>
    %27 = arith.andi %24, %26 : vector<64x64xi1>
    %c40_i32_6 = arith.constant 40 : i32
    %28 = vector.broadcast %c40_i32_6 : i32 to vector<64x64xi32>
    %29 = arith.cmpi sge, %2, %28 : vector<64x64xi32>
    %c48_i32 = arith.constant 48 : i32
    %30 = vector.broadcast %c48_i32 : i32 to vector<64x64xi32>
    %31 = arith.cmpi slt, %2, %30 : vector<64x64xi32>
    %32 = arith.andi %29, %31 : vector<64x64xi1>
    %c48_i32_7 = arith.constant 48 : i32
    %33 = vector.broadcast %c48_i32_7 : i32 to vector<64x64xi32>
    %34 = arith.cmpi sge, %2, %33 : vector<64x64xi32>
    %c56_i32 = arith.constant 56 : i32
    %35 = vector.broadcast %c56_i32 : i32 to vector<64x64xi32>
    %36 = arith.cmpi slt, %2, %35 : vector<64x64xi32>
    %37 = arith.andi %34, %36 : vector<64x64xi1>
    %c56_i32_8 = arith.constant 56 : i32
    %38 = vector.broadcast %c56_i32_8 : i32 to vector<64x64xi32>
    %39 = arith.cmpi sge, %2, %38 : vector<64x64xi32>
    %c64_i32 = arith.constant 64 : i32
    %40 = vector.broadcast %c64_i32 : i32 to vector<64x64xi32>
    %41 = arith.cmpi slt, %2, %40 : vector<64x64xi32>
    %42 = arith.andi %39, %41 : vector<64x64xi1>
    %c5 = arith.constant 5 : index
    %c0_9 = arith.constant 0 : index
    %43 = vector.load %arg4[%c5, %c0_9] : memref<12x64xf32, #tpu.memory_space<vmem>>, vector<1x32xf32>
    %c6 = arith.constant 6 : index
    %c0_10 = arith.constant 0 : index
    %44 = vector.load %arg4[%c6, %c0_10] : memref<12x64xf32, #tpu.memory_space<vmem>>, vector<1x32xf32>
    %cst = arith.constant dense<0.000000e+00> : vector<128xf32>
    %45 = vector.multi_reduction <add>, %1, %cst [1] : vector<128x32xf32> to vector<128xf32>
    %46 = vector.shape_cast %45 : vector<128xf32> to vector<128x1xf32>
    %cst_11 = arith.constant 3.200000e+01 : f32
    %47 = vector.broadcast %cst_11 : f32 to vector<128x1xf32>
    %48 = arith.divf %46, %47 : vector<128x1xf32>
    %49 = vector.broadcast %48 : vector<128x1xf32> to vector<128x32xf32>
    %50 = arith.subf %1, %49 : vector<128x32xf32>
    %51 = arith.mulf %50, %50 : vector<128x32xf32>
    %cst_12 = arith.constant dense<0.000000e+00> : vector<128xf32>
    %52 = vector.multi_reduction <add>, %51, %cst_12 [1] : vector<128x32xf32> to vector<128xf32>
    %53 = vector.shape_cast %52 : vector<128xf32> to vector<128x1xf32>
    %cst_13 = arith.constant 0.0322580636 : f32
    %54 = vector.broadcast %cst_13 : f32 to vector<128x1xf32>
    %55 = arith.mulf %53, %54 : vector<128x1xf32>
    %56 = math.sqrt %55 : vector<128x1xf32>
    %57 = vector.broadcast %48 : vector<128x1xf32> to vector<128x32xf32>
    %58 = arith.subf %1, %57 : vector<128x32xf32>
    %59 = vector.broadcast %43 : vector<1x32xf32> to vector<128x32xf32>
    %60 = arith.mulf %59, %58 : vector<128x32xf32>
    %cst_14 = arith.constant 9.99999997E-7 : f32
    %61 = vector.broadcast %cst_14 : f32 to vector<128x1xf32>
    %62 = arith.addf %56, %61 : vector<128x1xf32>
    %63 = tpu.reciprocal %62 {approx = true} : vector<128x1xf32> -> vector<128x1xf32>
    %64 = vector.broadcast %63 : vector<128x1xf32> to vector<128x32xf32>
    %65 = arith.mulf %60, %64 : vector<128x32xf32>
    %66 = vector.broadcast %44 : vector<1x32xf32> to vector<128x32xf32>
    %67 = arith.addf %65, %66 : vector<128x32xf32>
    %68 = vector.extract_strided_slice %67 {offsets = [0, 0], sizes = [64, 32], strides = [1, 1]} : vector<128x32xf32> to vector<64x32xf32>
    %69 = vector.extract_strided_slice %67 {offsets = [64, 0], sizes = [64, 32], strides = [1, 1]} : vector<128x32xf32> to vector<64x32xf32>
    %c0_15 = arith.constant 0 : index
    %c0_16 = arith.constant 0 : index
    %c0_17 = arith.constant 0 : index
    %70 = vector.load %arg2[%c0_15, %c0_16, %c0_17] : memref<5x32x64xf32, #tpu.memory_space<vmem>>, vector<1x32x64xf32>
    %71 = vector.shape_cast %70 : vector<1x32x64xf32> to vector<32x64xf32>
    %c0_18 = arith.constant 0 : index
    %c0_19 = arith.constant 0 : index
    %72 = vector.load %arg4[%c0_18, %c0_19] : memref<12x64xf32, #tpu.memory_space<vmem>>, vector<1x64xf32>
    %c1 = arith.constant 1 : index
    %c0_20 = arith.constant 0 : index
    %c0_21 = arith.constant 0 : index
    %73 = vector.load %arg2[%c1, %c0_20, %c0_21] : memref<5x32x64xf32, #tpu.memory_space<vmem>>, vector<1x32x64xf32>
    %74 = vector.shape_cast %73 : vector<1x32x64xf32> to vector<32x64xf32>
    %c1_22 = arith.constant 1 : index
    %c0_23 = arith.constant 0 : index
    %75 = vector.load %arg4[%c1_22, %c0_23] : memref<12x64xf32, #tpu.memory_space<vmem>>, vector<1x64xf32>
    %c0_24 = arith.constant 0 : index
    %c0_25 = arith.constant 0 : index
    %c0_26 = arith.constant 0 : index
    %76 = vector.load %arg3[%c0_24, %c0_25, %c0_26] : memref<3x64x32xf32, #tpu.memory_space<vmem>>, vector<1x64x32xf32>
    %77 = vector.shape_cast %76 : vector<1x64x32xf32> to vector<64x32xf32>
    %c9 = arith.constant 9 : index
    %c0_27 = arith.constant 0 : index
    %78 = vector.load %arg4[%c9, %c0_27] : memref<12x64xf32, #tpu.memory_space<vmem>>, vector<1x32xf32>
    %cst_28 = arith.constant dense<0.000000e+00> : vector<64x64xf32>
    %79 = tpu.matmul %68, %71, %cst_28 {dimension_numbers = #tpu.dot_dimension_numbers<[1], [0], [0], [1], [0, 0, 1, 1], [], []>} : vector<64x32xf32>, vector<32x64xf32>, vector<64x64xf32> -> vector<64x64xf32>
    %80 = vector.broadcast %72 : vector<1x64xf32> to vector<64x64xf32>
    %81 = arith.addf %79, %80 : vector<64x64xf32>
    %cst_29 = arith.constant dense<0.000000e+00> : vector<64x64xf32>
    %82 = tpu.matmul %69, %74, %cst_29 {dimension_numbers = #tpu.dot_dimension_numbers<[1], [0], [0], [1], [0, 0, 1, 1], [], []>} : vector<64x32xf32>, vector<32x64xf32>, vector<64x64xf32> -> vector<64x64xf32>
    %83 = vector.broadcast %75 : vector<1x64xf32> to vector<64x64xf32>
    %84 = arith.addf %82, %83 : vector<64x64xf32>
    %cst_30 = arith.constant 0.000000e+00 : f32
    %85 = vector.broadcast %cst_30 : f32 to vector<64x64xf32>
    %86 = arith.select %7, %84, %85 : vector<64x64xi1>, vector<64x64xf32>
    %cst_31 = arith.constant 0.000000e+00 : f32
    %87 = vector.broadcast %cst_31 : f32 to vector<64x64xf32>
    %88 = arith.select %27, %84, %87 : vector<64x64xi1>, vector<64x64xf32>
    %cst_32 = arith.constant dense<0.000000e+00> : vector<64x64xf32>
    %89 = tpu.matmul %81, %86, %cst_32 {dimension_numbers = #tpu.dot_dimension_numbers<[1], [1], [0], [0], [0, 0, 1, 0], [], []>} : vector<64x64xf32>, vector<64x64xf32>, vector<64x64xf32> -> vector<64x64xf32>
    %cst_33 = arith.constant dense<0xFF800000> : vector<64xf32>
    %90 = vector.multi_reduction <maximumf>, %89, %cst_33 [1] : vector<64x64xf32> to vector<64xf32>
    %91 = vector.shape_cast %90 : vector<64xf32> to vector<64x1xf32>
    %92 = vector.broadcast %91 : vector<64x1xf32> to vector<64x64xf32>
    %93 = arith.subf %89, %92 : vector<64x64xf32>
    %94 = math.exp %93 : vector<64x64xf32>
    %cst_34 = arith.constant dense<0.000000e+00> : vector<64xf32>
    %95 = vector.multi_reduction <add>, %94, %cst_34 [1] : vector<64x64xf32> to vector<64xf32>
    %96 = vector.shape_cast %95 : vector<64xf32> to vector<64x1xf32>
    %97 = tpu.reciprocal %96 {approx = true} : vector<64x1xf32> -> vector<64x1xf32>
    %98 = vector.broadcast %97 : vector<64x1xf32> to vector<64x64xf32>
    %99 = arith.mulf %94, %98 : vector<64x64xf32>
    %cst_35 = arith.constant dense<0.000000e+00> : vector<64x64xf32>
    %100 = tpu.matmul %99, %88, %cst_35 {dimension_numbers = #tpu.dot_dimension_numbers<[1], [0], [0], [1], [0, 0, 1, 1], [], []>} : vector<64x64xf32>, vector<64x64xf32>, vector<64x64xf32> -> vector<64x64xf32>
    %cst_36 = arith.constant 0.000000e+00 : f32
    %101 = vector.broadcast %cst_36 : f32 to vector<64x64xf32>
    %102 = arith.select %12, %84, %101 : vector<64x64xi1>, vector<64x64xf32>
    %cst_37 = arith.constant 0.000000e+00 : f32
    %103 = vector.broadcast %cst_37 : f32 to vector<64x64xf32>
    %104 = arith.select %32, %84, %103 : vector<64x64xi1>, vector<64x64xf32>
    %cst_38 = arith.constant dense<0.000000e+00> : vector<64x64xf32>
    %105 = tpu.matmul %81, %102, %cst_38 {dimension_numbers = #tpu.dot_dimension_numbers<[1], [1], [0], [0], [0, 0, 1, 0], [], []>} : vector<64x64xf32>, vector<64x64xf32>, vector<64x64xf32> -> vector<64x64xf32>
    %cst_39 = arith.constant dense<0xFF800000> : vector<64xf32>
    %106 = vector.multi_reduction <maximumf>, %105, %cst_39 [1] : vector<64x64xf32> to vector<64xf32>
    %107 = vector.shape_cast %106 : vector<64xf32> to vector<64x1xf32>
    %108 = vector.broadcast %107 : vector<64x1xf32> to vector<64x64xf32>
    %109 = arith.subf %105, %108 : vector<64x64xf32>
    %110 = math.exp %109 : vector<64x64xf32>
    %cst_40 = arith.constant dense<0.000000e+00> : vector<64xf32>
    %111 = vector.multi_reduction <add>, %110, %cst_40 [1] : vector<64x64xf32> to vector<64xf32>
    %112 = vector.shape_cast %111 : vector<64xf32> to vector<64x1xf32>
    %113 = tpu.reciprocal %112 {approx = true} : vector<64x1xf32> -> vector<64x1xf32>
    %114 = vector.broadcast %113 : vector<64x1xf32> to vector<64x64xf32>
    %115 = arith.mulf %110, %114 : vector<64x64xf32>
    %cst_41 = arith.constant dense<0.000000e+00> : vector<64x64xf32>
    %116 = tpu.matmul %115, %104, %cst_41 {dimension_numbers = #tpu.dot_dimension_numbers<[1], [0], [0], [1], [0, 0, 1, 1], [], []>} : vector<64x64xf32>, vector<64x64xf32>, vector<64x64xf32> -> vector<64x64xf32>
    %117 = arith.addf %100, %116 : vector<64x64xf32>
    %cst_42 = arith.constant 0.000000e+00 : f32
    %118 = vector.broadcast %cst_42 : f32 to vector<64x64xf32>
    %119 = arith.select %17, %84, %118 : vector<64x64xi1>, vector<64x64xf32>
    %cst_43 = arith.constant 0.000000e+00 : f32
    %120 = vector.broadcast %cst_43 : f32 to vector<64x64xf32>
    %121 = arith.select %37, %84, %120 : vector<64x64xi1>, vector<64x64xf32>
    %cst_44 = arith.constant dense<0.000000e+00> : vector<64x64xf32>
    %122 = tpu.matmul %81, %119, %cst_44 {dimension_numbers = #tpu.dot_dimension_numbers<[1], [1], [0], [0], [0, 0, 1, 0], [], []>} : vector<64x64xf32>, vector<64x64xf32>, vector<64x64xf32> -> vector<64x64xf32>
    %cst_45 = arith.constant dense<0xFF800000> : vector<64xf32>
    %123 = vector.multi_reduction <maximumf>, %122, %cst_45 [1] : vector<64x64xf32> to vector<64xf32>
    %124 = vector.shape_cast %123 : vector<64xf32> to vector<64x1xf32>
    %125 = vector.broadcast %124 : vector<64x1xf32> to vector<64x64xf32>
    %126 = arith.subf %122, %125 : vector<64x64xf32>
    %127 = math.exp %126 : vector<64x64xf32>
    %cst_46 = arith.constant dense<0.000000e+00> : vector<64xf32>
    %128 = vector.multi_reduction <add>, %127, %cst_46 [1] : vector<64x64xf32> to vector<64xf32>
    %129 = vector.shape_cast %128 : vector<64xf32> to vector<64x1xf32>
    %130 = tpu.reciprocal %129 {approx = true} : vector<64x1xf32> -> vector<64x1xf32>
    %131 = vector.broadcast %130 : vector<64x1xf32> to vector<64x64xf32>
    %132 = arith.mulf %127, %131 : vector<64x64xf32>
    %cst_47 = arith.constant dense<0.000000e+00> : vector<64x64xf32>
    %133 = tpu.matmul %132, %121, %cst_47 {dimension_numbers = #tpu.dot_dimension_numbers<[1], [0], [0], [1], [0, 0, 1, 1], [], []>} : vector<64x64xf32>, vector<64x64xf32>, vector<64x64xf32> -> vector<64x64xf32>
    %134 = arith.addf %117, %133 : vector<64x64xf32>
    %cst_48 = arith.constant 0.000000e+00 : f32
    %135 = vector.broadcast %cst_48 : f32 to vector<64x64xf32>
    %136 = arith.select %22, %84, %135 : vector<64x64xi1>, vector<64x64xf32>
    %cst_49 = arith.constant 0.000000e+00 : f32
    %137 = vector.broadcast %cst_49 : f32 to vector<64x64xf32>
    %138 = arith.select %42, %84, %137 : vector<64x64xi1>, vector<64x64xf32>
    %cst_50 = arith.constant dense<0.000000e+00> : vector<64x64xf32>
    %139 = tpu.matmul %81, %136, %cst_50 {dimension_numbers = #tpu.dot_dimension_numbers<[1], [1], [0], [0], [0, 0, 1, 0], [], []>} : vector<64x64xf32>, vector<64x64xf32>, vector<64x64xf32> -> vector<64x64xf32>
    %cst_51 = arith.constant dense<0xFF800000> : vector<64xf32>
    %140 = vector.multi_reduction <maximumf>, %139, %cst_51 [1] : vector<64x64xf32> to vector<64xf32>
    %141 = vector.shape_cast %140 : vector<64xf32> to vector<64x1xf32>
    %142 = vector.broadcast %141 : vector<64x1xf32> to vector<64x64xf32>
    %143 = arith.subf %139, %142 : vector<64x64xf32>
    %144 = math.exp %143 : vector<64x64xf32>
    %cst_52 = arith.constant dense<0.000000e+00> : vector<64xf32>
    %145 = vector.multi_reduction <add>, %144, %cst_52 [1] : vector<64x64xf32> to vector<64xf32>
    %146 = vector.shape_cast %145 : vector<64xf32> to vector<64x1xf32>
    %147 = tpu.reciprocal %146 {approx = true} : vector<64x1xf32> -> vector<64x1xf32>
    %148 = vector.broadcast %147 : vector<64x1xf32> to vector<64x64xf32>
    %149 = arith.mulf %144, %148 : vector<64x64xf32>
    %cst_53 = arith.constant dense<0.000000e+00> : vector<64x64xf32>
    %150 = tpu.matmul %149, %138, %cst_53 {dimension_numbers = #tpu.dot_dimension_numbers<[1], [0], [0], [1], [0, 0, 1, 1], [], []>} : vector<64x64xf32>, vector<64x64xf32>, vector<64x64xf32> -> vector<64x64xf32>
    %151 = arith.addf %134, %150 : vector<64x64xf32>
    %cst_54 = arith.constant dense<0.000000e+00> : vector<64x32xf32>
    %152 = tpu.matmul %151, %77, %cst_54 {dimension_numbers = #tpu.dot_dimension_numbers<[1], [0], [0], [1], [0, 0, 1, 1], [], []>} : vector<64x64xf32>, vector<64x32xf32>, vector<64x32xf32> -> vector<64x32xf32>
    %153 = vector.broadcast %78 : vector<1x32xf32> to vector<64x32xf32>
    %154 = arith.addf %152, %153 : vector<64x32xf32>
    %c2 = arith.constant 2 : index
    %c0_55 = arith.constant 0 : index
    %c0_56 = arith.constant 0 : index
    %155 = vector.load %arg2[%c2, %c0_55, %c0_56] : memref<5x32x64xf32, #tpu.memory_space<vmem>>, vector<1x32x64xf32>
    %156 = vector.shape_cast %155 : vector<1x32x64xf32> to vector<32x64xf32>
    %c2_57 = arith.constant 2 : index
    %c0_58 = arith.constant 0 : index
    %157 = vector.load %arg4[%c2_57, %c0_58] : memref<12x64xf32, #tpu.memory_space<vmem>>, vector<1x64xf32>
    %c3 = arith.constant 3 : index
    %c0_59 = arith.constant 0 : index
    %c0_60 = arith.constant 0 : index
    %158 = vector.load %arg2[%c3, %c0_59, %c0_60] : memref<5x32x64xf32, #tpu.memory_space<vmem>>, vector<1x32x64xf32>
    %159 = vector.shape_cast %158 : vector<1x32x64xf32> to vector<32x64xf32>
    %c3_61 = arith.constant 3 : index
    %c0_62 = arith.constant 0 : index
    %160 = vector.load %arg4[%c3_61, %c0_62] : memref<12x64xf32, #tpu.memory_space<vmem>>, vector<1x64xf32>
    %c1_63 = arith.constant 1 : index
    %c0_64 = arith.constant 0 : index
    %c0_65 = arith.constant 0 : index
    %161 = vector.load %arg3[%c1_63, %c0_64, %c0_65] : memref<3x64x32xf32, #tpu.memory_space<vmem>>, vector<1x64x32xf32>
    %162 = vector.shape_cast %161 : vector<1x64x32xf32> to vector<64x32xf32>
    %c10 = arith.constant 10 : index
    %c0_66 = arith.constant 0 : index
    %163 = vector.load %arg4[%c10, %c0_66] : memref<12x64xf32, #tpu.memory_space<vmem>>, vector<1x32xf32>
    %cst_67 = arith.constant dense<0.000000e+00> : vector<64x64xf32>
    %164 = tpu.matmul %69, %156, %cst_67 {dimension_numbers = #tpu.dot_dimension_numbers<[1], [0], [0], [1], [0, 0, 1, 1], [], []>} : vector<64x32xf32>, vector<32x64xf32>, vector<64x64xf32> -> vector<64x64xf32>
    %165 = vector.broadcast %157 : vector<1x64xf32> to vector<64x64xf32>
    %166 = arith.addf %164, %165 : vector<64x64xf32>
    %cst_68 = arith.constant dense<0.000000e+00> : vector<64x64xf32>
    %167 = tpu.matmul %154, %159, %cst_68 {dimension_numbers = #tpu.dot_dimension_numbers<[1], [0], [0], [1], [0, 0, 1, 1], [], []>} : vector<64x32xf32>, vector<32x64xf32>, vector<64x64xf32> -> vector<64x64xf32>
    %168 = vector.broadcast %160 : vector<1x64xf32> to vector<64x64xf32>
    %169 = arith.addf %167, %168 : vector<64x64xf32>
    %cst_69 = arith.constant 0.000000e+00 : f32
    %170 = vector.broadcast %cst_69 : f32 to vector<64x64xf32>
    %171 = arith.select %7, %169, %170 : vector<64x64xi1>, vector<64x64xf32>
    %cst_70 = arith.constant 0.000000e+00 : f32
    %172 = vector.broadcast %cst_70 : f32 to vector<64x64xf32>
    %173 = arith.select %27, %169, %172 : vector<64x64xi1>, vector<64x64xf32>
    %cst_71 = arith.constant dense<0.000000e+00> : vector<64x64xf32>
    %174 = tpu.matmul %166, %171, %cst_71 {dimension_numbers = #tpu.dot_dimension_numbers<[1], [1], [0], [0], [0, 0, 1, 0], [], []>} : vector<64x64xf32>, vector<64x64xf32>, vector<64x64xf32> -> vector<64x64xf32>
    %cst_72 = arith.constant dense<0xFF800000> : vector<64xf32>
    %175 = vector.multi_reduction <maximumf>, %174, %cst_72 [1] : vector<64x64xf32> to vector<64xf32>
    %176 = vector.shape_cast %175 : vector<64xf32> to vector<64x1xf32>
    %177 = vector.broadcast %176 : vector<64x1xf32> to vector<64x64xf32>
    %178 = arith.subf %174, %177 : vector<64x64xf32>
    %179 = math.exp %178 : vector<64x64xf32>
    %cst_73 = arith.constant dense<0.000000e+00> : vector<64xf32>
    %180 = vector.multi_reduction <add>, %179, %cst_73 [1] : vector<64x64xf32> to vector<64xf32>
    %181 = vector.shape_cast %180 : vector<64xf32> to vector<64x1xf32>
    %182 = tpu.reciprocal %181 {approx = true} : vector<64x1xf32> -> vector<64x1xf32>
    %183 = vector.broadcast %182 : vector<64x1xf32> to vector<64x64xf32>
    %184 = arith.mulf %179, %183 : vector<64x64xf32>
    %cst_74 = arith.constant dense<0.000000e+00> : vector<64x64xf32>
    %185 = tpu.matmul %184, %173, %cst_74 {dimension_numbers = #tpu.dot_dimension_numbers<[1], [0], [0], [1], [0, 0, 1, 1], [], []>} : vector<64x64xf32>, vector<64x64xf32>, vector<64x64xf32> -> vector<64x64xf32>
    %cst_75 = arith.constant 0.000000e+00 : f32
    %186 = vector.broadcast %cst_75 : f32 to vector<64x64xf32>
    %187 = arith.select %12, %169, %186 : vector<64x64xi1>, vector<64x64xf32>
    %cst_76 = arith.constant 0.000000e+00 : f32
    %188 = vector.broadcast %cst_76 : f32 to vector<64x64xf32>
    %189 = arith.select %32, %169, %188 : vector<64x64xi1>, vector<64x64xf32>
    %cst_77 = arith.constant dense<0.000000e+00> : vector<64x64xf32>
    %190 = tpu.matmul %166, %187, %cst_77 {dimension_numbers = #tpu.dot_dimension_numbers<[1], [1], [0], [0], [0, 0, 1, 0], [], []>} : vector<64x64xf32>, vector<64x64xf32>, vector<64x64xf32> -> vector<64x64xf32>
    %cst_78 = arith.constant dense<0xFF800000> : vector<64xf32>
    %191 = vector.multi_reduction <maximumf>, %190, %cst_78 [1] : vector<64x64xf32> to vector<64xf32>
    %192 = vector.shape_cast %191 : vector<64xf32> to vector<64x1xf32>
    %193 = vector.broadcast %192 : vector<64x1xf32> to vector<64x64xf32>
    %194 = arith.subf %190, %193 : vector<64x64xf32>
    %195 = math.exp %194 : vector<64x64xf32>
    %cst_79 = arith.constant dense<0.000000e+00> : vector<64xf32>
    %196 = vector.multi_reduction <add>, %195, %cst_79 [1] : vector<64x64xf32> to vector<64xf32>
    %197 = vector.shape_cast %196 : vector<64xf32> to vector<64x1xf32>
    %198 = tpu.reciprocal %197 {approx = true} : vector<64x1xf32> -> vector<64x1xf32>
    %199 = vector.broadcast %198 : vector<64x1xf32> to vector<64x64xf32>
    %200 = arith.mulf %195, %199 : vector<64x64xf32>
    %cst_80 = arith.constant dense<0.000000e+00> : vector<64x64xf32>
    %201 = tpu.matmul %200, %189, %cst_80 {dimension_numbers = #tpu.dot_dimension_numbers<[1], [0], [0], [1], [0, 0, 1, 1], [], []>} : vector<64x64xf32>, vector<64x64xf32>, vector<64x64xf32> -> vector<64x64xf32>
    %202 = arith.addf %185, %201 : vector<64x64xf32>
    %cst_81 = arith.constant 0.000000e+00 : f32
    %203 = vector.broadcast %cst_81 : f32 to vector<64x64xf32>
    %204 = arith.select %17, %169, %203 : vector<64x64xi1>, vector<64x64xf32>
    %cst_82 = arith.constant 0.000000e+00 : f32
    %205 = vector.broadcast %cst_82 : f32 to vector<64x64xf32>
    %206 = arith.select %37, %169, %205 : vector<64x64xi1>, vector<64x64xf32>
    %cst_83 = arith.constant dense<0.000000e+00> : vector<64x64xf32>
    %207 = tpu.matmul %166, %204, %cst_83 {dimension_numbers = #tpu.dot_dimension_numbers<[1], [1], [0], [0], [0, 0, 1, 0], [], []>} : vector<64x64xf32>, vector<64x64xf32>, vector<64x64xf32> -> vector<64x64xf32>
    %cst_84 = arith.constant dense<0xFF800000> : vector<64xf32>
    %208 = vector.multi_reduction <maximumf>, %207, %cst_84 [1] : vector<64x64xf32> to vector<64xf32>
    %209 = vector.shape_cast %208 : vector<64xf32> to vector<64x1xf32>
    %210 = vector.broadcast %209 : vector<64x1xf32> to vector<64x64xf32>
    %211 = arith.subf %207, %210 : vector<64x64xf32>
    %212 = math.exp %211 : vector<64x64xf32>
    %cst_85 = arith.constant dense<0.000000e+00> : vector<64xf32>
    %213 = vector.multi_reduction <add>, %212, %cst_85 [1] : vector<64x64xf32> to vector<64xf32>
    %214 = vector.shape_cast %213 : vector<64xf32> to vector<64x1xf32>
    %215 = tpu.reciprocal %214 {approx = true} : vector<64x1xf32> -> vector<64x1xf32>
    %216 = vector.broadcast %215 : vector<64x1xf32> to vector<64x64xf32>
    %217 = arith.mulf %212, %216 : vector<64x64xf32>
    %cst_86 = arith.constant dense<0.000000e+00> : vector<64x64xf32>
    %218 = tpu.matmul %217, %206, %cst_86 {dimension_numbers = #tpu.dot_dimension_numbers<[1], [0], [0], [1], [0, 0, 1, 1], [], []>} : vector<64x64xf32>, vector<64x64xf32>, vector<64x64xf32> -> vector<64x64xf32>
    %219 = arith.addf %202, %218 : vector<64x64xf32>
    %cst_87 = arith.constant 0.000000e+00 : f32
    %220 = vector.broadcast %cst_87 : f32 to vector<64x64xf32>
    %221 = arith.select %22, %169, %220 : vector<64x64xi1>, vector<64x64xf32>
    %cst_88 = arith.constant 0.000000e+00 : f32
    %222 = vector.broadcast %cst_88 : f32 to vector<64x64xf32>
    %223 = arith.select %42, %169, %222 : vector<64x64xi1>, vector<64x64xf32>
    %cst_89 = arith.constant dense<0.000000e+00> : vector<64x64xf32>
    %224 = tpu.matmul %166, %221, %cst_89 {dimension_numbers = #tpu.dot_dimension_numbers<[1], [1], [0], [0], [0, 0, 1, 0], [], []>} : vector<64x64xf32>, vector<64x64xf32>, vector<64x64xf32> -> vector<64x64xf32>
    %cst_90 = arith.constant dense<0xFF800000> : vector<64xf32>
    %225 = vector.multi_reduction <maximumf>, %224, %cst_90 [1] : vector<64x64xf32> to vector<64xf32>
    %226 = vector.shape_cast %225 : vector<64xf32> to vector<64x1xf32>
    %227 = vector.broadcast %226 : vector<64x1xf32> to vector<64x64xf32>
    %228 = arith.subf %224, %227 : vector<64x64xf32>
    %229 = math.exp %228 : vector<64x64xf32>
    %cst_91 = arith.constant dense<0.000000e+00> : vector<64xf32>
    %230 = vector.multi_reduction <add>, %229, %cst_91 [1] : vector<64x64xf32> to vector<64xf32>
    %231 = vector.shape_cast %230 : vector<64xf32> to vector<64x1xf32>
    %232 = tpu.reciprocal %231 {approx = true} : vector<64x1xf32> -> vector<64x1xf32>
    %233 = vector.broadcast %232 : vector<64x1xf32> to vector<64x64xf32>
    %234 = arith.mulf %229, %233 : vector<64x64xf32>
    %cst_92 = arith.constant dense<0.000000e+00> : vector<64x64xf32>
    %235 = tpu.matmul %234, %223, %cst_92 {dimension_numbers = #tpu.dot_dimension_numbers<[1], [0], [0], [1], [0, 0, 1, 1], [], []>} : vector<64x64xf32>, vector<64x64xf32>, vector<64x64xf32> -> vector<64x64xf32>
    %236 = arith.addf %219, %235 : vector<64x64xf32>
    %cst_93 = arith.constant dense<0.000000e+00> : vector<64x32xf32>
    %237 = tpu.matmul %236, %162, %cst_93 {dimension_numbers = #tpu.dot_dimension_numbers<[1], [0], [0], [1], [0, 0, 1, 1], [], []>} : vector<64x64xf32>, vector<64x32xf32>, vector<64x32xf32> -> vector<64x32xf32>
    %238 = vector.broadcast %163 : vector<1x32xf32> to vector<64x32xf32>
    %239 = arith.addf %237, %238 : vector<64x32xf32>
    %240 = tpu.concatenate %154, %239 in 0 : vector<64x32xf32>, vector<64x32xf32> -> vector<128x32xf32>
    %241 = arith.addf %240, %1 : vector<128x32xf32>
    %c7 = arith.constant 7 : index
    %c0_94 = arith.constant 0 : index
    %242 = vector.load %arg4[%c7, %c0_94] : memref<12x64xf32, #tpu.memory_space<vmem>>, vector<1x32xf32>
    %c8 = arith.constant 8 : index
    %c0_95 = arith.constant 0 : index
    %243 = vector.load %arg4[%c8, %c0_95] : memref<12x64xf32, #tpu.memory_space<vmem>>, vector<1x32xf32>
    %cst_96 = arith.constant dense<0.000000e+00> : vector<128xf32>
    %244 = vector.multi_reduction <add>, %241, %cst_96 [1] : vector<128x32xf32> to vector<128xf32>
    %245 = vector.shape_cast %244 : vector<128xf32> to vector<128x1xf32>
    %cst_97 = arith.constant 3.200000e+01 : f32
    %246 = vector.broadcast %cst_97 : f32 to vector<128x1xf32>
    %247 = arith.divf %245, %246 : vector<128x1xf32>
    %248 = vector.broadcast %247 : vector<128x1xf32> to vector<128x32xf32>
    %249 = arith.subf %241, %248 : vector<128x32xf32>
    %250 = arith.mulf %249, %249 : vector<128x32xf32>
    %cst_98 = arith.constant dense<0.000000e+00> : vector<128xf32>
    %251 = vector.multi_reduction <add>, %250, %cst_98 [1] : vector<128x32xf32> to vector<128xf32>
    %252 = vector.shape_cast %251 : vector<128xf32> to vector<128x1xf32>
    %cst_99 = arith.constant 0.0322580636 : f32
    %253 = vector.broadcast %cst_99 : f32 to vector<128x1xf32>
    %254 = arith.mulf %252, %253 : vector<128x1xf32>
    %255 = math.sqrt %254 : vector<128x1xf32>
    %256 = vector.broadcast %247 : vector<128x1xf32> to vector<128x32xf32>
    %257 = arith.subf %241, %256 : vector<128x32xf32>
    %258 = vector.broadcast %242 : vector<1x32xf32> to vector<128x32xf32>
    %259 = arith.mulf %258, %257 : vector<128x32xf32>
    %cst_100 = arith.constant 9.99999997E-7 : f32
    %260 = vector.broadcast %cst_100 : f32 to vector<128x1xf32>
    %261 = arith.addf %255, %260 : vector<128x1xf32>
    %262 = tpu.reciprocal %261 {approx = true} : vector<128x1xf32> -> vector<128x1xf32>
    %263 = vector.broadcast %262 : vector<128x1xf32> to vector<128x32xf32>
    %264 = arith.mulf %259, %263 : vector<128x32xf32>
    %265 = vector.broadcast %243 : vector<1x32xf32> to vector<128x32xf32>
    %266 = arith.addf %264, %265 : vector<128x32xf32>
    %c4 = arith.constant 4 : index
    %c0_101 = arith.constant 0 : index
    %c0_102 = arith.constant 0 : index
    %267 = vector.load %arg2[%c4, %c0_101, %c0_102] : memref<5x32x64xf32, #tpu.memory_space<vmem>>, vector<1x32x64xf32>
    %268 = vector.shape_cast %267 : vector<1x32x64xf32> to vector<32x64xf32>
    %cst_103 = arith.constant dense<0.000000e+00> : vector<128x64xf32>
    %269 = tpu.matmul %266, %268, %cst_103 {dimension_numbers = #tpu.dot_dimension_numbers<[1], [0], [0], [1], [0, 0, 1, 1], [], []>} : vector<128x32xf32>, vector<32x64xf32>, vector<128x64xf32> -> vector<128x64xf32>
    %c4_104 = arith.constant 4 : index
    %c0_105 = arith.constant 0 : index
    %270 = vector.load %arg4[%c4_104, %c0_105] : memref<12x64xf32, #tpu.memory_space<vmem>>, vector<1x64xf32>
    %271 = vector.broadcast %270 : vector<1x64xf32> to vector<128x64xf32>
    %272 = arith.addf %269, %271 : vector<128x64xf32>
    %cst_106 = arith.constant 5.000000e-01 : f32
    %273 = vector.broadcast %cst_106 : f32 to vector<128x64xf32>
    %274 = arith.mulf %273, %272 : vector<128x64xf32>
    %cst_107 = arith.constant 0.707106769 : f32
    %275 = vector.broadcast %cst_107 : f32 to vector<128x64xf32>
    %276 = arith.mulf %272, %275 : vector<128x64xf32>
    %277 = math.erf %276 : vector<128x64xf32>
    %cst_108 = arith.constant 1.000000e+00 : f32
    %278 = vector.broadcast %cst_108 : f32 to vector<128x64xf32>
    %279 = arith.addf %278, %277 : vector<128x64xf32>
    %280 = arith.mulf %274, %279 : vector<128x64xf32>
    %c2_109 = arith.constant 2 : index
    %c0_110 = arith.constant 0 : index
    %c0_111 = arith.constant 0 : index
    %281 = vector.load %arg3[%c2_109, %c0_110, %c0_111] : memref<3x64x32xf32, #tpu.memory_space<vmem>>, vector<1x64x32xf32>
    %282 = vector.shape_cast %281 : vector<1x64x32xf32> to vector<64x32xf32>
    %cst_112 = arith.constant dense<0.000000e+00> : vector<128x32xf32>
    %283 = tpu.matmul %280, %282, %cst_112 {dimension_numbers = #tpu.dot_dimension_numbers<[1], [0], [0], [1], [0, 0, 1, 1], [], []>} : vector<128x64xf32>, vector<64x32xf32>, vector<128x32xf32> -> vector<128x32xf32>
    %c11 = arith.constant 11 : index
    %c0_113 = arith.constant 0 : index
    %284 = vector.load %arg4[%c11, %c0_113] : memref<12x64xf32, #tpu.memory_space<vmem>>, vector<1x32xf32>
    %285 = vector.broadcast %284 : vector<1x32xf32> to vector<128x32xf32>
    %286 = arith.addf %283, %285 : vector<128x32xf32>
    %287 = arith.addf %266, %286 : vector<128x32xf32>
    %c0_114 = arith.constant 0 : index
    %c0_115 = arith.constant 0 : index
    %c0_116 = arith.constant 0 : index
    %288 = vector.load %arg5[%c0_114, %c0_115, %c0_116] : memref<1x128x32xf32, #tpu.memory_space<vmem>>, vector<1x128x32xf32>
    %289 = vector.shape_cast %288 : vector<1x128x32xf32> to vector<128x32xf32>
    %290 = vector.shape_cast %287 : vector<128x32xf32> to vector<1x128x32xf32>
    tpu.vector_store %arg5[%c0_114, %c0_115, %c0_116], %290 {strides = array<i32>} : memref<1x128x32xf32, #tpu.memory_space<vmem>>, vector<1x128x32xf32>,
    return
  }
  func.func @transform_0(%arg0: i32) -> (i32, i32, i32) {
    %c0_i32 = arith.constant 0 : i32
    %c0_i32_0 = arith.constant 0 : i32
    %c0_i32_1 = arith.constant 0 : i32
    return %arg0, %c0_i32, %c0_i32_0 : i32, i32, i32
  }
  func.func @transform_1(%arg0: i32) -> (i32, i32, i32) {
    %c0_i32 = arith.constant 0 : i32
    %c0_i32_0 = arith.constant 0 : i32
    %c0_i32_1 = arith.constant 0 : i32
    %c0_i32_2 = arith.constant 0 : i32
    return %c0_i32, %c0_i32_0, %c0_i32_1 : i32, i32, i32
  }
  func.func @transform_2(%arg0: i32) -> (i32, i32, i32) {
    %c0_i32 = arith.constant 0 : i32
    %c0_i32_0 = arith.constant 0 : i32
    %c0_i32_1 = arith.constant 0 : i32
    %c0_i32_2 = arith.constant 0 : i32
    return %c0_i32, %c0_i32_0, %c0_i32_1 : i32, i32, i32
  }
  func.func @transform_3(%arg0: i32) -> (i32, i32) {
    %c0_i32 = arith.constant 0 : i32
    %c0_i32_0 = arith.constant 0 : i32
    %c0_i32_1 = arith.constant 0 : i32
    return %c0_i32, %c0_i32_0 : i32, i32
  }
  func.func @transform_4(%arg0: i32) -> (i32, i32, i32) {
    %c0_i32 = arith.constant 0 : i32
    %c0_i32_0 = arith.constant 0 : i32
    %c0_i32_1 = arith.constant 0 : i32
    return %arg0, %c0_i32, %c0_i32_0 : i32, i32, i32
  }
}

</mosaic_0001>

<bundles_post_ra>
// kernel: tpu_custom_call.1
= control target key start
LH: loop header
LB: loop body
LE: loop exit
PB: predicated region body
PF: predicated region fallthrough
CT: control target
= control target key end

     0   :  { %s7774_s15 = smov 0   ;;  %s10318_s0 = inlined_call_operand.vmem [shape: f32[2,128,32], index: 0, kind: input, shape index: {}]   ;;  %s10319_s1 = inlined_call_operand.vmem [shape: f32[5,32,64], index: 1, kind: input, shape index: {}]   ;;  %s10320_s2 = inlined_call_operand.vmem [shape: f32[3,64,32], index: 2, kind: input, shape index: {}]   ;;  %s10321_s3 = inlined_call_operand.vmem [shape: f32[12,64], index: 3, kind: input, shape index: {}]   ;;  %s10322_s4 = inlined_call_operand.vmem [shape: f32[2,128,32], index: 4, kind: output, shape index: {}]  }
   0x1 LB: > { %s5352_s16 = sadd.s32 4294967295, %s7747_s15   ;;  %p5356_p0 = scmp.ge.s32.totalorder %s7747_s15, 1  ;;  %s7747_s15 = sphi %s7774_s15, %s14_s15  }
   0x2   : > { %p162_p1 = scmp.lt.s32.totalorder %s7747_s15, 3 }
   0x4   : > { %p163_p2 = pnand %p5356_p0, %p162_p1 }
   0x6   : > { %166 = sbr.rel (%p163_p2) target bundleno = 3688 (0xe68), region = 36 }
   0xd   : > { %p188_p3 = scmp.lt.s32.totalorder %s5352_s16, 1  ;;  %vm242_vm0 = vcmask 261120  }
   0xf   : > { %s10343_s16 = smov (!%p188_p3, %s5352_s16), 1 }
  0x10   : > { %s5743_s17 = sshll.u32 %s10343_s16, 7 }
  0x11   : > { %s7790_s20 = scalar_lea.vmem %s10318_s0, %s5743_s17  ;;  %s10265_s23 = scalar_lea.vmem %s10322_s4, %s5743_s17 }
  0x12   : > { %v206_v0 = vld [vmem:[%s7790_s20 + $0x40] sm:$0xff]  ;;  %v208_v1 = vld [vmem:[%s7790_s20 + $0x50] sm:$0xff]  ;;  %v207_v2 = vld [vmem:[%s7790_s20 + $0x48] sm:$0xff] }
  0x13   : > { %v267_v3 = vsel %vm242_vm0, %v206_v0, 0.0  ;;  %v273_v4 = vsel %vm242_vm0, %v208_v1, 0.0  ;;  %v209_v5 = vld [vmem:[%s7790_s20 + $0x58] sm:$0xff]  ;;  %v270_v6 = vsel %vm242_vm0, %v207_v2, 0.0  ;;  %v210_v8 = vld [vmem:[%s7790_s20 + $0x60] sm:$0xff]  ;;  %v211_v9 = vld [vmem:[%s7790_s20 + $0x68] sm:$0xff] }
  0x14   : > { %268 = vadd.xlane.f32.xlu0 %v267_v3  ;;  %274 = vadd.xlane.f32.xlu1 %v273_v4  ;;  %v276_v7 = vsel %vm242_vm0, %v209_v5, 0.0  ;;  %v279_v10 = vsel %vm242_vm0, %v210_v8, 0.0  ;;  %v282_v11 = vsel %vm242_vm0, %v211_v9, 0.0  ;;  %v7805_v12 = vld [vmem:[%s7790_s20 + $0x70] sm:$0xff]  ;;  %v7808_v13 = vld [vmem:[%s7790_s20 + $0x78] sm:$0xff]  ;;  %v7815_v16 = vld [vmem:[%s7790_s20] sm:$0xff] }
  0x15   : > { %v285_v14 = vsel %vm242_vm0, %v7805_v12, 0.0  ;;  %v288_v15 = vsel %vm242_vm0, %v7808_v13, 0.0  ;;  %v7818_v17 = vld [vmem:[%s7790_s20 + $0x8] sm:$0xff]  ;;  %v243_v18 = vsel %vm242_vm0, %v7815_v16, 0.0  ;;  %v7825_v20 = vld [vmem:[%s7790_s20 + $0x10] sm:$0xff]  ;;  %v7828_v21 = vld [vmem:[%s7790_s20 + $0x18] sm:$0xff] }
  0x16   : > { %v246_v19 = vsel %vm242_vm0, %v7818_v17, 0.0  ;;  %v249_v22 = vsel %vm242_vm0, %v7825_v20, 0.0  ;;  %v252_v23 = vsel %vm242_vm0, %v7828_v21, 0.0  ;;  %v7835_v24 = vld [vmem:[%s7790_s20 + $0x20] sm:$0xff]  ;;  %v7838_v25 = vld [vmem:[%s7790_s20 + $0x28] sm:$0xff]  ;;  %v7845_v28 = vld [vmem:[%s7790_s20 + $0x30] sm:$0xff] }
  0x17   : > { %v255_v26 = vsel %vm242_vm0, %v7835_v24, 0.0  ;;  %v258_v27 = vsel %vm242_vm0, %v7838_v25, 0.0  ;;  %v7848_v29 = vld [vmem:[%s7790_s20 + $0x38] sm:$0xff]  ;;  %v261_v30 = vsel %vm242_vm0, %v7845_v28, 0.0 }
  0x18   : > { %271 = vadd.xlane.f32.xlu0 %v270_v6  ;;  %277 = vadd.xlane.f32.xlu1 %v276_v7  ;;  %v264_v31 = vsel %vm242_vm0, %v7848_v29, 0.0 }
  0x1c   : > { %280 = vadd.xlane.f32.xlu0 %v279_v10  ;;  %283 = vadd.xlane.f32.xlu1 %v282_v11 }
  0x20   : > { %286 = vadd.xlane.f32.xlu0 %v285_v14  ;;  %289 = vadd.xlane.f32.xlu1 %v288_v15 }
  0x24   : > { %244 = vadd.xlane.f32.xlu0 %v243_v18  ;;  %247 = vadd.xlane.f32.xlu1 %v246_v19 }
  0x28   : > { %250 = vadd.xlane.f32.xlu0 %v249_v22  ;;  %253 = vadd.xlane.f32.xlu1 %v252_v23 }
  0x2c   : > { %256 = vadd.xlane.f32.xlu0 %v255_v26  ;;  %259 = vadd.xlane.f32.xlu1 %v258_v27 }
  0x30   : > { %262 = vadd.xlane.f32.xlu0 %v261_v30  ;;  %265 = vadd.xlane.f32.xlu1 %v264_v31 }
  0xa1   : > { %v269_v32 = vpop.xlane.xlu0 %268  ;;  %v275_v33 = vpop.xlane.xlu1 %274 }
  0xa2   : > { %v300_v34 = vmul.f32 0.03125, %v269_v32  ;;  %v302_v35 = vmul.f32 0.03125, %v275_v33 }
  0xa4   : > { %v7854_v36 = vsub.f32 %v206_v0, %v300_v34  ;;  %v7856_v37 = vsub.f32 %v208_v1, %v302_v35 }
  0xa5   : > { %v272_v38 = vpop.xlane.xlu0 %271  ;;  %v278_v39 = vpop.xlane.xlu1 %277 }
  0xa6   : > { %v301_v40 = vmul.f32 0.03125, %v272_v38  ;;  %v303_v41 = vmul.f32 0.03125, %v278_v39  ;;  %v332_v42 = vmul.f32 %v7854_v36, %v7854_v36  ;;  %v334_v43 = vmul.f32 %v7856_v37, %v7856_v37 }
  0xa8   : > { %v7862_v44 = vsub.f32 %v207_v2, %v301_v40  ;;  %v7864_v45 = vsub.f32 %v209_v5, %v303_v41  ;;  %v364_v46 = vsel %vm242_vm0, %v332_v42, 0.0  ;;  %v370_v51 = vsel %vm242_vm0, %v334_v43, 0.0 }
  0xa9   : > { %v281_v47 = vpop.xlane.xlu0 %280  ;;  %365 = vadd.xlane.f32.xlu0 %v364_v46  ;;  %v284_v48 = vpop.xlane.xlu1 %283 }
  0xaa   : > { %v304_v49 = vmul.f32 0.03125, %v281_v47  ;;  %v305_v50 = vmul.f32 0.03125, %v284_v48  ;;  %v333_v52 = vmul.f32 %v7862_v44, %v7862_v44  ;;  %v335_v53 = vmul.f32 %v7864_v45, %v7864_v45 }
  0xac   : > { %v7872_v54 = vsub.f32 %v210_v8, %v304_v49  ;;  %v7874_v55 = vsub.f32 %v211_v9, %v305_v50  ;;  %v367_v57 = vsel %vm242_vm0, %v333_v52, 0.0  ;;  %v373_v61 = vsel %vm242_vm0, %v335_v53, 0.0  ;;  %v5364_v53 = vld [vmem:[%s10319_s1 + $0x28] sm:$0xff] }
  0xad   : > { %v287_v56 = vpop.xlane.xlu0 %286  ;;  %371 = vadd.xlane.f32.xlu0 %v370_v51  ;;  %v290_v58 = vpop.xlane.xlu1 %289  ;;  %368 = vadd.xlane.f32.xlu1 %v367_v57  ;;  %v5365_v57 = vld [vmem:[%s10319_s1 + $0x30] sm:$0xff] }
  0xae   : > { %v306_v59 = vmul.f32 0.03125, %v287_v56  ;;  %v307_v60 = vmul.f32 0.03125, %v290_v58  ;;  %v336_v62 = vmul.f32 %v7872_v54, %v7872_v54  ;;  %v337_v63 = vmul.f32 %v7874_v55, %v7874_v55  ;;  %v5366_v58 = vld [vmem:[%s10319_s1 + $0x38] sm:$0xff] }
  0xb0   : > { %v7883_v0 = vsub.f32 %v7805_v12, %v306_v59  ;;  %v7886_v1 = vsub.f32 %v7808_v13, %v307_v60  ;;  %v376_v2 = vsel %vm242_vm0, %v336_v62, 0.0  ;;  %v379_v7 = vsel %vm242_vm0, %v337_v63, 0.0  ;;  %v604_v60 = vld [vmem:[%s10319_s1] sm:$0xff]  ;;  %v606_v63 = vld [vmem:[%s10319_s1 + $0x10] sm:$0xff] }
  0xb1   : > { %v245_v3 = vpop.xlane.xlu0 %244  ;;  %v248_v4 = vpop.xlane.xlu1 %247  ;;  %374 = vadd.xlane.f32.xlu1 %v373_v61  ;;  %377 = vadd.xlane.f32.xlu0 %v376_v2  ;;  %v6793_v59 = vpack.c.bf16 %v5366_v58, %v5365_v57  ;;  %v605_v61 = vld [vmem:[%s10319_s1 + $0x8] sm:$0xff]  ;;  %v607_v2 = vld [vmem:[%s10319_s1 + $0x18] sm:$0xff] }
  0xb2   : > { %v292_v5 = vmul.f32 0.03125, %v245_v3  ;;  %v293_v6 = vmul.f32 0.03125, %v248_v4  ;;  %v338_v8 = vmul.f32 %v7883_v0, %v7883_v0  ;;  %v339_v9 = vmul.f32 %v7886_v1, %v7886_v1 }
  0xb3   : > { %v6781_v62 = vpack.c.bf16 %v605_v61, %v604_v60  ;;  %v6785_v3 = vpack.c.bf16 %v607_v2, %v606_v63 }
  0xb4   : > { %v7895_v10 = vsub.f32 %v7815_v16, %v292_v5  ;;  %v7898_v11 = vsub.f32 %v7818_v17, %v293_v6  ;;  %v382_v12 = vsel %vm242_vm0, %v338_v8, 0.0  ;;  %v385_v22 = vsel %vm242_vm0, %v339_v9, 0.0 }
  0xb5   : > { %v251_v13 = vpop.xlane.xlu0 %250  ;;  %v254_v14 = vpop.xlane.xlu1 %253  ;;  %380 = vadd.xlane.f32.xlu1 %v379_v7  ;;  %383 = vadd.xlane.f32.xlu0 %v382_v12 }
  0xb6   : > { %v294_v15 = vmul.f32 0.03125, %v251_v13  ;;  %v295_v18 = vmul.f32 0.03125, %v254_v14  ;;  %v324_v19 = vmul.f32 %v7895_v10, %v7895_v10  ;;  %v325_v16 = vmul.f32 %v7898_v11, %v7898_v11  ;;  %6782 = vmatprep.subr.bf16.mxu0 %v6781_v62 }
  0xb7   : > { %6784 = vmatpush3.bf16.msra.mxu0 %v6781_v62 }
  0xb8   : > { %v7907_v23 = vsub.f32 %v7825_v20, %v294_v15  ;;  %v7910_v17 = vsub.f32 %v7828_v21, %v295_v18  ;;  %v340_v26 = vsel %vm242_vm0, %v324_v19, 0.0  ;;  %v343_v33 = vsel %vm242_vm0, %v325_v16, 0.0  ;;  %6786 = vmatprep.subr.bf16.mxu0 %v6785_v3  ;;  %v7978_v18 = vld [vmem:[%s10321_s3 + $0x5] ss:$0 sm:$0xff] }
  0xb9   : > { %v257_v27 = vpop.xlane.xlu0 %256  ;;  %v260_v30 = vpop.xlane.xlu1 %259  ;;  %386 = vadd.xlane.f32.xlu1 %v385_v22  ;;  %341 = vadd.xlane.f32.xlu0 %v340_v26  ;;  %v7983_v22 = vmul.f32 %v7978_v18, %v7856_v37  ;;  %v8000_v37 = vmul.f32 %v7978_v18, %v7864_v45 }
  0xba   : > { %v296_v31 = vmul.f32 0.03125, %v257_v27  ;;  %v297_v32 = vmul.f32 0.03125, %v260_v30  ;;  %v326_v34 = vmul.f32 %v7907_v23, %v7907_v23  ;;  %v327_v20 = vmul.f32 %v7910_v17, %v7910_v17 }
  0xbb   : > { %6788 = vmatpush3.bf16.msra.mxu0 %v6785_v3 }
  0xbc   : > { %v7919_v35 = vsub.f32 %v7835_v24, %v296_v31  ;;  %v7922_v21 = vsub.f32 %v7838_v25, %v297_v32  ;;  %v346_v38 = vsel %vm242_vm0, %v326_v34, 0.0  ;;  %v349_v43 = vsel %vm242_vm0, %v327_v20, 0.0 }
  0xbd   : > { %v263_v39 = vpop.xlane.xlu0 %262  ;;  %v266_v40 = vpop.xlane.xlu1 %265  ;;  %344 = vadd.xlane.f32.xlu1 %v343_v33  ;;  %347 = vadd.xlane.f32.xlu0 %v346_v38  ;;  %v7992_v32 = vmul.f32 %v7978_v18, %v7854_v36  ;;  %v7996_v33 = vmul.f32 %v7978_v18, %v7862_v44  ;;  %v8004_v34 = vmul.f32 %v7978_v18, %v7872_v54 }
  0xbe   : > { %v298_v41 = vmul.f32 0.03125, %v263_v39  ;;  %v299_v42 = vmul.f32 0.03125, %v266_v40  ;;  %v328_v46 = vmul.f32 %v7919_v35, %v7919_v35  ;;  %v329_v24 = vmul.f32 %v7922_v21, %v7922_v21 }
  0xbf   : > { %v8008_v20 = vmul.f32 %v7978_v18, %v7874_v55 }
  0xc0   : > { %v7931_v47 = vsub.f32 %v7845_v28, %v298_v41  ;;  %v7934_v25 = vsub.f32 %v7848_v29, %v299_v42  ;;  %v352_v48 = vsel %vm242_vm0, %v328_v46, 0.0  ;;  %v355_v50 = vsel %vm242_vm0, %v329_v24, 0.0  ;;  %v5363_v29 = vld [vmem:[%s10319_s1 + $0x20] sm:$0xff] }
  0xc1   : > { %350 = vadd.xlane.f32.xlu1 %v349_v43  ;;  %353 = vadd.xlane.f32.xlu0 %v352_v48  ;;  %v6789_v56 = vpack.c.bf16 %v5364_v53, %v5363_v29 }
  0xc2   : > { %v330_v49 = vmul.f32 %v7931_v47, %v7931_v47  ;;  %v331_v51 = vmul.f32 %v7934_v25, %v7934_v25 }
  0xc3   : > { %6790 = vmatprep.subr.bf16.mxu1 %v6789_v56 }
  0xc4   : > { %v358_v52 = vsel %vm242_vm0, %v330_v49, 0.0  ;;  %v361_v28 = vsel %vm242_vm0, %v331_v51, 0.0  ;;  %6792 = vmatpush3.bf16.msra.mxu1 %v6789_v56 }
  0xc5   : > { %356 = vadd.xlane.f32.xlu1 %v355_v50  ;;  %359 = vadd.xlane.f32.xlu0 %v358_v52 }
  0xc6   : > { %6794 = vmatprep.subr.bf16.mxu1 %v6793_v59 }
  0xc8   : > { %6796 = vmatpush3.bf16.msra.mxu1 %v6793_v59 }
  0xc9   : > { %362 = vadd.xlane.f32.xlu1 %v361_v28 }
 0x136   : > { %v366_v4 = vpop.xlane.xlu0 %365 }
 0x137   : > { %v396_v5 = vmul.f32 0.032258064, %v366_v4 }
 0x139   : > { %7309 = vrsqrt.f32 %v396_v5  ;;  %vm462_vm1 = vcmp.eq.f32.partialorder %v396_v5, inf  ;;  %vm464_vm2 = vcmp.eq.f32.partialorder %v396_v5, 0.0  ;;  %v465_v36 = vand.u32 2147483648, %v396_v5 }
 0x13a   : > { %v372_v6 = vpop.xlane.xlu0 %371  ;;  %v369_v7 = vpop.xlane.xlu1 %368 }
 0x13b   : > { %v7968_v8 = vmul.f32 0.032258064, %v372_v6  ;;  %v397_v9 = vmul.f32 0.032258064, %v369_v7 }
 0x13d   : > { %7311 = vrsqrt.f32 %v7968_v8  ;;  %vm476_vm3 = vcmp.eq.f32.partialorder %v7968_v8, inf  ;;  %vm478_vm4 = vcmp.eq.f32.partialorder %v7968_v8, 0.0  ;;  %v479_v44 = vand.u32 2147483648, %v7968_v8 }
 0x13e   : > { %7313 = vrsqrt.f32 %v397_v9  ;;  %v375_v12 = vpop.xlane.xlu1 %374  ;;  %v378_v13 = vpop.xlane.xlu0 %377  ;;  %vm469_vm5 = vcmp.eq.f32.partialorder %v397_v9, inf  ;;  %vm471_vm6 = vcmp.eq.f32.partialorder %v397_v9, 0.0  ;;  %v472_v24 = vand.u32 2147483648, %v397_v9 }
 0x13f   : > { %v7971_v14 = vmul.f32 0.032258064, %v375_v12  ;;  %v7973_v15 = vmul.f32 0.032258064, %v378_v13 }
 0x141   : > { %7315 = vrsqrt.f32 %v7971_v14  ;;  %vm483_vm7 = vcmp.eq.f32.partialorder %v7971_v14, inf  ;;  %vm485_vm8 = vcmp.eq.f32.partialorder %v7971_v14, 0.0  ;;  %v486_v29 = vand.u32 2147483648, %v7971_v14 }
 0x142   : > { %7317 = vrsqrt.f32 %v7973_v15  ;;  %v381_v16 = vpop.xlane.xlu1 %380  ;;  %v384_v26 = vpop.xlane.xlu0 %383  ;;  %vm490_vm9 = vcmp.eq.f32.partialorder %v7973_v15, inf  ;;  %v493_v61 = vand.u32 2147483648, %v7973_v15  ;;  %vm492_vm12 = vcmp.eq.f32.partialorder %v7973_v15, 0.0 }
 0x143   : > { %v7310_v19 = vpop.eup %7309  ;;  %v7986_v30 = vmul.f32 0.032258064, %v381_v16  ;;  %v7988_v31 = vmul.f32 0.032258064, %v384_v26 }
 0x144   : > { %v461_v27 = vmul.f32 %v7310_v19, %v396_v5 }
 0x145   : > { %7319 = vrsqrt.f32 %v7986_v30  ;;  %vm497_vm10 = vcmp.eq.f32.partialorder %v7986_v30, inf  ;;  %v500_v2 = vand.u32 2147483648, %v7986_v30  ;;  %vm504_vm11 = vcmp.eq.f32.partialorder %v7988_v31, inf }
 0x146   : > { %7321 = vrsqrt.f32 %v7988_v31  ;;  %v387_v45 = vpop.xlane.xlu1 %386  ;;  %v342_v54 = vpop.xlane.xlu0 %341  ;;  %v463_v42 = vsel %vm462_vm1, %v396_v5, %v461_v27  ;;  %vm499_vm13 = vcmp.eq.f32.partialorder %v7986_v30, 0.0  ;;  %v507_v7 = vand.u32 2147483648, %v7988_v31 }
 0x147   : > { %v7312_v38 = vpop.eup %7311  ;;  %v8016_v40 = vmul.f32 0.032258064, %v387_v45  ;;  %v8018_v41 = vmul.f32 0.032258064, %v342_v54  ;;  %v466_v46 = vsel %vm464_vm2, %v465_v36, %v463_v42  ;;  %vm506_vm15 = vcmp.eq.f32.partialorder %v7988_v31, 0.0 }
 0x148   : > { %v7314_v39 = vpop.eup %7313  ;;  %v475_v55 = vmul.f32 %v7312_v38, %v7968_v8  ;;  %v544_v52 = vadd.f32 1e-06, %v466_v46 }
 0x149   : > { %v468_v43 = vmul.f32 %v7314_v39, %v397_v9  ;;  %7323 = vrsqrt.f32 %v8016_v40  ;;  %vm511_vm14 = vcmp.eq.f32.partialorder %v8016_v40, inf  ;;  %v514_v12 = vand.u32 2147483648, %v8016_v40 }
 0x14a   : > { %v477_v49 = vsel %vm476_vm3, %v7968_v8, %v475_v55  ;;  %7325 = vrsqrt.f32 %v8018_v41  ;;  %v345_v50 = vpop.xlane.xlu1 %344  ;;  %v348_v51 = vpop.xlane.xlu0 %347 }
 0x14b   : > { %v470_v48 = vsel %vm469_vm5, %v397_v9, %v468_v43  ;;  %v7316_v28 = vpop.eup %7315  ;;  %v8029_v53 = vmul.f32 0.032258064, %v345_v50  ;;  %v8031_v56 = vmul.f32 0.032258064, %v348_v51  ;;  %7327 = vrcp.f32 %v544_v52 }
 0x14c   : > { %v473_v57 = vsel %vm471_vm6, %v472_v24, %v470_v48  ;;  %v7318_v58 = vpop.eup %7317  ;;  %v482_v59 = vmul.f32 %v7316_v28, %v7971_v14  ;;  %v480_v62 = vsel %vm478_vm4, %v479_v44, %v477_v49  ;;  %vm513_vm4 = vcmp.eq.f32.partialorder %v8016_v40, 0.0 }
 0x14d   : > { %v545_v60 = vadd.f32 1e-06, %v473_v57  ;;  %7329 = vrsqrt.f32 %v8029_v53  ;;  %v489_v6 = vmul.f32 %v7318_v58, %v7973_v15  ;;  %v546_v19 = vadd.f32 1e-06, %v480_v62 }
 0x14e   : > { %v484_v63 = vsel %vm483_vm7, %v7971_v14, %v482_v59  ;;  %7331 = vrsqrt.f32 %v8031_v56  ;;  %v351_v3 = vpop.xlane.xlu1 %350  ;;  %v354_v4 = vpop.xlane.xlu0 %353  ;;  %vm413_vm1 = vcmp.eq.f32.partialorder %v8029_v53, inf  ;;  %v416_v36 = vand.u32 2147483648, %v8029_v53 }
 0x14f   : > { %v7320_v5 = vpop.eup %7319  ;;  %v8052_v8 = vmul.f32 0.032258064, %v351_v3  ;;  %v8056_v13 = vmul.f32 0.032258064, %v354_v4  ;;  %7333 = vrcp.f32 %v545_v60  ;;  %v487_v26 = vsel %vm485_vm8, %v486_v29, %v484_v63  ;;  %v8103_v60 = vld [vmem:[%s10321_s3 + $0x6] ss:$0 sm:$0xff] }
 0x150   : > { %v7322_v9 = vpop.eup %7321  ;;  %v496_v16 = vmul.f32 %v7320_v5, %v7986_v30  ;;  %vm420_vm2 = vcmp.eq.f32.partialorder %v8031_v56, inf  ;;  %v491_v54 = vsel %vm490_vm9, %v7973_v15, %v489_v6  ;;  %v423_v39 = vand.u32 2147483648, %v8031_v56 }
 0x151   : > { %7335 = vrsqrt.f32 %v8052_v8  ;;  %v503_v27 = vmul.f32 %v7322_v9, %v7988_v31  ;;  %vm427_vm3 = vcmp.eq.f32.partialorder %v8052_v8, inf  ;;  %vm415_vm5 = vcmp.eq.f32.partialorder %v8029_v53, 0.0 }
 0x152   : > { %7337 = vrsqrt.f32 %v8056_v13  ;;  %v357_v38 = vpop.xlane.xlu1 %356  ;;  %v360_v44 = vpop.xlane.xlu0 %359  ;;  %v547_v46 = vadd.f32 1e-06, %v487_v26  ;;  %v498_v24 = vsel %vm497_vm10, %v7986_v30, %v496_v16  ;;  %v430_v48 = vand.u32 2147483648, %v8052_v8 }
 0x153   : > { %v7324_v45 = vpop.eup %7323  ;;  %v8072_v14 = vmul.f32 0.032258064, %v357_v38  ;;  %v8077_v43 = vmul.f32 0.032258064, %v360_v44  ;;  %7339 = vrcp.f32 %v546_v19  ;;  %vm434_vm6 = vcmp.eq.f32.partialorder %v8056_v13, inf }
 0x154   : > { %v7326_v55 = vpop.eup %7325  ;;  %v510_v42 = vmul.f32 %v7324_v45, %v8016_v40  ;;  %v505_v50 = vsel %vm504_vm11, %v7988_v31, %v503_v27  ;;  %vm422_vm7 = vcmp.eq.f32.partialorder %v8031_v56, 0.0  ;;  %v437_v52 = vand.u32 2147483648, %v8056_v13 }
 0x155   : > { %7341 = vrsqrt.f32 %v8072_v14  ;;  %v7328_v49 = vpop.eup %7327  ;;  %v405_v51 = vmul.f32 %v7326_v55, %v8018_v41  ;;  %vm429_vm8 = vcmp.eq.f32.partialorder %v8052_v8, 0.0  ;;  %vm441_vm9 = vcmp.eq.f32.partialorder %v8072_v14, inf }
 0x156   : > { %7343 = vrsqrt.f32 %v8077_v43  ;;  %v363_v28 = vpop.xlane.xlu1 %362  ;;  %v512_v57 = vsel %vm511_vm14, %v8016_v40, %v510_v42  ;;  %v444_v58 = vand.u32 2147483648, %v8072_v14  ;;  %v576_v62 = vmul.f32 %v7328_v49, %v7992_v32 }
 0x157   : > { %v7330_v29 = vpop.eup %7329  ;;  %v8098_v59 = vmul.f32 0.032258064, %v363_v28  ;;  %7345 = vrcp.f32 %v547_v46  ;;  %v494_v4 = vsel %vm492_vm12, %v493_v61, %v491_v54  ;;  %v501_v5 = vsel %vm499_vm13, %v500_v2, %v498_v24 }
 0x158   : > { %v7332_v63 = vpop.eup %7331  ;;  %v412_v3 = vmul.f32 %v7330_v29, %v8029_v53  ;;  %vm436_vm10 = vcmp.eq.f32.partialorder %v8056_v13, 0.0  ;;  %vm443_vm11 = vcmp.eq.f32.partialorder %v8072_v14, 0.0  ;;  %vm448_vm14 = vcmp.eq.f32.partialorder %v8077_v43, inf }
 0x159   : > { %v419_v6 = vmul.f32 %v7332_v63, %v8031_v56  ;;  %v451_v32 = vand.u32 2147483648, %v8077_v43  ;;  %7347 = vrsqrt.f32 %v8098_v59  ;;  %v7334_v9 = vpop.eup %7333  ;;  %v458_v30 = vand.u32 2147483648, %v8098_v59 }
 0x15a   : > { %v414_v15 = vsel %vm413_vm1, %v8029_v53, %v412_v3  ;;  %v8126_v61 = vadd.f32 %v8103_v60, %v576_v62  ;;  %v548_v2 = vadd.f32 1e-06, %v494_v4  ;;  %vm450_vm12 = vcmp.eq.f32.partialorder %v8077_v43, 0.0 }
 0x15b   : > { %v7336_v19 = vpop.eup %7335  ;;  %v421_v16 = vsel %vm420_vm2, %v8031_v56, %v419_v6  ;;  %vm455_vm13 = vcmp.eq.f32.partialorder %v8098_v59, inf  ;;  %v577_v26 = vmul.f32 %v7334_v9, %v7996_v33  ;;  %v549_v27 = vadd.f32 1e-06, %v501_v5 }
 0x15c   : > { %v508_v38 = vsel %vm506_vm15, %v507_v7, %v505_v50  ;;  %v7338_v44 = vpop.eup %7337  ;;  %v426_v45 = vmul.f32 %v7336_v19, %v8052_v8  ;;  %vm457_vm1 = vcmp.eq.f32.partialorder %v8098_v59, 0.0  ;;  %6153 = vmatprep.mubr.msk.f32.mxu1 %vm242_vm0, %v8126_v61  ;;  %7349 = vrcp.f32 %v548_v2 }
 0x15d   : > { %v550_v54 = vadd.f32 1e-06, %v508_v38  ;;  %vm406_vm2 = vcmp.eq.f32.partialorder %v8018_v41, inf  ;;  %v433_v33 = vmul.f32 %v7338_v44, %v8056_v13  ;;  %v8145_v55 = vadd.f32 %v8103_v60, %v577_v26  ;;  %v7340_v7 = vpop.eup %7339 }
 0x15e   : > { %7351 = vrcp.f32 %v549_v27  ;;  %v407_v31 = vsel %vm406_vm2, %v8018_v41, %v405_v51  ;;  %v428_v42 = vsel %vm427_vm3, %v8052_v8, %v426_v45  ;;  %vm408_vm15 = vcmp.eq.f32.partialorder %v8018_v41, 0.0 }
 0x15f   : > { %7353 = vrcp.f32 %v550_v54  ;;  %v409_v46 = vand.u32 2147483648, %v8018_v41  ;;  %v7342_v24 = vpop.eup %7341  ;;  %v435_v49 = vsel %vm434_vm6, %v8056_v13, %v433_v33  ;;  %6154 = vmatmul.mubr.msk.f32.vlgmr.msra.gmra.mrb[0].mxu1 %vm242_vm0, %v8145_v55  ;;  %v578_v50 = vmul.f32 %v7340_v7, %v7983_v22 }
 0x160   : > { %v515_v51 = vsel %vm513_vm4, %v514_v12, %v512_v57  ;;  %v417_v41 = vsel %vm415_vm5, %v416_v36, %v414_v15  ;;  %v7344_v28 = vpop.eup %7343  ;;  %v440_v29 = vmul.f32 %v7342_v24, %v8072_v14  ;;  %v424_v40 = vsel %vm422_vm7, %v423_v39, %v421_v16 }
 0x161   : > { %v410_v62 = vsel %vm408_vm15, %v409_v46, %v407_v31  ;;  %v551_v63 = vadd.f32 1e-06, %v515_v51  ;;  %v537_v3 = vadd.f32 1e-06, %v417_v41  ;;  %v447_v4 = vmul.f32 %v7344_v28, %v8077_v43  ;;  %v7346_v12 = vpop.eup %7345 }
 0x162   : > { %v8170_v22 = vadd.f32 %v8103_v60, %v578_v50  ;;  %v536_v5 = vadd.f32 1e-06, %v410_v62  ;;  %v442_v53 = vsel %vm441_vm9, %v8072_v14, %v440_v29  ;;  %v538_v36 = vadd.f32 1e-06, %v424_v40 }
 0x163   : > { %7355 = vrcp.f32 %v551_v63  ;;  %v431_v57 = vsel %vm429_vm8, %v430_v48, %v428_v42  ;;  %v7348_v6 = vpop.eup %7347  ;;  %v449_v9 = vsel %vm448_vm14, %v8077_v43, %v447_v4  ;;  %v579_v56 = vmul.f32 %v7346_v12, %v8000_v37 }
 0x164   : > { %6156 = vmatprep.mubr.msk.f32.mxu1 %vm242_vm0, %v8170_v22  ;;  %7357 = vrcp.f32 %v536_v5  ;;  %v539_v39 = vadd.f32 1e-06, %v431_v57  ;;  %v454_v15 = vmul.f32 %v7348_v6, %v8098_v59  ;;  %v438_v8 = vsel %vm436_vm10, %v437_v52, %v435_v49 }
 0x165   : > { %7359 = vrcp.f32 %v537_v3  ;;  %v445_v48 = vsel %vm443_vm11, %v444_v58, %v442_v53  ;;  %v8199_v2 = vadd.f32 %v8103_v60, %v579_v56  ;;  %v540_v37 = vadd.f32 1e-06, %v438_v8 }
 0x166   : > { %7361 = vrcp.f32 %v538_v36  ;;  %v541_v19 = vadd.f32 1e-06, %v445_v48  ;;  %v7350_v16 = vpop.eup %7349  ;;  %v534_v26 = vmul.f32 %v7978_v18, %v7883_v0  ;;  %v456_v13 = vsel %vm455_vm13, %v8098_v59, %v454_v15 }
 0x167   : > { %7363 = vrcp.f32 %v539_v39  ;;  %v452_v14 = vsel %vm450_vm12, %v451_v32, %v449_v9  ;;  %6157 = vmatmul.mubr.msk.f32.gmra.mrb[2].mxu1 %vm242_vm0, %v8199_v2  ;;  %v580_v58 = vmul.f32 %v7350_v16, %v8004_v34  ;;  %v459_v0 = vsel %vm457_vm1, %v458_v30, %v456_v13 }
 0x168   : > { %v7352_v52 = vpop.eup %7351  ;;  %7365 = vrcp.f32 %v540_v37  ;;  %v542_v27 = vadd.f32 1e-06, %v452_v14  ;;  %v543_v45 = vadd.f32 1e-06, %v459_v0  ;;  %v535_v34 = vmul.f32 %v7978_v18, %v7886_v1 }
 0x169   : > { %v7354_v38 = vpop.eup %7353  ;;  %v581_v44 = vmul.f32 %v7352_v52, %v8008_v20  ;;  %7367 = vrcp.f32 %v541_v19  ;;  %v8219_v43 = vadd.f32 %v8103_v60, %v580_v58  ;;  %v520_v30 = vmul.f32 %v7978_v18, %v7895_v10 }
 0x16a   : > { %v582_v32 = vmul.f32 %v7354_v38, %v534_v26  ;;  %7369 = vrcp.f32 %v542_v27  ;;  %v521_v31 = vmul.f32 %v7978_v18, %v7898_v11  ;;  %v522_v42 = vmul.f32 %v7978_v18, %v7907_v23 }
 0x16b   : > { %v8222_v54 = vadd.f32 %v8103_v60, %v581_v44  ;;  %7371 = vrcp.f32 %v543_v45  ;;  %6159 = vmatprep.mubr.msk.f32.mxu1 %vm242_vm0, %v8219_v43  ;;  %v523_v49 = vmul.f32 %v7978_v18, %v7910_v17  ;;  %v524_v11 = vmul.f32 %v7978_v18, %v7919_v35 }
 0x16c   : > { %v8229_v59 = vadd.f32 %v8103_v60, %v582_v32  ;;  %v525_v23 = vmul.f32 %v7978_v18, %v7922_v21  ;;  %v526_v3 = vmul.f32 %v7978_v18, %v7931_v47  ;;  %v527_v47 = vmul.f32 %v7978_v18, %v7934_v25  ;;  %v8283_v25 = vld [vmem:[%s10321_s3 + $0x1] ss:$0 sm:$0xff] }
 0x16d   : > { %v7356_v20 = vpop.eup %7355  ;;  %6160 = vmatmul.mubr.msk.f32.gmra.mrb[4].mxu1 %vm242_vm0, %v8222_v54  ;;  %v214_v39 = vlaneseq  ;;  %vm906_vm12 = vcmask 523264  }
 0x16e   : > { %v7358_v33 = vpop.eup %7357  ;;  %6162 = vmatprep.mubr.msk.f32.mxu1 %vm242_vm0, %v8229_v59  ;;  %v583_v1 = vmul.f32 %v7356_v20, %v535_v34  ;;  %vm8314_vm13 = vmpackc.low %vm906_vm12, %vm906_vm12 }
 0x16f   : > { %v7360_v7 = vpop.eup %7359  ;;  %v568_v46 = vmul.f32 %v7358_v33, %v520_v30  ;;  %v8272_v15 = vand.u32 127, %v214_v39 }
 0x170   : > { %v7362_v24 = vpop.eup %7361  ;;  %v8244_v50 = vadd.f32 %v8103_v60, %v583_v1  ;;  %v569_v10 = vmul.f32 %v7360_v7, %v521_v31 }
 0x171   : > { %v7364_v51 = vpop.eup %7363  ;;  %v588_v41 = vadd.f32 %v8103_v60, %v568_v46  ;;  %v570_v28 = vmul.f32 %v7362_v24, %v522_v42  ;;  %vm219_vm3 = vcmp.ge.s32.totalorder %v8272_v15, 8  ;;  %vm220_vm4 = vcmp.lt.s32.totalorder %v8272_v15, 16 }
 0x172   : > { %v7366_v29 = vpop.eup %7365  ;;  %6163 = vmatmul.mubr.msk.f32.gmra.mrb[6].mxu1 %vm242_vm0, %v8244_v50  ;;  %v589_v17 = vadd.f32 %v8103_v60, %v569_v10  ;;  %v571_v62 = vmul.f32 %v7364_v51, %v523_v49  ;;  %vm222_vm5 = vcmp.ge.s32.totalorder %v8272_v15, 16  ;;  %vm223_vm6 = vcmp.lt.s32.totalorder %v8272_v15, 24  ;;  %vm8285_vm9 = vmand %vm219_vm3, %vm220_vm4 }
 0x173   : > { %v7368_v63 = vpop.eup %7367  ;;  %6133 = vmatprep.mubr.msk.f32.mxu0 %vm242_vm0, %v588_v41  ;;  %v590_v35 = vadd.f32 %v8103_v60, %v570_v28  ;;  %v572_v4 = vmul.f32 %v7366_v29, %v524_v11  ;;  %vm225_vm7 = vcmp.ge.s32.totalorder %v8272_v15, 24  ;;  %vm226_vm8 = vcmp.lt.s32.totalorder %v8272_v15, 32  ;;  %vm8289_vm10 = vmand %vm222_vm5, %vm223_vm6 }
 0x174   : > { %v7370_v5 = vpop.eup %7369  ;;  %6134 = vmatmul.mubr.msk.f32.vlgmr.msra.gmra.mrb[0].mxu0 %vm242_vm0, %v589_v17  ;;  %v591_v21 = vadd.f32 %v8103_v60, %v571_v62  ;;  %v573_v40 = vmul.f32 %v7368_v63, %v525_v23  ;;  %vm217_vm11 = vcmp.lt.s32.totalorder %v8272_v15, 8  ;;  %vm8294_vm14 = vmand %vm225_vm7, %vm226_vm8  ;;  %vm231_vm1 = vcmp.ge.s32.totalorder %v8272_v15, 40 }
 0x175   : > { %v7372_v12 = vpop.eup %7371  ;;  %6136 = vmatprep.mubr.msk.f32.mxu0 %vm242_vm0, %v590_v35  ;;  %v592_v53 = vadd.f32 %v8103_v60, %v572_v4  ;;  %v574_v36 = vmul.f32 %v7370_v5, %v526_v3  ;;  %vm232_vm2 = vcmp.lt.s32.totalorder %v8272_v15, 48  ;;  %vm228_vm4 = vcmp.ge.s32.totalorder %v8272_v15, 32 }
 0x176   : > { %v593_v57 = vadd.f32 %v8103_v60, %v573_v40  ;;  %v575_v6 = vmul.f32 %v7372_v12, %v527_v47  ;;  %vm233_vm15 = vmand %vm231_vm1, %vm232_vm2  ;;  %vm229_vm5 = vcmp.lt.s32.totalorder %v8272_v15, 40  ;;  %vm234_vm8 = vcmp.ge.s32.totalorder %v8272_v15, 48 }
 0x177   : > { %v594_v9 = vadd.f32 %v8103_v60, %v574_v36  ;;  %vm8440_vm3 = vmpackc.low %vm233_vm15, %vm233_vm15  ;;  %vm235_vm1 = vcmp.lt.s32.totalorder %v8272_v15, 56 }
 0x178   : > { %6137 = vmatmul.mubr.msk.f32.gmra.mrb[2].mxu0 %vm242_vm0, %v591_v21  ;;  %v595_v56 = vadd.f32 %v8103_v60, %v575_v6  ;;  %vm230_vm6 = vmand %vm228_vm4, %vm229_vm5  ;;  %vm237_vm4 = vcmp.ge.s32.totalorder %v8272_v15, 56  ;;  %vm238_vm5 = vcmp.lt.s32.totalorder %v8272_v15, 64 }
 0x179   : > { %6139 = vmatprep.mubr.msk.f32.mxu0 %vm242_vm0, %v592_v53  ;;  %vm8515_vm7 = vmpackc.low %vm230_vm6, %vm230_vm6 }
 0x17a   : > { %vm236_vm2 = vmand %vm234_vm8, %vm235_vm1 }
 0x17b   : > { %vm8950_vm15 = vmpackc.low %vm236_vm2, %vm236_vm2 }
 0x17c   : > { %6140 = vmatmul.mubr.msk.f32.gmra.mrb[4].mxu0 %vm242_vm0, %v593_v57  ;;  %vm239_vm6 = vmand %vm237_vm4, %vm238_vm5 }
 0x17d   : > { %6142 = vmatprep.mubr.msk.f32.mxu0 %vm242_vm0, %v594_v9  ;;  %vm8996_vm8 = vmpackc.low %vm239_vm6, %vm239_vm6 }
 0x180   : > { %6143 = vmatmul.mubr.msk.f32.gmra.mrb[6].mxu0 %vm242_vm0, %v595_v56 }
 0x232   : > { %v6155_v8 = vpop.f32.mrb[0].mxu1 }
 0x233   : > { %v857_v37 = vadd.f32 %v6155_v8, %v8283_v25  ;;  %v851_v19 = vpop.f32.mrb[1].mxu1 }
 0x234   : > { %v852_v16 = vadd.f32 %v8283_v25, %v851_v19 }
 0x235   : > { %v891_v26 = vsel %vm217_vm11, %v857_v37, 0.0  ;;  %v1149_v13 = vsel %vm8285_vm9, %v857_v37, 0.0  ;;  %v1640_v14 = vsel %vm8289_vm10, %v857_v37, 0.0  ;;  %v2010_v52 = vsel %vm8294_vm14, %v857_v37, 0.0 }
 0x236   : > { %v8308_v58 = vpack.c.bf16 %v857_v37, %v852_v16  ;;  %v890_v27 = vsel %vm217_vm11, %v852_v16, 0.0  ;;  %v1148_v38 = vsel %vm8285_vm9, %v852_v16, 0.0  ;;  %v1639_v44 = vsel %vm8289_vm10, %v852_v16, 0.0 }
 0x237   : > { %v6797_v45 = vpack.c.bf16 %v891_v26, %v890_v27  ;;  %v6821_v32 = vpack.c.bf16 %v1149_v13, %v1148_v38  ;;  %v8322_v34 = vpack.c.bf16 %v1640_v14, %v1639_v44  ;;  %v2009_v20 = vsel %vm8294_vm14, %v852_v16, 0.0  ;;  %v8394_v16 = vld [vmem:[%s10321_s3] ss:$0 sm:$0xff] }
 0x238   : > { %v8326_v30 = vpack.c.bf16 %v2010_v52, %v2009_v20 }
 0x239   : > { %6799 = vmatprep.subr.msk.bf16.mxu0 %vm8314_vm13, %v6797_v45  ;;  %6823 = vmatprep.subr.msk.bf16.mxu1 %vm8314_vm13, %v6821_v32 }
 0x23a   : > { %v6158_v33 = vpop.f32.mrb[2].mxu1  ;;  %6802 = vmatpush3.bf16.xpose.msk.msra.mxu0 %vm8314_vm13, %v6797_v45  ;;  %6826 = vmatpush3.bf16.xpose.msk.msra.mxu1 %vm8314_vm13, %v6821_v32 }
 0x23b   : > { %v867_v31 = vadd.f32 %v6158_v33, %v8283_v25  ;;  %v861_v1 = vpop.f32.mrb[3].mxu1 }
 0x23c   : > { %v862_v7 = vadd.f32 %v8283_v25, %v861_v1 }
 0x23d   : > { %v893_v42 = vsel %vm217_vm11, %v867_v31, 0.0  ;;  %v1151_v46 = vsel %vm8285_vm9, %v867_v31, 0.0  ;;  %v1642_v24 = vsel %vm8289_vm10, %v867_v31, 0.0  ;;  %v2012_v49 = vsel %vm8294_vm14, %v867_v31, 0.0 }
 0x23e   : > { %v8346_v10 = vpack.c.bf16 %v867_v31, %v862_v7  ;;  %v892_v51 = vsel %vm217_vm11, %v862_v7, 0.0  ;;  %v1150_v11 = vsel %vm8285_vm9, %v862_v7, 0.0  ;;  %v1641_v41 = vsel %vm8289_vm10, %v862_v7, 0.0 }
 0x23f   : > { %v6803_v29 = vpack.c.bf16 %v893_v42, %v892_v51  ;;  %v6827_v23 = vpack.c.bf16 %v1151_v46, %v1150_v11  ;;  %v8354_v17 = vpack.c.bf16 %v1642_v24, %v1641_v41  ;;  %v2011_v62 = vsel %vm8294_vm14, %v862_v7, 0.0 }
 0x240   : > { %v6161_v28 = vpop.f32.mrb[4].mxu1  ;;  %v8359_v35 = vpack.c.bf16 %v2012_v49, %v2011_v62 }
 0x241   : > { %v877_v63 = vadd.f32 %v6161_v28, %v8283_v25  ;;  %v871_v3 = vpop.f32.mrb[5].mxu1  ;;  %6805 = vmatprep.subr.msk.bf16.mxu0 %vm8314_vm13, %v6803_v29  ;;  %6829 = vmatprep.subr.msk.bf16.mxu1 %vm8314_vm13, %v6827_v23 }
 0x242   : > { %v872_v4 = vadd.f32 %v8283_v25, %v871_v3  ;;  %6808 = vmatpush3.bf16.xpose.msk.msra.mxu0 %vm8314_vm13, %v6803_v29  ;;  %6832 = vmatpush3.bf16.xpose.msk.msra.mxu1 %vm8314_vm13, %v6827_v23 }
 0x243   : > { %v895_v5 = vsel %vm217_vm11, %v877_v63, 0.0  ;;  %v1153_v21 = vsel %vm8285_vm9, %v877_v63, 0.0  ;;  %v1644_v40 = vsel %vm8289_vm10, %v877_v63, 0.0  ;;  %v2014_v12 = vsel %vm8294_vm14, %v877_v63, 0.0 }
 0x244   : > { %v8378_v53 = vpack.c.bf16 %v877_v63, %v872_v4  ;;  %v894_v36 = vsel %vm217_vm11, %v872_v4, 0.0  ;;  %v1152_v47 = vsel %vm8285_vm9, %v872_v4, 0.0  ;;  %v1643_v57 = vsel %vm8289_vm10, %v872_v4, 0.0 }
 0x245   : > { %v6164_v6 = vpop.f32.mrb[6].mxu1  ;;  %v6809_v9 = vpack.c.bf16 %v895_v5, %v894_v36  ;;  %v6833_v56 = vpack.c.bf16 %v1153_v21, %v1152_v47  ;;  %v8386_v39 = vpack.c.bf16 %v1644_v40, %v1643_v57  ;;  %v2013_v8 = vsel %vm8294_vm14, %v872_v4, 0.0  ;;  %v5525_v36 = vld [vmem:[%s10319_s1 + $0x58] sm:$0xff] }
 0x246   : > { %v887_v37 = vadd.f32 %v6164_v6, %v8283_v25  ;;  %v881_v19 = vpop.f32.mrb[7].mxu1  ;;  %v8396_v26 = vpack.c.bf16 %v2014_v12, %v2013_v8  ;;  %v5524_v12 = vld [vmem:[%s10319_s1 + $0x50] sm:$0xff] }
 0x247   : > { %v882_v13 = vadd.f32 %v8283_v25, %v881_v19  ;;  %v6135_v14 = vpop.f32.mrb[0].mxu0  ;;  %6811 = vmatprep.subr.msk.bf16.mxu0 %vm8314_vm13, %v6809_v9  ;;  %6835 = vmatprep.subr.msk.bf16.mxu1 %vm8314_vm13, %v6833_v56  ;;  %v7009_v47 = vpack.c.bf16 %v5525_v36, %v5524_v12 }
 0x248   : > { %v718_v52 = vpop.f32.mrb[1].mxu0  ;;  %v897_v27 = vsel %vm217_vm11, %v887_v37, 0.0  ;;  %v1155_v38 = vsel %vm8285_vm9, %v887_v37, 0.0  ;;  %v1646_v44 = vsel %vm8289_vm10, %v887_v37, 0.0  ;;  %v2016_v24 = vsel %vm8294_vm14, %v887_v37, 0.0 }
 0x249   : > { %v8409_v45 = vpack.c.bf16 %v887_v37, %v882_v13  ;;  %v8412_v25 = vadd.f32 %v8394_v16, %v718_v52  ;;  %v896_v32 = vsel %vm217_vm11, %v882_v13, 0.0  ;;  %v1154_v20 = vsel %vm8285_vm9, %v882_v13, 0.0 }
 0x24a   : > { %v6815_v33 = vpack.c.bf16 %v897_v27, %v896_v32  ;;  %v6839_v31 = vpack.c.bf16 %v1155_v38, %v1154_v20  ;;  %v1645_v1 = vsel %vm8289_vm10, %v882_v13, 0.0  ;;  %v2015_v7 = vsel %vm8294_vm14, %v882_v13, 0.0  ;;  %6814 = vmatpush3.bf16.xpose.msk.msra.mxu0 %vm8314_vm13, %v6809_v9  ;;  %6838 = vmatpush3.bf16.xpose.msk.msra.mxu1 %vm8314_vm13, %v6833_v56 }
 0x24b   : > { %v6138_v42 = vpop.f32.mrb[2].mxu0  ;;  %6181 = vmatprep.mubr.msk.f32.mxu0 %vm906_vm12, %v8412_v25  ;;  %6209 = vmatprep.mubr.msk.f32.mxu1 %vm906_vm12, %v8412_v25  ;;  %v6911_v46 = vpack.c.bf16 %v1646_v44, %v1645_v1  ;;  %v8434_v51 = vpack.c.bf16 %v2016_v24, %v2015_v7  ;;  %v8455_v62 = vadd.f32 %v6135_v14, %v8394_v16 }
 0x24c   : > { %v728_v49 = vpop.f32.mrb[3].mxu0  ;;  %6817 = vmatprep.subr.msk.bf16.mxu0 %vm8314_vm13, %v6815_v33  ;;  %6841 = vmatprep.subr.msk.bf16.mxu1 %vm8314_vm13, %v6839_v31  ;;  %v734_v3 = vadd.f32 %v6138_v42, %v8394_v16 }
 0x24d   : > { %v8458_v63 = vadd.f32 %v8394_v16, %v728_v49 }
 0x24f   : > { %v6141_v11 = vpop.f32.mrb[4].mxu0 }
 0x250   : > { %v738_v41 = vpop.f32.mrb[5].mxu0 }
 0x251   : > { %v739_v4 = vadd.f32 %v8394_v16, %v738_v41 }
 0x252   : > { %6820 = vmatpush3.bf16.xpose.msk.msra.mxu0 %vm8314_vm13, %v6815_v33  ;;  %6844 = vmatpush3.bf16.xpose.msk.msra.mxu1 %vm8314_vm13, %v6839_v31 }
 0x253   : > { %v6144_v29 = vpop.f32.mrb[6].mxu0  ;;  %6847 = vmatprep.subr.msk.bf16.mxu0 %vm8440_vm3, %v8308_v58  ;;  %6895 = vmatprep.subr.msk.bf16.mxu1 %vm8314_vm13, %v8322_v34 }
 0x254   : > { %v748_v23 = vpop.f32.mrb[7].mxu0  ;;  %v754_v21 = vadd.f32 %v6144_v29, %v8394_v16 }
 0x255   : > { %v749_v5 = vadd.f32 %v8394_v16, %v748_v23 }
 0x259   : > { %6182 = vmatmul.mubr.msk.f32.vlgmr.msra.gmra.mrb[8].mxu0 %vm906_vm12, %v8455_v62  ;;  %6210 = vmatmul.mubr.msk.f32.vlgmr.msra.gmra.mrb[8].mxu1 %vm906_vm12, %v8455_v62 }
 0x25a   : > { %6184 = vmatprep.mubr.msk.f32.mxu0 %vm906_vm12, %v8458_v63  ;;  %6212 = vmatprep.mubr.msk.f32.mxu1 %vm906_vm12, %v8458_v63 }
 0x25b   : > { %6850 = vmatpush3.bf16.msk.msra.mxu0 %vm8440_vm3, %v8308_v58  ;;  %6898 = vmatpush3.bf16.xpose.msk.msra.mxu1 %vm8314_vm13, %v8322_v34  ;;  %v744_v34 = vadd.f32 %v6141_v11, %v8394_v16 }
 0x25c   : > { %6853 = vmatprep.subr.msk.bf16.mxu0 %vm8440_vm3, %v8346_v10  ;;  %6901 = vmatprep.subr.msk.bf16.mxu1 %vm8314_vm13, %v8354_v17 }
 0x25d   : > { %6185 = vmatmul.mubr.msk.f32.gmra.mrb[10].mxu0 %vm906_vm12, %v734_v3  ;;  %6213 = vmatmul.mubr.msk.f32.gmra.mrb[10].mxu1 %vm906_vm12, %v734_v3 }
 0x25e   : > { %6187 = vmatprep.mubr.msk.f32.mxu0 %vm906_vm12, %v739_v4  ;;  %6215 = vmatprep.mubr.msk.f32.mxu1 %vm906_vm12, %v739_v4 }
 0x25f   : > { %6856 = vmatpush3.bf16.msk.msra.mxu0 %vm8440_vm3, %v8346_v10 }
 0x260   : > { %6859 = vmatprep.subr.msk.bf16.mxu0 %vm8440_vm3, %v8378_v53 }
 0x261   : > { %6188 = vmatmul.mubr.msk.f32.gmra.mrb[12].mxu0 %vm906_vm12, %v744_v34  ;;  %6216 = vmatmul.mubr.msk.f32.gmra.mrb[12].mxu1 %vm906_vm12, %v744_v34 }
 0x262   : > { %6190 = vmatprep.mubr.msk.f32.mxu0 %vm906_vm12, %v749_v5  ;;  %6218 = vmatprep.mubr.msk.f32.mxu1 %vm906_vm12, %v749_v5 }
 0x263   : > { %6862 = vmatpush3.bf16.msk.msra.mxu0 %vm8440_vm3, %v8378_v53  ;;  %6904 = vmatpush3.bf16.xpose.msk.msra.mxu1 %vm8314_vm13, %v8354_v17  ;;  %v5523_v17 = vld [vmem:[%s10319_s1 + $0x48] sm:$0xff] }
 0x264   : > { %6865 = vmatprep.subr.msk.bf16.mxu0 %vm8440_vm3, %v8409_v45  ;;  %6907 = vmatprep.subr.msk.bf16.mxu1 %vm8314_vm13, %v8386_v39 }
 0x265   : > { %6191 = vmatmul.mubr.msk.f32.gmra.mrb[14].mxu0 %vm906_vm12, %v754_v21  ;;  %6219 = vmatmul.mubr.msk.f32.gmra.mrb[14].mxu1 %vm906_vm12, %v754_v21 }
 0x266   : > { %6293 = vmatprep.mubr.msk.f32.mxu1 %vm906_vm12, %v8412_v25 }
 0x267   : > { %6868 = vmatpush3.bf16.msk.msra.mxu0 %vm8440_vm3, %v8409_v45 }
 0x268   : > { %6871 = vmatprep.subr.msk.bf16.mxu0 %vm8515_vm7, %v8308_v58 }
 0x26b   : > { %6910 = vmatpush3.bf16.xpose.msk.msra.mxu1 %vm8314_vm13, %v8386_v39 }
 0x26c   : > { %6913 = vmatprep.subr.msk.bf16.mxu1 %vm8314_vm13, %v6911_v46 }
 0x273   : > { %6916 = vmatpush3.bf16.xpose.msk.msra.mxu1 %vm8314_vm13, %v6911_v46 }
 0x274   : > { %6943 = vmatprep.subr.msk.bf16.mxu1 %vm8314_vm13, %v8326_v30 }
 0x27a   : > { %6294 = vmatmul.mubr.msk.f32.vlgmr.msra.gmra.mrb[16].mxu1 %vm906_vm12, %v8455_v62 }
 0x27b   : > { %6296 = vmatprep.mubr.msk.f32.mxu1 %vm906_vm12, %v8458_v63  ;;  %6946 = vmatpush3.bf16.xpose.msk.msra.mxu1 %vm8314_vm13, %v8326_v30  ;;  %v5522_v30 = vld [vmem:[%s10319_s1 + $0x40] sm:$0xff] }
 0x27c   : > { %6949 = vmatprep.subr.msk.bf16.mxu1 %vm8314_vm13, %v8359_v35 }
 0x27e   : > { %6297 = vmatmul.mubr.msk.f32.gmra.mrb[18].mxu1 %vm906_vm12, %v734_v3 }
 0x27f   : > { %6299 = vmatprep.mubr.msk.f32.mxu1 %vm906_vm12, %v739_v4 }
 0x282   : > { %6300 = vmatmul.mubr.msk.f32.gmra.mrb[20].mxu1 %vm906_vm12, %v744_v34 }
 0x283   : > { %6302 = vmatprep.mubr.msk.f32.mxu1 %vm906_vm12, %v749_v5  ;;  %6952 = vmatpush3.bf16.xpose.msk.msra.mxu1 %vm8314_vm13, %v8359_v35  ;;  %v7005_v35 = vpack.c.bf16 %v5523_v17, %v5522_v30 }
 0x284   : > { %6955 = vmatprep.subr.msk.bf16.mxu1 %vm8314_vm13, %v8396_v26 }
 0x286   : > { %6303 = vmatmul.mubr.msk.f32.gmra.mrb[22].mxu1 %vm906_vm12, %v754_v21 }
 0x287   : > { %6349 = vmatprep.mubr.msk.f32.mxu1 %vm906_vm12, %v8412_v25 }
 0x28b   : > { %6958 = vmatpush3.bf16.xpose.msk.msra.mxu1 %vm8314_vm13, %v8396_v26 }
 0x28c   : > { %6961 = vmatprep.subr.msk.bf16.mxu1 %vm8314_vm13, %v8434_v51 }
 0x293   : > { %6964 = vmatpush3.bf16.xpose.msk.msra.mxu1 %vm8314_vm13, %v8434_v51 }
 0x294   : > { %7006 = vmatprep.subr.bf16.mxu1 %v7005_v35 }
 0x29a   : > { %6350 = vmatmul.mubr.msk.f32.vlgmr.msra.gmra.mrb[24].mxu1 %vm906_vm12, %v8455_v62 }
 0x29b   : > { %6352 = vmatprep.mubr.msk.f32.mxu1 %vm906_vm12, %v8458_v63  ;;  %7008 = vmatpush3.bf16.msra.mxu1 %v7005_v35 }
 0x29c   : > { %7010 = vmatprep.subr.bf16.mxu1 %v7009_v47 }
 0x29e   : > { %6353 = vmatmul.mubr.msk.f32.gmra.mrb[26].mxu1 %vm906_vm12, %v734_v3 }
 0x29f   : > { %6355 = vmatprep.mubr.msk.f32.mxu1 %vm906_vm12, %v739_v4  ;;  %7012 = vmatpush3.bf16.msra.mxu1 %v7009_v47 }
 0x2a2   : > { %6356 = vmatmul.mubr.msk.f32.gmra.mrb[28].mxu1 %vm906_vm12, %v744_v34 }
 0x2a3   : > { %6358 = vmatprep.mubr.msk.f32.mxu1 %vm906_vm12, %v749_v5 }
 0x2a6   : > { %6359 = vmatmul.mubr.msk.f32.gmra.mrb[30].mxu1 %vm906_vm12, %v754_v21 }
 0x2a7   : > { %6425 = vmatprep.mubr.msk.f32.mxu1 %vm242_vm0, %v8126_v61 }
 0x2aa   : > { %6426 = vmatmul.mubr.msk.f32.vlgmr.msra.gmra.mrb[32].mxu1 %vm242_vm0, %v8145_v55 }
 0x2ab   : > { %6428 = vmatprep.mubr.msk.f32.mxu1 %vm242_vm0, %v8170_v22 }
 0x2ae   : > { %6429 = vmatmul.mubr.msk.f32.gmra.mrb[34].mxu1 %vm242_vm0, %v8199_v2 }
 0x2af   : > { %6431 = vmatprep.mubr.msk.f32.mxu1 %vm242_vm0, %v8219_v43 }
 0x2b2   : > { %6432 = vmatmul.mubr.msk.f32.gmra.mrb[36].mxu1 %vm242_vm0, %v8222_v54 }
 0x2b3   : > { %6434 = vmatprep.mubr.msk.f32.mxu1 %vm242_vm0, %v8229_v59 }
 0x2b6   : > { %6435 = vmatmul.mubr.msk.f32.gmra.mrb[38].mxu1 %vm242_vm0, %v8244_v50 }
 0x32c   : > { %v8606_v61 = vpop.f32.mrb[8].mxu0  ;;  %v8608_v55 = vpop.f32.mrb[8].mxu1 }
 0x32d   : > { %v8610_v22 = vpop.f32.mrb[9].mxu0  ;;  %v8612_v57 = vpop.f32.mrb[9].mxu1  ;;  %v1296_v2 = vsel %vm906_vm12, %v8608_v55, -inf  ;;  %v1063_v25 = vsel %vm906_vm12, %v8606_v61, -inf }
 0x32e   : > { %1297 = vmax.xlane.f32.xlu1 %v1296_v2  ;;  %v1293_v43 = vsel %vm906_vm12, %v8612_v57, -inf  ;;  %v1060_v32 = vsel %vm906_vm12, %v8610_v22, -inf }
 0x32f   : > { %1294 = vmax.xlane.f32.xlu0 %v1293_v43 }
 0x330   : > { %v8618_v54 = vpop.f32.mrb[10].mxu0  ;;  %v8620_v59 = vpop.f32.mrb[10].mxu1 }
 0x331   : > { %v8622_v50 = vpop.f32.mrb[11].mxu0  ;;  %v8624_v6 = vpop.f32.mrb[11].mxu1  ;;  %v1302_v9 = vsel %vm906_vm12, %v8620_v59, -inf  ;;  %v1069_v20 = vsel %vm906_vm12, %v8618_v54, -inf }
 0x332   : > { %1303 = vmax.xlane.f32.xlu1 %v1302_v9  ;;  %v1299_v56 = vsel %vm906_vm12, %v8624_v6, -inf  ;;  %v1066_v33 = vsel %vm906_vm12, %v8622_v50, -inf }
 0x333   : > { %1300 = vmax.xlane.f32.xlu0 %v1299_v56 }
 0x334   : > { %v8630_v39 = vpop.f32.mrb[12].mxu0  ;;  %v8632_v8 = vpop.f32.mrb[12].mxu1 }
 0x335   : > { %v8634_v37 = vpop.f32.mrb[13].mxu0  ;;  %v8636_v19 = vpop.f32.mrb[13].mxu1  ;;  %v1308_v16 = vsel %vm906_vm12, %v8632_v8, -inf  ;;  %v1075_v31 = vsel %vm906_vm12, %v8630_v39, -inf }
 0x336   : > { %1309 = vmax.xlane.f32.xlu1 %v1308_v16  ;;  %v1305_v26 = vsel %vm906_vm12, %v8636_v19, -inf  ;;  %v1072_v1 = vsel %vm906_vm12, %v8634_v37, -inf }
 0x337   : > { %1306 = vmax.xlane.f32.xlu0 %v1305_v26 }
 0x338   : > { %v8642_v13 = vpop.f32.mrb[14].mxu0  ;;  %v8644_v14 = vpop.f32.mrb[14].mxu1 }
 0x339   : > { %v8646_v52 = vpop.f32.mrb[15].mxu0  ;;  %v8648_v27 = vpop.f32.mrb[15].mxu1  ;;  %v1314_v38 = vsel %vm906_vm12, %v8644_v14, -inf  ;;  %v1081_v7 = vsel %vm906_vm12, %v8642_v13, -inf }
 0x33a   : > { %1315 = vmax.xlane.f32.xlu1 %v1314_v38  ;;  %v1311_v44 = vsel %vm906_vm12, %v8648_v27, -inf  ;;  %v1078_v42 = vsel %vm906_vm12, %v8646_v52, -inf }
 0x33b   : > { %1312 = vmax.xlane.f32.xlu0 %v1311_v44 }
 0x33e   : > { %1064 = vmax.xlane.f32.xlu1 %v1063_v25 }
 0x33f   : > { %1061 = vmax.xlane.f32.xlu0 %v1060_v32 }
 0x342   : > { %1070 = vmax.xlane.f32.xlu1 %v1069_v20 }
 0x343   : > { %1067 = vmax.xlane.f32.xlu0 %v1066_v33  ;;  %v5538_v33 = vld [vmem:[%s10321_s3 + $0x2] ss:$0 sm:$0xff] }
 0x346   : > { %1076 = vmax.xlane.f32.xlu1 %v1075_v31 }
 0x347   : > { %1073 = vmax.xlane.f32.xlu0 %v1072_v1 }
 0x34a   : > { %1082 = vmax.xlane.f32.xlu1 %v1081_v7 }
 0x34b   : > { %1079 = vmax.xlane.f32.xlu0 %v1078_v42 }
 0x34d   : > { %v8670_v46 = vpop.f32.mrb[16].mxu1 }
 0x34e   : > { %v8672_v24 = vpop.f32.mrb[17].mxu1  ;;  %v1787_v49 = vsel %vm906_vm12, %v8670_v46, -inf }
 0x34f   : > { %1788 = vmax.xlane.f32.xlu1 %v1787_v49  ;;  %v1784_v51 = vsel %vm906_vm12, %v8672_v24, -inf }
 0x350   : > { %1785 = vmax.xlane.f32.xlu0 %v1784_v51 }
 0x351   : > { %v8678_v11 = vpop.f32.mrb[18].mxu1 }
 0x352   : > { %v8680_v41 = vpop.f32.mrb[19].mxu1  ;;  %v1793_v29 = vsel %vm906_vm12, %v8678_v11, -inf }
 0x353   : > { %1794 = vmax.xlane.f32.xlu1 %v1793_v29  ;;  %v1790_v23 = vsel %vm906_vm12, %v8680_v41, -inf }
 0x354   : > { %1791 = vmax.xlane.f32.xlu0 %v1790_v23 }
 0x355   : > { %v8686_v62 = vpop.f32.mrb[20].mxu1 }
 0x356   : > { %v8688_v63 = vpop.f32.mrb[21].mxu1  ;;  %v1799_v3 = vsel %vm906_vm12, %v8686_v62, -inf }
 0x357   : > { %1800 = vmax.xlane.f32.xlu1 %v1799_v3  ;;  %v1796_v4 = vsel %vm906_vm12, %v8688_v63, -inf }
 0x358   : > { %1797 = vmax.xlane.f32.xlu0 %v1796_v4 }
 0x359   : > { %v8694_v34 = vpop.f32.mrb[22].mxu1 }
 0x35a   : > { %v8696_v5 = vpop.f32.mrb[23].mxu1  ;;  %v1805_v21 = vsel %vm906_vm12, %v8694_v34, -inf }
 0x35b   : > { %1806 = vmax.xlane.f32.xlu1 %v1805_v21  ;;  %v1802_v30 = vsel %vm906_vm12, %v8696_v5, -inf }
 0x35c   : > { %1803 = vmax.xlane.f32.xlu0 %v1802_v30 }
 0x36d   : > { %v8702_v17 = vpop.f32.mrb[24].mxu1 }
 0x36e   : > { %v8704_v35 = vpop.f32.mrb[25].mxu1  ;;  %v2157_v12 = vsel %vm906_vm12, %v8702_v17, -inf }
 0x36f   : > { %2158 = vmax.xlane.f32.xlu1 %v2157_v12  ;;  %v2154_v36 = vsel %vm906_vm12, %v8704_v35, -inf }
 0x370   : > { %2155 = vmax.xlane.f32.xlu0 %v2154_v36 }
 0x371   : > { %v8710_v47 = vpop.f32.mrb[26].mxu1 }
 0x372   : > { %v8712_v2 = vpop.f32.mrb[27].mxu1  ;;  %v2163_v43 = vsel %vm906_vm12, %v8710_v47, -inf }
 0x373   : > { %2164 = vmax.xlane.f32.xlu1 %v2163_v43  ;;  %v2160_v9 = vsel %vm906_vm12, %v8712_v2, -inf }
 0x374   : > { %2161 = vmax.xlane.f32.xlu0 %v2160_v9 }
 0x375   : > { %v8718_v56 = vpop.f32.mrb[28].mxu1 }
 0x376   : > { %v8720_v16 = vpop.f32.mrb[29].mxu1  ;;  %v2169_v26 = vsel %vm906_vm12, %v8718_v56, -inf }
 0x377   : > { %2170 = vmax.xlane.f32.xlu1 %v2169_v26  ;;  %v2166_v38 = vsel %vm906_vm12, %v8720_v16, -inf }
 0x378   : > { %2167 = vmax.xlane.f32.xlu0 %v2166_v38 }
 0x379   : > { %v8726_v44 = vpop.f32.mrb[30].mxu1 }
 0x37a   : > { %v8728_v25 = vpop.f32.mrb[31].mxu1  ;;  %v2175_v32 = vsel %vm906_vm12, %v8726_v44, -inf }
 0x37b   : > { %2176 = vmax.xlane.f32.xlu1 %v2175_v32  ;;  %v2172_v20 = vsel %vm906_vm12, %v8728_v25, -inf }
 0x37c   : > { %2173 = vmax.xlane.f32.xlu0 %v2172_v20 }
 0x37d   : > { %v6427_v31 = vpop.f32.mrb[32].mxu1 }
 0x37e   : > { %v8737_v1 = vadd.f32 %v6427_v31, %v5538_v33  ;;  %v2604_v7 = vpop.f32.mrb[33].mxu1 }
 0x37f   : > { %v8739_v42 = vadd.f32 %v5538_v33, %v2604_v7 }
 0x381   : > { %v6430_v49 = vpop.f32.mrb[34].mxu1  ;;  %6473 = vmatprep.mubr.msk.f32.mxu1 %vm906_vm12, %v8739_v42 }
 0x382   : > { %v8743_v51 = vadd.f32 %v6430_v49, %v5538_v33  ;;  %v2614_v29 = vpop.f32.mrb[35].mxu1 }
 0x383   : > { %v8745_v23 = vadd.f32 %v5538_v33, %v2614_v29 }
 0x385   : > { %v6433_v3 = vpop.f32.mrb[36].mxu1 }
 0x386   : > { %v8747_v4 = vadd.f32 %v6433_v3, %v5538_v33  ;;  %v2624_v21 = vpop.f32.mrb[37].mxu1 }
 0x387   : > { %v8749_v30 = vadd.f32 %v5538_v33, %v2624_v21 }
 0x389   : > { %v6436_v12 = vpop.f32.mrb[38].mxu1 }
 0x38a   : > { %v8751_v36 = vadd.f32 %v6436_v12, %v5538_v33  ;;  %v2634_v43 = vpop.f32.mrb[39].mxu1 }
 0x38b   : > { %v8753_v9 = vadd.f32 %v5538_v33, %v2634_v43 }
 0x38c   : > { %10336 = vst [vmem:[#allocation2_spill] sm:$0xff] %v8751_v36 }
 0x393   : > { %v10341_v60 = vld [vmem:[#allocation2_spill] sm:$0xff] }
 0x3bb   : > { %v1298_v26 = vpop.xlane.xlu1 %1297 }
 0x3bc   : > { %v1318_v38 = vsub.f32 %v8608_v55, %v1298_v26  ;;  %v1295_v32 = vpop.xlane.xlu0 %1294 }
 0x3bd   : > { %v1317_v20 = vsub.f32 %v8612_v57, %v1295_v32 }
 0x3be   : > { %v1327_v31 = vmul.f32 1.442695, %v1318_v38 }
 0x3bf   : > { %v1325_v7 = vmul.f32 1.442695, %v1317_v20  ;;  %v1304_v49 = vpop.xlane.xlu1 %1303 }
 0x3c0   : > { %7373 = vpow2.f32 %v1327_v31  ;;  %v1320_v29 = vsub.f32 %v8620_v59, %v1304_v49  ;;  %v1301_v3 = vpop.xlane.xlu0 %1300 }
 0x3c1   : > { %7375 = vpow2.f32 %v1325_v7  ;;  %v1319_v21 = vsub.f32 %v8624_v6, %v1301_v3 }
 0x3c2   : > { %v1331_v12 = vmul.f32 1.442695, %v1320_v29 }
 0x3c3   : > { %v1329_v36 = vmul.f32 1.442695, %v1319_v21  ;;  %v1310_v33 = vpop.xlane.xlu1 %1309 }
 0x3c4   : > { %7377 = vpow2.f32 %v1331_v12  ;;  %v1322_v43 = vsub.f32 %v8632_v8, %v1310_v33  ;;  %v1307_v55 = vpop.xlane.xlu0 %1306 }
 0x3c5   : > { %7379 = vpow2.f32 %v1329_v36  ;;  %v1321_v57 = vsub.f32 %v8636_v19, %v1307_v55 }
 0x3c6   : > { %v1335_v26 = vmul.f32 1.442695, %v1322_v43 }
 0x3c7   : > { %v1333_v38 = vmul.f32 1.442695, %v1321_v57  ;;  %v1316_v32 = vpop.xlane.xlu1 %1315 }
 0x3c8   : > { %7381 = vpow2.f32 %v1335_v26  ;;  %v1324_v59 = vsub.f32 %v8644_v14, %v1316_v32  ;;  %v1313_v20 = vpop.xlane.xlu0 %1312 }
 0x3c9   : > { %7383 = vpow2.f32 %v1333_v38  ;;  %v1323_v6 = vsub.f32 %v8648_v27, %v1313_v20 }
 0x3ca   : > { %v8763_v31 = vpop.eup %7373  ;;  %v1339_v7 = vmul.f32 1.442695, %v1324_v59 }
 0x3cb   : > { %v8765_v49 = vpop.eup %7375  ;;  %v1337_v8 = vmul.f32 1.442695, %v1323_v6  ;;  %v1065_v29 = vpop.xlane.xlu1 %1064  ;;  %v1344_v19 = vsel %vm906_vm12, %v8763_v31, 0.0 }
 0x3cc   : > { %7385 = vpow2.f32 %v1339_v7  ;;  %v1085_v36 = vsub.f32 %v8606_v61, %v1065_v29  ;;  %1345 = vadd.xlane.f32.xlu1 %v1344_v19  ;;  %v1062_v3 = vpop.xlane.xlu0 %1061  ;;  %v1341_v14 = vsel %vm906_vm12, %v8765_v49, 0.0 }
 0x3cd   : > { %7387 = vpow2.f32 %v1337_v8  ;;  %v1084_v27 = vsub.f32 %v8610_v22, %v1062_v3  ;;  %1342 = vadd.xlane.f32.xlu0 %v1341_v14 }
 0x3ce   : > { %v8773_v21 = vpop.eup %7377  ;;  %v1094_v12 = vmul.f32 1.442695, %v1085_v36 }
 0x3cf   : > { %v8775_v33 = vpop.eup %7379  ;;  %v1092_v43 = vmul.f32 1.442695, %v1084_v27  ;;  %v1071_v55 = vpop.xlane.xlu1 %1070  ;;  %v1350_v57 = vsel %vm906_vm12, %v8773_v21, 0.0 }
 0x3d0   : > { %7389 = vpow2.f32 %v1094_v12  ;;  %v1087_v61 = vsub.f32 %v8618_v54, %v1071_v55  ;;  %1351 = vadd.xlane.f32.xlu1 %v1350_v57  ;;  %v1068_v26 = vpop.xlane.xlu0 %1067  ;;  %v1347_v38 = vsel %vm906_vm12, %v8775_v33, 0.0 }
 0x3d1   : > { %7391 = vpow2.f32 %v1092_v43  ;;  %v1086_v22 = vsub.f32 %v8622_v50, %v1068_v26  ;;  %1348 = vadd.xlane.f32.xlu0 %v1347_v38 }
 0x3d2   : > { %v8783_v32 = vpop.eup %7381  ;;  %v1098_v59 = vmul.f32 1.442695, %v1087_v61 }
 0x3d3   : > { %v8785_v20 = vpop.eup %7383  ;;  %v1096_v6 = vmul.f32 1.442695, %v1086_v22  ;;  %v1077_v7 = vpop.xlane.xlu1 %1076  ;;  %v1356_v8 = vsel %vm906_vm12, %v8783_v32, 0.0 }
 0x3d4   : > { %7393 = vpow2.f32 %v1098_v59  ;;  %v1089_v54 = vsub.f32 %v8630_v39, %v1077_v7  ;;  %1357 = vadd.xlane.f32.xlu1 %v1356_v8  ;;  %v1074_v29 = vpop.xlane.xlu0 %1073  ;;  %v1353_v19 = vsel %vm906_vm12, %v8785_v20, 0.0 }
 0x3d5   : > { %7395 = vpow2.f32 %v1096_v6  ;;  %v1088_v50 = vsub.f32 %v8634_v37, %v1074_v29  ;;  %1354 = vadd.xlane.f32.xlu0 %v1353_v19 }
 0x3d6   : > { %v8793_v36 = vpop.eup %7385  ;;  %v1102_v3 = vmul.f32 1.442695, %v1089_v54 }
 0x3d7   : > { %v8795_v14 = vpop.eup %7387  ;;  %v1100_v27 = vmul.f32 1.442695, %v1088_v50  ;;  %v1083_v12 = vpop.xlane.xlu1 %1082  ;;  %v1362_v43 = vsel %vm906_vm12, %v8793_v36, 0.0 }
 0x3d8   : > { %7397 = vpow2.f32 %v1102_v3  ;;  %v1091_v39 = vsub.f32 %v8642_v13, %v1083_v12  ;;  %1363 = vadd.xlane.f32.xlu1 %v1362_v43  ;;  %v1080_v55 = vpop.xlane.xlu0 %1079  ;;  %v1359_v57 = vsel %vm906_vm12, %v8795_v14, 0.0 }
 0x3d9   : > { %7399 = vpow2.f32 %v1100_v27  ;;  %v1090_v37 = vsub.f32 %v8646_v52, %v1080_v55  ;;  %1360 = vadd.xlane.f32.xlu0 %v1359_v57 }
 0x3da   : > { %v8803_v61 = vpop.eup %7389  ;;  %v1106_v26 = vmul.f32 1.442695, %v1091_v39 }
 0x3db   : > { %v8805_v38 = vpop.eup %7391  ;;  %v1104_v22 = vmul.f32 1.442695, %v1090_v37  ;;  %v1111_v59 = vsel %vm906_vm12, %v8803_v61, 0.0 }
 0x3dc   : > { %7401 = vpow2.f32 %v1106_v26  ;;  %v1789_v13 = vpop.xlane.xlu1 %1788  ;;  %1112 = vadd.xlane.f32.xlu1 %v1111_v59  ;;  %v1108_v6 = vsel %vm906_vm12, %v8805_v38, 0.0 }
 0x3dd   : > { %7403 = vpow2.f32 %v1104_v22  ;;  %v1809_v7 = vsub.f32 %v8670_v46, %v1789_v13  ;;  %v1786_v52 = vpop.xlane.xlu0 %1785  ;;  %1109 = vadd.xlane.f32.xlu0 %v1108_v6 }
 0x3de   : > { %v8812_v8 = vpop.eup %7393  ;;  %v1808_v54 = vsub.f32 %v8672_v24, %v1786_v52 }
 0x3df   : > { %v8815_v29 = vpop.eup %7395  ;;  %v1818_v19 = vmul.f32 1.442695, %v1809_v7  ;;  %v1117_v50 = vsel %vm906_vm12, %v8812_v8, 0.0 }
 0x3e0   : > { %v1816_v3 = vmul.f32 1.442695, %v1808_v54  ;;  %v1795_v27 = vpop.xlane.xlu1 %1794  ;;  %1118 = vadd.xlane.f32.xlu1 %v1117_v50  ;;  %v1114_v12 = vsel %vm906_vm12, %v8815_v29, 0.0 }
 0x3e1   : > { %7405 = vpow2.f32 %v1818_v19  ;;  %v1811_v46 = vsub.f32 %v8678_v11, %v1795_v27  ;;  %v1792_v43 = vpop.xlane.xlu0 %1791  ;;  %1115 = vadd.xlane.f32.xlu0 %v1114_v12 }
 0x3e2   : > { %v8822_v39 = vpop.eup %7397  ;;  %7407 = vpow2.f32 %v1816_v3  ;;  %v1810_v24 = vsub.f32 %v8680_v41, %v1792_v43 }
 0x3e3   : > { %v8825_v55 = vpop.eup %7399  ;;  %v1822_v57 = vmul.f32 1.442695, %v1811_v46  ;;  %v1123_v37 = vsel %vm906_vm12, %v8822_v39, 0.0 }
 0x3e4   : > { %v1820_v26 = vmul.f32 1.442695, %v1810_v24  ;;  %v1801_v22 = vpop.xlane.xlu1 %1800  ;;  %1124 = vadd.xlane.f32.xlu1 %v1123_v37  ;;  %v1120_v59 = vsel %vm906_vm12, %v8825_v55, 0.0 }
 0x3e5   : > { %7409 = vpow2.f32 %v1822_v57  ;;  %v1813_v11 = vsub.f32 %v8686_v62, %v1801_v22  ;;  %v1798_v13 = vpop.xlane.xlu0 %1797  ;;  %1121 = vadd.xlane.f32.xlu0 %v1120_v59 }
 0x3e6   : > { %v8832_v6 = vpop.eup %7401  ;;  %7411 = vpow2.f32 %v1820_v26  ;;  %v1812_v41 = vsub.f32 %v8688_v63, %v1798_v13 }
 0x3e7   : > { %v8835_v7 = vpop.eup %7403  ;;  %v1826_v52 = vmul.f32 1.442695, %v1813_v11  ;;  %v1129_v54 = vsel %vm906_vm12, %v8832_v6, 0.0 }
 0x3e8   : > { %v1824_v19 = vmul.f32 1.442695, %v1812_v41  ;;  %v1807_v50 = vpop.xlane.xlu1 %1806  ;;  %1130 = vadd.xlane.f32.xlu1 %v1129_v54  ;;  %v1126_v3 = vsel %vm906_vm12, %v8835_v7, 0.0 }
 0x3e9   : > { %7413 = vpow2.f32 %v1826_v52  ;;  %v1815_v62 = vsub.f32 %v8694_v34, %v1807_v50  ;;  %v1804_v27 = vpop.xlane.xlu0 %1803  ;;  %1127 = vadd.xlane.f32.xlu0 %v1126_v3 }
 0x3ea   : > { %7415 = vpow2.f32 %v1824_v19  ;;  %v1814_v63 = vsub.f32 %v8696_v5, %v1804_v27 }
 0x3eb   : > { %v8843_v12 = vpop.eup %7405  ;;  %v1830_v46 = vmul.f32 1.442695, %v1815_v62 }
 0x3ec   : > { %v8845_v43 = vpop.eup %7407  ;;  %v1828_v24 = vmul.f32 1.442695, %v1814_v63  ;;  %v1835_v57 = vsel %vm906_vm12, %v8843_v12, 0.0 }
 0x3ed   : > { %7417 = vpow2.f32 %v1830_v46  ;;  %1836 = vadd.xlane.f32.xlu1 %v1835_v57  ;;  %v1832_v37 = vsel %vm906_vm12, %v8845_v43, 0.0 }
 0x3ee   : > { %7419 = vpow2.f32 %v1828_v24  ;;  %1833 = vadd.xlane.f32.xlu0 %v1832_v37 }
 0x3ef   : > { %v8851_v34 = vpop.eup %7409 }
 0x3f0   : > { %v8853_v26 = vpop.eup %7411  ;;  %v1841_v5 = vsel %vm906_vm12, %v8851_v34, 0.0 }
 0x3f1   : > { %1842 = vadd.xlane.f32.xlu1 %v1841_v5  ;;  %v1838_v22 = vsel %vm906_vm12, %v8853_v26, 0.0 }
 0x3f2   : > { %1839 = vadd.xlane.f32.xlu0 %v1838_v22 }
 0x3f3   : > { %v8859_v59 = vpop.eup %7413 }
 0x3f4   : > { %v8861_v11 = vpop.eup %7415  ;;  %v1847_v13 = vsel %vm906_vm12, %v8859_v59, 0.0 }
 0x3f5   : > { %1848 = vadd.xlane.f32.xlu1 %v1847_v13  ;;  %v1844_v41 = vsel %vm906_vm12, %v8861_v11, 0.0 }
 0x3f6   : > { %1845 = vadd.xlane.f32.xlu0 %v1844_v41 }
 0x3f7   : > { %v8867_v52 = vpop.eup %7417 }
 0x3f8   : > { %v8869_v54 = vpop.eup %7419  ;;  %v1853_v19 = vsel %vm906_vm12, %v8867_v52, 0.0 }
 0x3f9   : > { %1854 = vadd.xlane.f32.xlu1 %v1853_v19  ;;  %v1850_v50 = vsel %vm906_vm12, %v8869_v54, 0.0 }
 0x3fa   : > { %1851 = vadd.xlane.f32.xlu0 %v1850_v50 }
 0x3fc   : > { %v2159_v3 = vpop.xlane.xlu1 %2158 }
 0x3fd   : > { %v2179_v62 = vsub.f32 %v8702_v17, %v2159_v3  ;;  %v2156_v27 = vpop.xlane.xlu0 %2155 }
 0x3fe   : > { %v2178_v63 = vsub.f32 %v8704_v35, %v2156_v27 }
 0x3ff   : > { %v2188_v46 = vmul.f32 1.442695, %v2179_v62 }
 0x400   : > { %v2186_v24 = vmul.f32 1.442695, %v2178_v63  ;;  %v2165_v57 = vpop.xlane.xlu1 %2164 }
 0x401   : > { %7421 = vpow2.f32 %v2188_v46  ;;  %v2181_v37 = vsub.f32 %v8710_v47, %v2165_v57  ;;  %v2162_v5 = vpop.xlane.xlu0 %2161 }
 0x402   : > { %7423 = vpow2.f32 %v2186_v24  ;;  %v2180_v22 = vsub.f32 %v8712_v2, %v2162_v5 }
 0x403   : > { %v2192_v13 = vmul.f32 1.442695, %v2181_v37 }
 0x404   : > { %v2190_v41 = vmul.f32 1.442695, %v2180_v22  ;;  %v2171_v19 = vpop.xlane.xlu1 %2170 }
 0x405   : > { %7425 = vpow2.f32 %v2192_v13  ;;  %v2183_v50 = vsub.f32 %v8718_v56, %v2171_v19  ;;  %v2168_v17 = vpop.xlane.xlu0 %2167 }
 0x406   : > { %7427 = vpow2.f32 %v2190_v41  ;;  %v2182_v35 = vsub.f32 %v8720_v16, %v2168_v17 }
 0x407   : > { %v2196_v3 = vmul.f32 1.442695, %v2183_v50 }
 0x408   : > { %v2194_v62 = vmul.f32 1.442695, %v2182_v35  ;;  %v2177_v27 = vpop.xlane.xlu1 %2176 }
 0x409   : > { %7429 = vpow2.f32 %v2196_v3  ;;  %v2185_v47 = vsub.f32 %v8726_v44, %v2177_v27  ;;  %v2174_v63 = vpop.xlane.xlu0 %2173 }
 0x40a   : > { %7431 = vpow2.f32 %v2194_v62  ;;  %v2184_v2 = vsub.f32 %v8728_v25, %v2174_v63 }
 0x40b   : > { %v8883_v46 = vpop.eup %7421  ;;  %v2200_v24 = vmul.f32 1.442695, %v2185_v47 }
 0x40c   : > { %v8885_v57 = vpop.eup %7423  ;;  %v2198_v56 = vmul.f32 1.442695, %v2184_v2  ;;  %v2205_v37 = vsel %vm906_vm12, %v8883_v46, 0.0 }
 0x40d   : > { %7433 = vpow2.f32 %v2200_v24  ;;  %2206 = vadd.xlane.f32.xlu1 %v2205_v37  ;;  %v2202_v16 = vsel %vm906_vm12, %v8885_v57, 0.0 }
 0x40e   : > { %7435 = vpow2.f32 %v2198_v56  ;;  %2203 = vadd.xlane.f32.xlu0 %v2202_v16 }
 0x40f   : > { %v8891_v44 = vpop.eup %7425 }
 0x410   : > { %v8893_v5 = vpop.eup %7427  ;;  %v2211_v25 = vsel %vm906_vm12, %v8891_v44, 0.0 }
 0x411   : > { %2212 = vadd.xlane.f32.xlu1 %v2211_v25  ;;  %v2208_v22 = vsel %vm906_vm12, %v8893_v5, 0.0 }
 0x412   : > { %2209 = vadd.xlane.f32.xlu0 %v2208_v22 }
 0x413   : > { %v8899_v13 = vpop.eup %7429 }
 0x414   : > { %v8901_v41 = vpop.eup %7431  ;;  %v2217_v19 = vsel %vm906_vm12, %v8899_v13, 0.0 }
 0x415   : > { %2218 = vadd.xlane.f32.xlu1 %v2217_v19  ;;  %v2214_v50 = vsel %vm906_vm12, %v8901_v41, 0.0 }
 0x416   : > { %2215 = vadd.xlane.f32.xlu0 %v2214_v50 }
 0x417   : > { %v8907_v17 = vpop.eup %7433 }
 0x418   : > { %v8909_v35 = vpop.eup %7435  ;;  %v2223_v3 = vsel %vm906_vm12, %v8907_v17, 0.0 }
 0x419   : > { %2224 = vadd.xlane.f32.xlu1 %v2223_v3  ;;  %v2220_v62 = vsel %vm906_vm12, %v8909_v35, 0.0 }
 0x41a   : > { %2221 = vadd.xlane.f32.xlu0 %v2220_v62 }
 0x459   : > { %v1346_v27 = vpop.xlane.xlu1 %1345 }
 0x45a   : > { %7437 = vrcp.f32 %v1346_v27  ;;  %v1343_v47 = vpop.xlane.xlu0 %1342 }
 0x45b   : > { %7439 = vrcp.f32 %v1343_v47 }
 0x45d   : > { %v1352_v63 = vpop.xlane.xlu1 %1351 }
 0x45e   : > { %7441 = vrcp.f32 %v1352_v63  ;;  %v1349_v2 = vpop.xlane.xlu0 %1348 }
 0x45f   : > { %7443 = vrcp.f32 %v1349_v2 }
 0x461   : > { %v1358_v24 = vpop.xlane.xlu1 %1357 }
 0x462   : > { %7445 = vrcp.f32 %v1358_v24  ;;  %v1355_v56 = vpop.xlane.xlu0 %1354 }
 0x463   : > { %7447 = vrcp.f32 %v1355_v56 }
 0x464   : > { %v7438_v37 = vpop.eup %7437 }
 0x465   : > { %v7440_v16 = vpop.eup %7439  ;;  %v1364_v25 = vpop.xlane.xlu1 %1363  ;;  %v1374_v50 = vmul.f32 %v7438_v37, %v8763_v31 }
 0x466   : > { %7449 = vrcp.f32 %v1364_v25  ;;  %v1361_v22 = vpop.xlane.xlu0 %1360  ;;  %v1373_v19 = vmul.f32 %v7440_v16, %v8765_v49 }
 0x467   : > { %7451 = vrcp.f32 %v1361_v22 }
 0x468   : > { %v7442_v3 = vpop.eup %7441  ;;  %6237 = vmatprep.mubr.msk.f32.mxu0 %vm906_vm12, %v1373_v19 }
 0x469   : > { %v7444_v62 = vpop.eup %7443  ;;  %v1113_v27 = vpop.xlane.xlu1 %1112  ;;  %6238 = vmatmul.mubr.msk.f32.vlgmr.msra.gmra.mrb[16].mxu0 %vm906_vm12, %v1374_v50  ;;  %v1376_v31 = vmul.f32 %v7442_v3, %v8773_v21 }
 0x46a   : > { %7453 = vrcp.f32 %v1113_v27  ;;  %6874 = vmatpush3.bf16.msk.msra.mxu0 %vm8515_vm7, %v8308_v58  ;;  %v1110_v47 = vpop.xlane.xlu0 %1109  ;;  %v1375_v63 = vmul.f32 %v7444_v62, %v8775_v33 }
 0x46b   : > { %6877 = vmatprep.subr.msk.bf16.mxu0 %vm8515_vm7, %v8346_v10  ;;  %7455 = vrcp.f32 %v1110_v47 }
 0x46c   : > { %v7446_v49 = vpop.eup %7445  ;;  %6240 = vmatprep.mubr.msk.f32.mxu0 %vm906_vm12, %v1375_v63 }
 0x46d   : > { %v7448_v2 = vpop.eup %7447  ;;  %v1119_v24 = vpop.xlane.xlu1 %1118  ;;  %6241 = vmatmul.mubr.msk.f32.gmra.mrb[18].mxu0 %vm906_vm12, %v1376_v31  ;;  %v1378_v21 = vmul.f32 %v7446_v49, %v8783_v32 }
 0x46e   : > { %7457 = vrcp.f32 %v1119_v24  ;;  %6880 = vmatpush3.bf16.msk.msra.mxu0 %vm8515_vm7, %v8346_v10  ;;  %v1116_v33 = vpop.xlane.xlu0 %1115  ;;  %v1377_v56 = vmul.f32 %v7448_v2, %v8785_v20 }
 0x46f   : > { %6883 = vmatprep.subr.msk.bf16.mxu0 %vm8515_vm7, %v8378_v53  ;;  %7459 = vrcp.f32 %v1116_v33 }
 0x470   : > { %v7450_v37 = vpop.eup %7449  ;;  %6243 = vmatprep.mubr.msk.f32.mxu0 %vm906_vm12, %v1377_v56 }
 0x471   : > { %v7452_v16 = vpop.eup %7451  ;;  %v1125_v25 = vpop.xlane.xlu1 %1124  ;;  %6244 = vmatmul.mubr.msk.f32.gmra.mrb[20].mxu0 %vm906_vm12, %v1378_v21  ;;  %v1380_v32 = vmul.f32 %v7450_v37, %v8793_v36 }
 0x472   : > { %7461 = vrcp.f32 %v1125_v25  ;;  %6886 = vmatpush3.bf16.msk.msra.mxu0 %vm8515_vm7, %v8378_v53  ;;  %v1122_v20 = vpop.xlane.xlu0 %1121  ;;  %v1379_v22 = vmul.f32 %v7452_v16, %v8795_v14 }
 0x473   : > { %6889 = vmatprep.subr.msk.bf16.mxu0 %vm8515_vm7, %v8409_v45  ;;  %7463 = vrcp.f32 %v1122_v20  ;;  %v5533_v20 = vld [vmem:[%s10320_s2 + $0x58] sm:$0xff] }
 0x474   : > { %v7454_v19 = vpop.eup %7453  ;;  %6246 = vmatprep.mubr.msk.f32.mxu0 %vm906_vm12, %v1379_v22 }
 0x475   : > { %v7456_v3 = vpop.eup %7455  ;;  %v1131_v62 = vpop.xlane.xlu1 %1130  ;;  %6247 = vmatmul.mubr.msk.f32.gmra.mrb[22].mxu0 %vm906_vm12, %v1380_v32  ;;  %v1141_v36 = vmul.f32 %v7454_v19, %v8803_v61 }
 0x476   : > { %7465 = vrcp.f32 %v1131_v62  ;;  %6892 = vmatpush3.bf16.msk.msra.mxu0 %vm8515_vm7, %v8409_v45  ;;  %v1128_v14 = vpop.xlane.xlu0 %1127  ;;  %v1140_v27 = vmul.f32 %v7456_v3, %v8805_v38 }
 0x477   : > { %6919 = vmatprep.subr.msk.bf16.mxu0 %vm8950_vm15, %v8308_v58  ;;  %7467 = vrcp.f32 %v1128_v14 }
 0x478   : > { %v7458_v47 = vpop.eup %7457  ;;  %6265 = vmatprep.mubr.msk.f32.mxu0 %vm906_vm12, %v1140_v27 }
 0x479   : > { %v7460_v63 = vpop.eup %7459  ;;  %6266 = vmatmul.mubr.msk.f32.vlgmr.msra.gmra.mrb[16].mxu0 %vm906_vm12, %v1141_v36  ;;  %v1143_v49 = vmul.f32 %v7458_v47, %v8812_v8 }
 0x47a   : > { %v1837_v31 = vpop.xlane.xlu1 %1836  ;;  %6922 = vmatpush3.bf16.msk.msra.mxu0 %vm8950_vm15, %v8308_v58  ;;  %v1142_v38 = vmul.f32 %v7460_v63, %v8815_v29  ;;  %v616_v63 = vld [vmem:[%s10320_s2 + $0x8] sm:$0xff] }
 0x47b   : > { %7469 = vrcp.f32 %v1837_v31  ;;  %6925 = vmatprep.subr.msk.bf16.mxu0 %vm8950_vm15, %v8346_v10  ;;  %v1834_v61 = vpop.xlane.xlu0 %1833 }
 0x47c   : > { %v7462_v2 = vpop.eup %7461  ;;  %7471 = vrcp.f32 %v1834_v61  ;;  %6268 = vmatprep.mubr.msk.f32.mxu0 %vm906_vm12, %v1142_v38 }
 0x47d   : > { %v7464_v24 = vpop.eup %7463  ;;  %6269 = vmatmul.mubr.msk.f32.gmra.mrb[18].mxu0 %vm906_vm12, %v1143_v49  ;;  %v1145_v56 = vmul.f32 %v7462_v2, %v8822_v39 }
 0x47e   : > { %v1843_v33 = vpop.xlane.xlu1 %1842  ;;  %6928 = vmatpush3.bf16.msk.msra.mxu0 %vm8950_vm15, %v8346_v10  ;;  %v1144_v29 = vmul.f32 %v7464_v24, %v8825_v55  ;;  %v617_v24 = vld [vmem:[%s10320_s2 + $0x10] sm:$0xff] }
 0x47f   : > { %7473 = vrcp.f32 %v1843_v33  ;;  %6931 = vmatprep.subr.msk.bf16.mxu0 %vm8950_vm15, %v8378_v53  ;;  %v1840_v8 = vpop.xlane.xlu0 %1839 }
 0x480   : > { %v7466_v21 = vpop.eup %7465  ;;  %7475 = vrcp.f32 %v1840_v8  ;;  %6271 = vmatprep.mubr.msk.f32.mxu0 %vm906_vm12, %v1144_v29 }
 0x481   : > { %v7468_v37 = vpop.eup %7467  ;;  %6272 = vmatmul.mubr.msk.f32.gmra.mrb[20].mxu0 %vm906_vm12, %v1145_v56  ;;  %v1147_v25 = vmul.f32 %v7466_v21, %v8832_v6 }
 0x482   : > { %v1849_v55 = vpop.xlane.xlu1 %1848  ;;  %6934 = vmatpush3.bf16.msk.msra.mxu0 %vm8950_vm15, %v8378_v53  ;;  %v1146_v16 = vmul.f32 %v7468_v37, %v8835_v7 }
 0x483   : > { %7477 = vrcp.f32 %v1849_v55  ;;  %6937 = vmatprep.subr.msk.bf16.mxu0 %vm8950_vm15, %v8409_v45  ;;  %v1846_v39 = vpop.xlane.xlu0 %1845 }
 0x484   : > { %7479 = vrcp.f32 %v1846_v39  ;;  %6274 = vmatprep.mubr.msk.f32.mxu0 %vm906_vm12, %v1146_v16  ;;  %v619_v16 = vld [vmem:[%s10320_s2 + $0x20] sm:$0xff]  ;;  %v620_v39 = vld [vmem:[%s10320_s2 + $0x28] sm:$0xff] }
 0x485   : > { %v7470_v22 = vpop.eup %7469  ;;  %6275 = vmatmul.mubr.msk.f32.gmra.mrb[22].mxu0 %vm906_vm12, %v1147_v25 }
 0x486   : > { %v7472_v32 = vpop.eup %7471  ;;  %v1855_v7 = vpop.xlane.xlu1 %1854  ;;  %6940 = vmatpush3.bf16.msk.msra.mxu0 %vm8950_vm15, %v8409_v45  ;;  %v1865_v3 = vmul.f32 %v7470_v22, %v8843_v12  ;;  %v6997_v22 = vpack.c.bf16 %v620_v39, %v619_v16  ;;  %v5547_v16 = vld [vmem:[%s10321_s3 + $0x3] ss:$0 sm:$0xff] }
 0x487   : > { %7481 = vrcp.f32 %v1855_v7  ;;  %6967 = vmatprep.subr.msk.bf16.mxu0 %vm8996_vm8, %v8308_v58  ;;  %v1852_v6 = vpop.xlane.xlu0 %1851  ;;  %v1864_v19 = vmul.f32 %v7472_v32, %v8845_v43  ;;  %v621_v7 = vld [vmem:[%s10320_s2 + $0x30] sm:$0xff] }
 0x488   : > { %7483 = vrcp.f32 %v1852_v6  ;;  %v622_v6 = vld [vmem:[%s10320_s2 + $0x38] sm:$0xff] }
 0x489   : > { %v7474_v62 = vpop.eup %7473  ;;  %6321 = vmatprep.mubr.msk.f32.mxu0 %vm906_vm12, %v1864_v19 }
 0x48a   : > { %v7476_v14 = vpop.eup %7475  ;;  %6322 = vmatmul.mubr.msk.f32.vlgmr.msra.gmra.mrb[16].mxu0 %vm906_vm12, %v1865_v3  ;;  %v1867_v43 = vmul.f32 %v7474_v62, %v8851_v34  ;;  %v615_v34 = vld [vmem:[%s10320_s2] sm:$0xff]  ;;  %v7001_v3 = vpack.c.bf16 %v622_v6, %v621_v7 }
 0x48b   : > { %6970 = vmatpush3.bf16.msk.msra.mxu0 %vm8996_vm8, %v8308_v58  ;;  %v1866_v27 = vmul.f32 %v7476_v14, %v8853_v26  ;;  %v6989_v31 = vpack.c.bf16 %v616_v63, %v615_v34 }
 0x48c   : > { %6973 = vmatprep.subr.msk.bf16.mxu0 %vm8996_vm8, %v8346_v10 }
 0x48d   : > { %v7478_v12 = vpop.eup %7477  ;;  %6324 = vmatprep.mubr.msk.f32.mxu0 %vm906_vm12, %v1866_v27 }
 0x48e   : > { %v7480_v36 = vpop.eup %7479  ;;  %6325 = vmatmul.mubr.msk.f32.gmra.mrb[18].mxu0 %vm906_vm12, %v1867_v43  ;;  %v1869_v26 = vmul.f32 %v7478_v12, %v8859_v59 }
 0x48f   : > { %6976 = vmatpush3.bf16.msk.msra.mxu0 %vm8996_vm8, %v8346_v10  ;;  %v1868_v58 = vmul.f32 %v7480_v36, %v8861_v11 }
 0x490   : > { %6979 = vmatprep.subr.msk.bf16.mxu0 %vm8996_vm8, %v8378_v53 }
 0x491   : > { %v7482_v47 = vpop.eup %7481  ;;  %6327 = vmatprep.mubr.msk.f32.mxu0 %vm906_vm12, %v1868_v58 }
 0x492   : > { %v7484_v10 = vpop.eup %7483  ;;  %6328 = vmatmul.mubr.msk.f32.gmra.mrb[20].mxu0 %vm906_vm12, %v1869_v26  ;;  %v1871_v11 = vmul.f32 %v7482_v47, %v8867_v52 }
 0x493   : > { %6982 = vmatpush3.bf16.msk.msra.mxu0 %vm8996_vm8, %v8378_v53  ;;  %v1870_v59 = vmul.f32 %v7484_v10, %v8869_v54 }
 0x494   : > { %6985 = vmatprep.subr.msk.bf16.mxu0 %vm8996_vm8, %v8409_v45 }
 0x495   : > { %6330 = vmatprep.mubr.msk.f32.mxu0 %vm906_vm12, %v1870_v59 }
 0x496   : > { %6331 = vmatmul.mubr.msk.f32.gmra.mrb[22].mxu0 %vm906_vm12, %v1871_v11 }
 0x497   : > { %6988 = vmatpush3.bf16.msk.msra.mxu0 %vm8996_vm8, %v8409_v45  ;;  %v618_v45 = vld [vmem:[%s10320_s2 + $0x18] sm:$0xff] }
 0x498   : > { %6990 = vmatprep.subr.bf16.mxu0 %v6989_v31  ;;  %v6993_v37 = vpack.c.bf16 %v618_v45, %v617_v24 }
 0x49a   : > { %v2207_v38 = vpop.xlane.xlu1 %2206 }
 0x49b   : > { %7485 = vrcp.f32 %v2207_v38  ;;  %v2204_v53 = vpop.xlane.xlu0 %2203 }
 0x49c   : > { %7487 = vrcp.f32 %v2204_v53 }
 0x49e   : > { %v2213_v54 = vpop.xlane.xlu1 %2212 }
 0x49f   : > { %7489 = vrcp.f32 %v2213_v54  ;;  %v2210_v61 = vpop.xlane.xlu0 %2209 }
 0x4a0   : > { %7491 = vrcp.f32 %v2210_v61 }
 0x4a2   : > { %v2219_v49 = vpop.xlane.xlu1 %2218 }
 0x4a3   : > { %7493 = vrcp.f32 %v2219_v49  ;;  %v2216_v52 = vpop.xlane.xlu0 %2215 }
 0x4a4   : > { %7495 = vrcp.f32 %v2216_v52 }
 0x4a5   : > { %v7486_v2 = vpop.eup %7485 }
 0x4a6   : > { %v7488_v33 = vpop.eup %7487  ;;  %v2225_v29 = vpop.xlane.xlu1 %2224  ;;  %v2235_v21 = vmul.f32 %v7486_v2, %v8883_v46 }
 0x4a7   : > { %7497 = vrcp.f32 %v2225_v29  ;;  %v2222_v8 = vpop.xlane.xlu0 %2221  ;;  %v2234_v56 = vmul.f32 %v7488_v33, %v8885_v57 }
 0x4a8   : > { %7499 = vrcp.f32 %v2222_v8 }
 0x4a9   : > { %v7490_v55 = vpop.eup %7489  ;;  %6377 = vmatprep.mubr.msk.f32.mxu0 %vm906_vm12, %v2234_v56 }
 0x4aa   : > { %v7492_v25 = vpop.eup %7491  ;;  %6378 = vmatmul.mubr.msk.f32.vlgmr.msra.gmra.mrb[16].mxu0 %vm906_vm12, %v2235_v21  ;;  %v2237_v46 = vmul.f32 %v7490_v55, %v8891_v44 }
 0x4ab   : > { %v2236_v57 = vmul.f32 %v7492_v25, %v8893_v5  ;;  %6992 = vmatpush3.bf16.msra.mxu0 %v6989_v31  ;;  %v5513_v31 = vld [vmem:[%s10321_s3 + $0x9] ss:$0 sm:$0xff] }
 0x4ac   : > { %6994 = vmatprep.subr.bf16.mxu0 %v6993_v37 }
 0x4ad   : > { %v7494_v32 = vpop.eup %7493  ;;  %6380 = vmatprep.mubr.msk.f32.mxu0 %vm906_vm12, %v2236_v57 }
 0x4ae   : > { %v7496_v19 = vpop.eup %7495  ;;  %6381 = vmatmul.mubr.msk.f32.gmra.mrb[18].mxu0 %vm906_vm12, %v2237_v46  ;;  %v2239_v44 = vmul.f32 %v7494_v32, %v8899_v13  ;;  %v5526_v13 = vld [vmem:[%s10319_s1 + $0x60] sm:$0xff] }
 0x4af   : > { %v2238_v5 = vmul.f32 %v7496_v19, %v8901_v41  ;;  %6996 = vmatpush3.bf16.msra.mxu0 %v6993_v37  ;;  %v5527_v41 = vld [vmem:[%s10319_s1 + $0x68] sm:$0xff] }
 0x4b0   : > { %6998 = vmatprep.subr.bf16.mxu0 %v6997_v22  ;;  %v7013_v12 = vpack.c.bf16 %v5527_v41, %v5526_v13 }
 0x4b1   : > { %v7498_v62 = vpop.eup %7497  ;;  %6383 = vmatprep.mubr.msk.f32.mxu0 %vm906_vm12, %v2238_v5 }
 0x4b2   : > { %v7500_v14 = vpop.eup %7499  ;;  %6384 = vmatmul.mubr.msk.f32.gmra.mrb[20].mxu0 %vm906_vm12, %v2239_v44  ;;  %v2241_v43 = vmul.f32 %v7498_v62, %v8907_v17  ;;  %v5528_v17 = vld [vmem:[%s10319_s1 + $0x70] sm:$0xff] }
 0x4b3   : > { %v2240_v27 = vmul.f32 %v7500_v14, %v8909_v35  ;;  %7000 = vmatpush3.bf16.msra.mxu0 %v6997_v22  ;;  %v5529_v35 = vld [vmem:[%s10319_s1 + $0x78] sm:$0xff] }
 0x4b4   : > { %7002 = vmatprep.subr.bf16.mxu0 %v7001_v3  ;;  %v7017_v26 = vpack.c.bf16 %v5529_v35, %v5528_v17 }
 0x4b5   : > { %6386 = vmatprep.mubr.msk.f32.mxu0 %vm906_vm12, %v2240_v27 }
 0x4b6   : > { %6387 = vmatmul.mubr.msk.f32.gmra.mrb[22].mxu0 %vm906_vm12, %v2241_v43 }
 0x4b7   : > { %7004 = vmatpush3.bf16.msra.mxu0 %v7001_v3 }
 0x4b8   : > { %7014 = vmatprep.subr.bf16.mxu0 %v7013_v12 }
 0x57d   : > { %v6379_v36 = vpop.f32.mrb[16].mxu0 }
 0x57e   : > { %v2332_v58 = vpop.f32.mrb[17].mxu0 }
 0x57f   : > { %6405 = vmatprep.mubr.msk.f32.mxu0 %vm906_vm12, %v2332_v58 }
 0x580   : > { %6406 = vmatmul.mubr.msk.f32.vlgmr.msra.gmra.mrb[24].mxu0 %vm906_vm12, %v6379_v36 }
 0x581   : > { %v6382_v47 = vpop.f32.mrb[18].mxu0  ;;  %7016 = vmatpush3.bf16.msra.mxu0 %v7013_v12 }
 0x582   : > { %v2342_v34 = vpop.f32.mrb[19].mxu0  ;;  %7018 = vmatprep.subr.bf16.mxu0 %v7017_v26 }
 0x583   : > { %6408 = vmatprep.mubr.msk.f32.mxu0 %vm906_vm12, %v2342_v34 }
 0x584   : > { %6409 = vmatmul.mubr.msk.f32.gmra.mrb[26].mxu0 %vm906_vm12, %v6382_v47 }
 0x585   : > { %v6385_v63 = vpop.f32.mrb[20].mxu0  ;;  %7020 = vmatpush3.bf16.msra.mxu0 %v7017_v26 }
 0x586   : > { %v2352_v10 = vpop.f32.mrb[21].mxu0 }
 0x587   : > { %6411 = vmatprep.mubr.msk.f32.mxu0 %vm906_vm12, %v2352_v10 }
 0x588   : > { %6412 = vmatmul.mubr.msk.f32.gmra.mrb[28].mxu0 %vm906_vm12, %v6385_v63 }
 0x589   : > { %v6388_v59 = vpop.f32.mrb[22].mxu0 }
 0x58a   : > { %v2362_v11 = vpop.f32.mrb[23].mxu0 }
 0x58b   : > { %6414 = vmatprep.mubr.msk.f32.mxu0 %vm906_vm12, %v2362_v11 }
 0x58c   : > { %6415 = vmatmul.mubr.msk.f32.gmra.mrb[30].mxu0 %vm906_vm12, %v6388_v59 }
 0x653   : > { %v6407_v38 = vpop.f32.mrb[24].mxu0 }
 0x654   : > { %v2473_v53 = vpop.f32.mrb[25].mxu0  ;;  %v9109_v61 = vadd.f32 %v6407_v38, %v5513_v31 }
 0x655   : > { %v9107_v54 = vadd.f32 %v5513_v31, %v2473_v53 }
 0x657   : > { %v6410_v49 = vpop.f32.mrb[26].mxu0  ;;  %6445 = vmatprep.mubr.msk.f32.mxu0 %vm242_vm0, %v9107_v54 }
 0x658   : > { %v2483_v52 = vpop.f32.mrb[27].mxu0  ;;  %6446 = vmatmul.mubr.msk.f32.vlgmr.msra.gmra.mrb[32].mxu0 %vm242_vm0, %v9109_v61  ;;  %v9117_v24 = vadd.f32 %v6410_v49, %v5513_v31 }
 0x659   : > { %v9115_v2 = vadd.f32 %v5513_v31, %v2483_v52 }
 0x65b   : > { %v6413_v45 = vpop.f32.mrb[28].mxu0  ;;  %6448 = vmatprep.mubr.msk.f32.mxu0 %vm242_vm0, %v9115_v2 }
 0x65c   : > { %v2493_v33 = vpop.f32.mrb[29].mxu0  ;;  %6449 = vmatmul.mubr.msk.f32.gmra.mrb[34].mxu0 %vm242_vm0, %v9117_v24  ;;  %v9125_v8 = vadd.f32 %v6413_v45, %v5513_v31 }
 0x65d   : > { %v9123_v29 = vadd.f32 %v5513_v31, %v2493_v33 }
 0x65f   : > { %v6416_v56 = vpop.f32.mrb[30].mxu0  ;;  %6451 = vmatprep.mubr.msk.f32.mxu0 %vm242_vm0, %v9123_v29 }
 0x660   : > { %v2503_v21 = vpop.f32.mrb[31].mxu0  ;;  %6452 = vmatmul.mubr.msk.f32.gmra.mrb[36].mxu0 %vm242_vm0, %v9125_v8  ;;  %v9133_v55 = vadd.f32 %v6416_v56, %v5513_v31 }
 0x661   : > { %v9131_v37 = vadd.f32 %v5513_v31, %v2503_v21 }
 0x663   : > { %6454 = vmatprep.mubr.msk.f32.mxu0 %vm242_vm0, %v9131_v37 }
 0x664   : > { %6455 = vmatmul.mubr.msk.f32.gmra.mrb[38].mxu0 %vm242_vm0, %v9133_v55 }
 0x665   : > { %6501 = vmatprep.mubr.msk.f32.mxu0 %vm906_vm12, %v8739_v42 }
 0x72b   : > { %v6447_v39 = vpop.f32.mrb[32].mxu0 }
 0x72c   : > { %v2743_v25 = vadd.f32 %v6447_v39, %v5547_v16  ;;  %v2737_v57 = vpop.f32.mrb[33].mxu0 }
 0x72d   : > { %v2738_v46 = vadd.f32 %v5547_v16, %v2737_v57 }
 0x72e   : > { %v2777_v22 = vsel %vm217_vm11, %v2743_v25, 0.0  ;;  %v3034_v32 = vsel %vm8285_vm9, %v2743_v25, 0.0  ;;  %v3525_v7 = vsel %vm8289_vm10, %v2743_v25, 0.0  ;;  %v3895_v6 = vsel %vm8294_vm14, %v2743_v25, 0.0 }
 0x72f   : > { %v9152_v19 = vpack.c.bf16 %v2743_v25, %v2738_v46  ;;  %v6450_v5 = vpop.f32.mrb[34].mxu0  ;;  %v2776_v44 = vsel %vm217_vm11, %v2738_v46, 0.0  ;;  %v3033_v3 = vsel %vm8285_vm9, %v2738_v46, 0.0  ;;  %v3524_v62 = vsel %vm8289_vm10, %v2738_v46, 0.0 }
 0x730   : > { %v2753_v14 = vadd.f32 %v6450_v5, %v5547_v16  ;;  %v2747_v27 = vpop.f32.mrb[35].mxu0  ;;  %v7021_v43 = vpack.c.bf16 %v2777_v22, %v2776_v44  ;;  %v7045_v13 = vpack.c.bf16 %v3034_v32, %v3033_v3  ;;  %v9160_v41 = vpack.c.bf16 %v3525_v7, %v3524_v62 }
 0x731   : > { %v2748_v12 = vadd.f32 %v5547_v16, %v2747_v27  ;;  %v3894_v17 = vsel %vm8294_vm14, %v2738_v46, 0.0 }
 0x732   : > { %7023 = vmatprep.subr.msk.bf16.mxu1 %vm8314_vm13, %v7021_v43  ;;  %7047 = vmatprep.subr.msk.bf16.mxu0 %vm8314_vm13, %v7045_v13  ;;  %v2779_v35 = vsel %vm217_vm11, %v2753_v14, 0.0  ;;  %v3036_v36 = vsel %vm8285_vm9, %v2753_v14, 0.0  ;;  %v3527_v58 = vsel %vm8289_vm10, %v2753_v14, 0.0  ;;  %v9174_v26 = vpack.c.bf16 %v3895_v6, %v3894_v17 }
 0x733   : > { %v9176_v47 = vpack.c.bf16 %v2753_v14, %v2748_v12  ;;  %v6453_v34 = vpop.f32.mrb[36].mxu0  ;;  %7026 = vmatpush3.bf16.xpose.msk.msra.mxu1 %vm8314_vm13, %v7021_v43  ;;  %7050 = vmatpush3.bf16.xpose.msk.msra.mxu0 %vm8314_vm13, %v7045_v13  ;;  %v2778_v63 = vsel %vm217_vm11, %v2748_v12, 0.0  ;;  %v3035_v10 = vsel %vm8285_vm9, %v2748_v12, 0.0  ;;  %v3526_v59 = vsel %vm8289_vm10, %v2748_v12, 0.0 }
 0x734   : > { %v2763_v11 = vadd.f32 %v6453_v34, %v5547_v16  ;;  %v2757_v31 = vpop.f32.mrb[37].mxu0  ;;  %v7027_v38 = vpack.c.bf16 %v2779_v35, %v2778_v63  ;;  %v7051_v53 = vpack.c.bf16 %v3036_v36, %v3035_v10  ;;  %v9188_v49 = vpack.c.bf16 %v3527_v58, %v3526_v59 }
 0x735   : > { %v2758_v52 = vadd.f32 %v5547_v16, %v2757_v31  ;;  %v3896_v45 = vsel %vm8294_vm14, %v2748_v12, 0.0  ;;  %v3897_v33 = vsel %vm8294_vm14, %v2753_v14, 0.0 }
 0x736   : > { %7029 = vmatprep.subr.msk.bf16.mxu1 %vm8314_vm13, %v7027_v38  ;;  %7053 = vmatprep.subr.msk.bf16.mxu0 %vm8314_vm13, %v7051_v53  ;;  %v2781_v56 = vsel %vm217_vm11, %v2763_v11, 0.0  ;;  %v3038_v21 = vsel %vm8285_vm9, %v2763_v11, 0.0  ;;  %v3529_v39 = vsel %vm8289_vm10, %v2763_v11, 0.0  ;;  %v9204_v25 = vpack.c.bf16 %v3897_v33, %v3896_v45 }
 0x737   : > { %v9206_v57 = vpack.c.bf16 %v2763_v11, %v2758_v52  ;;  %v6456_v46 = vpop.f32.mrb[38].mxu0  ;;  %v2780_v22 = vsel %vm217_vm11, %v2758_v52, 0.0  ;;  %v3037_v32 = vsel %vm8285_vm9, %v2758_v52, 0.0  ;;  %v3528_v7 = vsel %vm8289_vm10, %v2758_v52, 0.0 }
 0x738   : > { %v2773_v6 = vadd.f32 %v6456_v46, %v5547_v16  ;;  %v2767_v5 = vpop.f32.mrb[39].mxu0  ;;  %v7033_v44 = vpack.c.bf16 %v2781_v56, %v2780_v22  ;;  %v7057_v3 = vpack.c.bf16 %v3038_v21, %v3037_v32  ;;  %v7129_v62 = vpack.c.bf16 %v3529_v39, %v3528_v7 }
 0x739   : > { %v2768_v14 = vadd.f32 %v5547_v16, %v2767_v5  ;;  %v3898_v27 = vsel %vm8294_vm14, %v2758_v52, 0.0  ;;  %v3899_v43 = vsel %vm8294_vm14, %v2763_v11, 0.0 }
 0x73a   : > { %v2783_v13 = vsel %vm217_vm11, %v2773_v6, 0.0  ;;  %v3040_v12 = vsel %vm8285_vm9, %v2773_v6, 0.0  ;;  %v3531_v17 = vsel %vm8289_vm10, %v2773_v6, 0.0  ;;  %v9224_v35 = vpack.c.bf16 %v3899_v43, %v3898_v27 }
 0x73b   : > { %v9226_v36 = vpack.c.bf16 %v2773_v6, %v2768_v14  ;;  %7032 = vmatpush3.bf16.xpose.msk.msra.mxu1 %vm8314_vm13, %v7027_v38  ;;  %7056 = vmatpush3.bf16.xpose.msk.msra.mxu0 %vm8314_vm13, %v7051_v53  ;;  %v2782_v16 = vsel %vm217_vm11, %v2768_v14, 0.0  ;;  %v3039_v58 = vsel %vm8285_vm9, %v2768_v14, 0.0  ;;  %v3530_v34 = vsel %vm8289_vm10, %v2768_v14, 0.0 }
 0x73c   : > { %7035 = vmatprep.subr.msk.bf16.mxu1 %vm8314_vm13, %v7033_v44  ;;  %7059 = vmatprep.subr.msk.bf16.mxu0 %vm8314_vm13, %v7057_v3  ;;  %v7039_v63 = vpack.c.bf16 %v2783_v13, %v2782_v16  ;;  %v7063_v10 = vpack.c.bf16 %v3040_v12, %v3039_v58  ;;  %v7135_v59 = vpack.c.bf16 %v3531_v17, %v3530_v34  ;;  %v3900_v11 = vsel %vm8294_vm14, %v2768_v14, 0.0 }
 0x73d   : > { %v3901_v15 = vsel %vm8294_vm14, %v2773_v6, 0.0 }
 0x73e   : > { %v7183_v18 = vpack.c.bf16 %v3901_v15, %v3900_v11 }
 0x743   : > { %7038 = vmatpush3.bf16.xpose.msk.msra.mxu1 %vm8314_vm13, %v7033_v44  ;;  %7062 = vmatpush3.bf16.xpose.msk.msra.mxu0 %vm8314_vm13, %v7057_v3 }
 0x744   : > { %7041 = vmatprep.subr.msk.bf16.mxu1 %vm8314_vm13, %v7039_v63  ;;  %7065 = vmatprep.subr.msk.bf16.mxu0 %vm8314_vm13, %v7063_v10 }
 0x74b   : > { %7044 = vmatpush3.bf16.xpose.msk.msra.mxu1 %vm8314_vm13, %v7039_v63  ;;  %7068 = vmatpush3.bf16.xpose.msk.msra.mxu0 %vm8314_vm13, %v7063_v10 }
 0x74c   : > { %7071 = vmatprep.subr.msk.bf16.mxu1 %vm8440_vm3, %v9152_v19  ;;  %7119 = vmatprep.subr.msk.bf16.mxu0 %vm8314_vm13, %v9160_v41 }
 0x752   : > { %6474 = vmatmul.mubr.msk.f32.vlgmr.msra.gmra.mrb[40].mxu1 %vm906_vm12, %v8737_v1  ;;  %6502 = vmatmul.mubr.msk.f32.vlgmr.msra.gmra.mrb[40].mxu0 %vm906_vm12, %v8737_v1 }
 0x753   : > { %6476 = vmatprep.mubr.msk.f32.mxu1 %vm906_vm12, %v8745_v23  ;;  %6504 = vmatprep.mubr.msk.f32.mxu0 %vm906_vm12, %v8745_v23 }
 0x754   : > { %7074 = vmatpush3.bf16.msk.msra.mxu1 %vm8440_vm3, %v9152_v19  ;;  %7122 = vmatpush3.bf16.xpose.msk.msra.mxu0 %vm8314_vm13, %v9160_v41 }
 0x755   : > { %7077 = vmatprep.subr.msk.bf16.mxu1 %vm8440_vm3, %v9176_v47  ;;  %7125 = vmatprep.subr.msk.bf16.mxu0 %vm8314_vm13, %v9188_v49 }
 0x756   : > { %6477 = vmatmul.mubr.msk.f32.gmra.mrb[42].mxu1 %vm906_vm12, %v8743_v51  ;;  %6505 = vmatmul.mubr.msk.f32.gmra.mrb[42].mxu0 %vm906_vm12, %v8743_v51 }
 0x757   : > { %6479 = vmatprep.mubr.msk.f32.mxu1 %vm906_vm12, %v8749_v30  ;;  %6507 = vmatprep.mubr.msk.f32.mxu0 %vm906_vm12, %v8749_v30 }
 0x758   : > { %7080 = vmatpush3.bf16.msk.msra.mxu1 %vm8440_vm3, %v9176_v47 }
 0x759   : > { %7083 = vmatprep.subr.msk.bf16.mxu1 %vm8440_vm3, %v9206_v57 }
 0x75a   : > { %6480 = vmatmul.mubr.msk.f32.gmra.mrb[44].mxu1 %vm906_vm12, %v8747_v4  ;;  %6508 = vmatmul.mubr.msk.f32.gmra.mrb[44].mxu0 %vm906_vm12, %v8747_v4 }
 0x75b   : > { %6482 = vmatprep.mubr.msk.f32.mxu1 %vm906_vm12, %v8753_v9  ;;  %6510 = vmatprep.mubr.msk.f32.mxu0 %vm906_vm12, %v8753_v9 }
 0x75c   : > { %7086 = vmatpush3.bf16.msk.msra.mxu1 %vm8440_vm3, %v9206_v57  ;;  %7128 = vmatpush3.bf16.xpose.msk.msra.mxu0 %vm8314_vm13, %v9188_v49 }
 0x75d   : > { %7089 = vmatprep.subr.msk.bf16.mxu1 %vm8440_vm3, %v9226_v36  ;;  %7131 = vmatprep.subr.msk.bf16.mxu0 %vm8314_vm13, %v7129_v62 }
 0x75e   : > { %6483 = vmatmul.mubr.msk.f32.gmra.mrb[46].mxu1 %vm906_vm12, %v10341_v60  ;;  %6511 = vmatmul.mubr.msk.f32.gmra.mrb[46].mxu0 %vm906_vm12, %v10341_v60 }
 0x75f   : > { %6585 = vmatprep.mubr.msk.f32.mxu0 %vm906_vm12, %v8739_v42 }
 0x760   : > { %7092 = vmatpush3.bf16.msk.msra.mxu1 %vm8440_vm3, %v9226_v36 }
 0x761   : > { %7095 = vmatprep.subr.msk.bf16.mxu1 %vm8515_vm7, %v9152_v19 }
 0x764   : > { %7134 = vmatpush3.bf16.xpose.msk.msra.mxu0 %vm8314_vm13, %v7129_v62 }
 0x765   : > { %7137 = vmatprep.subr.msk.bf16.mxu0 %vm8314_vm13, %v7135_v59 }
 0x76c   : > { %7140 = vmatpush3.bf16.xpose.msk.msra.mxu0 %vm8314_vm13, %v7135_v59 }
 0x76d   : > { %7167 = vmatprep.subr.msk.bf16.mxu0 %vm8314_vm13, %v9174_v26 }
 0x773   : > { %6586 = vmatmul.mubr.msk.f32.vlgmr.msra.gmra.mrb[48].mxu0 %vm906_vm12, %v8737_v1 }
 0x774   : > { %6588 = vmatprep.mubr.msk.f32.mxu0 %vm906_vm12, %v8745_v23  ;;  %7170 = vmatpush3.bf16.xpose.msk.msra.mxu0 %vm8314_vm13, %v9174_v26 }
 0x775   : > { %7173 = vmatprep.subr.msk.bf16.mxu0 %vm8314_vm13, %v9204_v25 }
 0x777   : > { %6589 = vmatmul.mubr.msk.f32.gmra.mrb[50].mxu0 %vm906_vm12, %v8743_v51 }
 0x778   : > { %6591 = vmatprep.mubr.msk.f32.mxu0 %vm906_vm12, %v8749_v30 }
 0x77b   : > { %6592 = vmatmul.mubr.msk.f32.gmra.mrb[52].mxu0 %vm906_vm12, %v8747_v4 }
 0x77c   : > { %6594 = vmatprep.mubr.msk.f32.mxu0 %vm906_vm12, %v8753_v9  ;;  %7176 = vmatpush3.bf16.xpose.msk.msra.mxu0 %vm8314_vm13, %v9204_v25 }
 0x77d   : > { %7179 = vmatprep.subr.msk.bf16.mxu0 %vm8314_vm13, %v9224_v35 }
 0x77f   : > { %6595 = vmatmul.mubr.msk.f32.gmra.mrb[54].mxu0 %vm906_vm12, %v10341_v60 }
 0x780   : > { %6641 = vmatprep.mubr.msk.f32.mxu0 %vm906_vm12, %v8739_v42 }
 0x784   : > { %7182 = vmatpush3.bf16.xpose.msk.msra.mxu0 %vm8314_vm13, %v9224_v35 }
 0x785   : > { %7185 = vmatprep.subr.msk.bf16.mxu0 %vm8314_vm13, %v7183_v18 }
 0x78c   : > { %7188 = vmatpush3.bf16.xpose.msk.msra.mxu0 %vm8314_vm13, %v7183_v18 }
 0x793   : > { %6642 = vmatmul.mubr.msk.f32.vlgmr.msra.gmra.mrb[56].mxu0 %vm906_vm12, %v8737_v1 }
 0x794   : > { %6644 = vmatprep.mubr.msk.f32.mxu0 %vm906_vm12, %v8745_v23 }
 0x797   : > { %6645 = vmatmul.mubr.msk.f32.gmra.mrb[58].mxu0 %vm906_vm12, %v8743_v51 }
 0x798   : > { %6647 = vmatprep.mubr.msk.f32.mxu0 %vm906_vm12, %v8749_v30 }
 0x79b   : > { %6648 = vmatmul.mubr.msk.f32.gmra.mrb[60].mxu0 %vm906_vm12, %v8747_v4 }
 0x79c   : > { %6650 = vmatprep.mubr.msk.f32.mxu0 %vm906_vm12, %v8753_v9 }
 0x79f   : > { %6651 = vmatmul.mubr.msk.f32.gmra.mrb[62].mxu0 %vm906_vm12, %v10341_v60 }
 0x825   : > { %v9387_v48 = vpop.f32.mrb[40].mxu1  ;;  %v9389_v0 = vpop.f32.mrb[40].mxu0 }
 0x826   : > { %v9391_v28 = vpop.f32.mrb[41].mxu1  ;;  %v9393_v1 = vpop.f32.mrb[41].mxu0  ;;  %v3181_v42 = vsel %vm906_vm12, %v9389_v0, -inf  ;;  %v2948_v22 = vsel %vm906_vm12, %v9387_v48, -inf }
 0x827   : > { %3182 = vmax.xlane.f32.xlu1 %v3181_v42  ;;  %v3178_v51 = vsel %vm906_vm12, %v9393_v1, -inf  ;;  %v2945_v32 = vsel %vm906_vm12, %v9391_v28, -inf }
 0x828   : > { %3179 = vmax.xlane.f32.xlu0 %v3178_v51 }
 0x829   : > { %v9399_v23 = vpop.f32.mrb[42].mxu1  ;;  %v9401_v4 = vpop.f32.mrb[42].mxu0 }
 0x82a   : > { %v9403_v30 = vpop.f32.mrb[43].mxu1  ;;  %v9405_v9 = vpop.f32.mrb[43].mxu0  ;;  %v3187_v41 = vsel %vm906_vm12, %v9401_v4, -inf  ;;  %v2954_v7 = vsel %vm906_vm12, %v9399_v23, -inf }
 0x82b   : > { %3188 = vmax.xlane.f32.xlu1 %v3187_v41  ;;  %v3184_v26 = vsel %vm906_vm12, %v9405_v9, -inf  ;;  %v2951_v6 = vsel %vm906_vm12, %v9403_v30, -inf }
 0x82c   : > { %3185 = vmax.xlane.f32.xlu0 %v3184_v26 }
 0x82d   : > { %v9411_v31 = vpop.f32.mrb[44].mxu1  ;;  %v9413_v38 = vpop.f32.mrb[44].mxu0 }
 0x82e   : > { %v9415_v53 = vpop.f32.mrb[45].mxu1  ;;  %v9417_v49 = vpop.f32.mrb[45].mxu0  ;;  %v3193_v52 = vsel %vm906_vm12, %v9413_v38, -inf  ;;  %v2960_v5 = vsel %vm906_vm12, %v9411_v31, -inf }
 0x82f   : > { %3194 = vmax.xlane.f32.xlu1 %v3193_v52  ;;  %v3190_v45 = vsel %vm906_vm12, %v9417_v49, -inf  ;;  %v2957_v44 = vsel %vm906_vm12, %v9415_v53, -inf }
 0x830   : > { %3191 = vmax.xlane.f32.xlu0 %v3190_v45 }
 0x831   : > { %v9423_v33 = vpop.f32.mrb[46].mxu1  ;;  %v9425_v56 = vpop.f32.mrb[46].mxu0 }
 0x832   : > { %v9427_v21 = vpop.f32.mrb[47].mxu1  ;;  %v9429_v39 = vpop.f32.mrb[47].mxu0  ;;  %v3199_v25 = vsel %vm906_vm12, %v9425_v56, -inf  ;;  %v2966_v3 = vsel %vm906_vm12, %v9423_v33, -inf }
 0x833   : > { %3200 = vmax.xlane.f32.xlu1 %v3199_v25  ;;  %v3196_v46 = vsel %vm906_vm12, %v9429_v39, -inf  ;;  %v2963_v62 = vsel %vm906_vm12, %v9427_v21, -inf }
 0x834   : > { %3197 = vmax.xlane.f32.xlu0 %v3196_v46 }
 0x837   : > { %2949 = vmax.xlane.f32.xlu1 %v2948_v22 }
 0x838   : > { %2946 = vmax.xlane.f32.xlu0 %v2945_v32 }
 0x83b   : > { %2955 = vmax.xlane.f32.xlu1 %v2954_v7 }
 0x83c   : > { %2952 = vmax.xlane.f32.xlu0 %v2951_v6 }
 0x83f   : > { %2961 = vmax.xlane.f32.xlu1 %v2960_v5 }
 0x840   : > { %2958 = vmax.xlane.f32.xlu0 %v2957_v44 }
 0x843   : > { %2967 = vmax.xlane.f32.xlu1 %v2966_v3 }
 0x844   : > { %2964 = vmax.xlane.f32.xlu0 %v2963_v62 }
 0x846   : > { %v9451_v14 = vpop.f32.mrb[48].mxu0 }
 0x847   : > { %v9453_v27 = vpop.f32.mrb[49].mxu0  ;;  %v3672_v43 = vsel %vm906_vm12, %v9451_v14, -inf }
 0x848   : > { %3673 = vmax.xlane.f32.xlu1 %v3672_v43  ;;  %v3669_v13 = vsel %vm906_vm12, %v9453_v27, -inf }
 0x849   : > { %3670 = vmax.xlane.f32.xlu0 %v3669_v13 }
 0x84a   : > { %v9459_v12 = vpop.f32.mrb[50].mxu0 }
 0x84b   : > { %v9461_v17 = vpop.f32.mrb[51].mxu0  ;;  %v3678_v35 = vsel %vm906_vm12, %v9459_v12, -inf }
 0x84c   : > { %3679 = vmax.xlane.f32.xlu1 %v3678_v35  ;;  %v3675_v16 = vsel %vm906_vm12, %v9461_v17, -inf }
 0x84d   : > { %3676 = vmax.xlane.f32.xlu0 %v3675_v16 }
 0x84e   : > { %v9467_v58 = vpop.f32.mrb[52].mxu0 }
 0x84f   : > { %v9469_v34 = vpop.f32.mrb[53].mxu0  ;;  %v3684_v63 = vsel %vm906_vm12, %v9467_v58, -inf }
 0x850   : > { %3685 = vmax.xlane.f32.xlu1 %v3684_v63  ;;  %v3681_v10 = vsel %vm906_vm12, %v9469_v34, -inf }
 0x851   : > { %3682 = vmax.xlane.f32.xlu0 %v3681_v10 }
 0x852   : > { %v9475_v59 = vpop.f32.mrb[54].mxu0 }
 0x853   : > { %v9477_v11 = vpop.f32.mrb[55].mxu0  ;;  %v3690_v15 = vsel %vm906_vm12, %v9475_v59, -inf }
 0x854   : > { %3691 = vmax.xlane.f32.xlu1 %v3690_v15  ;;  %v3687_v18 = vsel %vm906_vm12, %v9477_v11, -inf }
 0x855   : > { %3688 = vmax.xlane.f32.xlu0 %v3687_v18 }
 0x866   : > { %v9483_v60 = vpop.f32.mrb[56].mxu0 }
 0x867   : > { %v9485_v42 = vpop.f32.mrb[57].mxu0  ;;  %v4042_v51 = vsel %vm906_vm12, %v9483_v60, -inf }
 0x868   : > { %4043 = vmax.xlane.f32.xlu1 %v4042_v51  ;;  %v4039_v41 = vsel %vm906_vm12, %v9485_v42, -inf }
 0x869   : > { %4040 = vmax.xlane.f32.xlu0 %v4039_v41 }
 0x86a   : > { %v9491_v26 = vpop.f32.mrb[58].mxu0 }
 0x86b   : > { %v9493_v52 = vpop.f32.mrb[59].mxu0  ;;  %v4048_v45 = vsel %vm906_vm12, %v9491_v26, -inf }
 0x86c   : > { %4049 = vmax.xlane.f32.xlu1 %v4048_v45  ;;  %v4045_v25 = vsel %vm906_vm12, %v9493_v52, -inf }
 0x86d   : > { %4046 = vmax.xlane.f32.xlu0 %v4045_v25 }
 0x86e   : > { %v9499_v46 = vpop.f32.mrb[60].mxu0 }
 0x86f   : > { %v9501_v22 = vpop.f32.mrb[61].mxu0  ;;  %v4054_v32 = vsel %vm906_vm12, %v9499_v46, -inf }
 0x870   : > { %4055 = vmax.xlane.f32.xlu1 %v4054_v32  ;;  %v4051_v7 = vsel %vm906_vm12, %v9501_v22, -inf }
 0x871   : > { %4052 = vmax.xlane.f32.xlu0 %v4051_v7 }
 0x872   : > { %v9507_v6 = vpop.f32.mrb[62].mxu0 }
 0x873   : > { %v9509_v5 = vpop.f32.mrb[63].mxu0  ;;  %v4060_v44 = vsel %vm906_vm12, %v9507_v6, -inf }
 0x874   : > { %4061 = vmax.xlane.f32.xlu1 %v4060_v44  ;;  %v4057_v3 = vsel %vm906_vm12, %v9509_v5, -inf }
 0x875   : > { %4058 = vmax.xlane.f32.xlu0 %v4057_v3 }
 0x8b4   : > { %v3183_v62 = vpop.xlane.xlu1 %3182 }
 0x8b5   : > { %v3203_v43 = vsub.f32 %v9389_v0, %v3183_v62  ;;  %v3180_v13 = vpop.xlane.xlu0 %3179 }
 0x8b6   : > { %v3202_v35 = vsub.f32 %v9393_v1, %v3180_v13 }
 0x8b7   : > { %v3212_v16 = vmul.f32 1.442695, %v3203_v43 }
 0x8b8   : > { %v3210_v63 = vmul.f32 1.442695, %v3202_v35  ;;  %v3189_v10 = vpop.xlane.xlu1 %3188 }
 0x8b9   : > { %7501 = vpow2.f32 %v3212_v16  ;;  %v3205_v15 = vsub.f32 %v9401_v4, %v3189_v10  ;;  %v3186_v18 = vpop.xlane.xlu0 %3185 }
 0x8ba   : > { %7503 = vpow2.f32 %v3210_v63  ;;  %v3204_v51 = vsub.f32 %v9405_v9, %v3186_v18 }
 0x8bb   : > { %v3216_v41 = vmul.f32 1.442695, %v3205_v15 }
 0x8bc   : > { %v3214_v45 = vmul.f32 1.442695, %v3204_v51  ;;  %v3195_v25 = vpop.xlane.xlu1 %3194 }
 0x8bd   : > { %7505 = vpow2.f32 %v3216_v41  ;;  %v3207_v32 = vsub.f32 %v9413_v38, %v3195_v25  ;;  %v3192_v0 = vpop.xlane.xlu0 %3191 }
 0x8be   : > { %7507 = vpow2.f32 %v3214_v45  ;;  %v3206_v1 = vsub.f32 %v9417_v49, %v3192_v0 }
 0x8bf   : > { %v3220_v7 = vmul.f32 1.442695, %v3207_v32 }
 0x8c0   : > { %v3218_v44 = vmul.f32 1.442695, %v3206_v1  ;;  %v3201_v3 = vpop.xlane.xlu1 %3200 }
 0x8c1   : > { %7509 = vpow2.f32 %v3220_v7  ;;  %v3209_v4 = vsub.f32 %v9425_v56, %v3201_v3  ;;  %v3198_v62 = vpop.xlane.xlu0 %3197 }
 0x8c2   : > { %7511 = vpow2.f32 %v3218_v44  ;;  %v3208_v9 = vsub.f32 %v9429_v39, %v3198_v62 }
 0x8c3   : > { %v9523_v43 = vpop.eup %7501  ;;  %v3224_v13 = vmul.f32 1.442695, %v3209_v4 }
 0x8c4   : > { %v9525_v35 = vpop.eup %7503  ;;  %v3222_v38 = vmul.f32 1.442695, %v3208_v9  ;;  %v2950_v16 = vpop.xlane.xlu1 %2949  ;;  %v3229_v49 = vsel %vm906_vm12, %v9523_v43, 0.0 }
 0x8c5   : > { %7513 = vpow2.f32 %v3224_v13  ;;  %v2970_v63 = vsub.f32 %v9387_v48, %v2950_v16  ;;  %v2947_v10 = vpop.xlane.xlu0 %2946  ;;  %3230 = vadd.xlane.f32.xlu1 %v3229_v49  ;;  %v3226_v56 = vsel %vm906_vm12, %v9525_v35, 0.0 }
 0x8c6   : > { %7515 = vpow2.f32 %v3222_v38  ;;  %v2969_v39 = vsub.f32 %v9391_v28, %v2947_v10  ;;  %3227 = vadd.xlane.f32.xlu0 %v3226_v56 }
 0x8c7   : > { %v9533_v15 = vpop.eup %7505  ;;  %v2979_v18 = vmul.f32 1.442695, %v2970_v63 }
 0x8c8   : > { %v9535_v51 = vpop.eup %7507  ;;  %v2977_v41 = vmul.f32 1.442695, %v2969_v39  ;;  %v2956_v45 = vpop.xlane.xlu1 %2955  ;;  %v3235_v25 = vsel %vm906_vm12, %v9533_v15, 0.0 }
 0x8c9   : > { %7517 = vpow2.f32 %v2979_v18  ;;  %v2972_v48 = vsub.f32 %v9399_v23, %v2956_v45  ;;  %v2953_v32 = vpop.xlane.xlu0 %2952  ;;  %3236 = vadd.xlane.f32.xlu1 %v3235_v25  ;;  %v3232_v0 = vsel %vm906_vm12, %v9535_v51, 0.0 }
 0x8ca   : > { %7519 = vpow2.f32 %v2977_v41  ;;  %v2971_v28 = vsub.f32 %v9403_v30, %v2953_v32  ;;  %3233 = vadd.xlane.f32.xlu0 %v3232_v0 }
 0x8cb   : > { %v9543_v1 = vpop.eup %7509  ;;  %v2983_v7 = vmul.f32 1.442695, %v2972_v48 }
 0x8cc   : > { %v9545_v44 = vpop.eup %7511  ;;  %v2981_v3 = vmul.f32 1.442695, %v2971_v28  ;;  %v2962_v4 = vpop.xlane.xlu1 %2961  ;;  %v3241_v62 = vsel %vm906_vm12, %v9543_v1, 0.0 }
 0x8cd   : > { %7521 = vpow2.f32 %v2983_v7  ;;  %v2974_v23 = vsub.f32 %v9411_v31, %v2962_v4  ;;  %v2959_v9 = vpop.xlane.xlu0 %2958  ;;  %3242 = vadd.xlane.f32.xlu1 %v3241_v62  ;;  %v3238_v13 = vsel %vm906_vm12, %v9545_v44, 0.0 }
 0x8ce   : > { %7523 = vpow2.f32 %v2981_v3  ;;  %v2973_v30 = vsub.f32 %v9415_v53, %v2959_v9  ;;  %3239 = vadd.xlane.f32.xlu0 %v3238_v13 }
 0x8cf   : > { %v9553_v38 = vpop.eup %7513  ;;  %v2987_v16 = vmul.f32 1.442695, %v2974_v23 }
 0x8d0   : > { %v9555_v49 = vpop.eup %7515  ;;  %v2985_v63 = vmul.f32 1.442695, %v2973_v30  ;;  %v2968_v10 = vpop.xlane.xlu1 %2967  ;;  %v3247_v56 = vsel %vm906_vm12, %v9553_v38, 0.0 }
 0x8d1   : > { %7525 = vpow2.f32 %v2987_v16  ;;  %v2976_v31 = vsub.f32 %v9423_v33, %v2968_v10  ;;  %3248 = vadd.xlane.f32.xlu1 %v3247_v56  ;;  %v2965_v39 = vpop.xlane.xlu0 %2964  ;;  %v3244_v18 = vsel %vm906_vm12, %v9555_v49, 0.0 }
 0x8d2   : > { %7527 = vpow2.f32 %v2985_v63  ;;  %v2975_v53 = vsub.f32 %v9427_v21, %v2965_v39  ;;  %3245 = vadd.xlane.f32.xlu0 %v3244_v18 }
 0x8d3   : > { %v9563_v41 = vpop.eup %7517  ;;  %v2991_v45 = vmul.f32 1.442695, %v2976_v31 }
 0x8d4   : > { %v9565_v25 = vpop.eup %7519  ;;  %v2989_v48 = vmul.f32 1.442695, %v2975_v53  ;;  %v2996_v32 = vsel %vm906_vm12, %v9563_v41, 0.0 }
 0x8d5   : > { %7529 = vpow2.f32 %v2991_v45  ;;  %v3674_v33 = vpop.xlane.xlu1 %3673  ;;  %2997 = vadd.xlane.f32.xlu1 %v2996_v32  ;;  %v2993_v0 = vsel %vm906_vm12, %v9565_v25, 0.0 }
 0x8d6   : > { %7531 = vpow2.f32 %v2989_v48  ;;  %v3694_v28 = vsub.f32 %v9451_v14, %v3674_v33  ;;  %v3671_v21 = vpop.xlane.xlu0 %3670  ;;  %2994 = vadd.xlane.f32.xlu0 %v2993_v0 }
 0x8d7   : > { %v9572_v7 = vpop.eup %7521  ;;  %v3693_v3 = vsub.f32 %v9453_v27, %v3671_v21 }
 0x8d8   : > { %v9575_v4 = vpop.eup %7523  ;;  %v3703_v62 = vmul.f32 1.442695, %v3694_v28  ;;  %v3002_v23 = vsel %vm906_vm12, %v9572_v7, 0.0 }
 0x8d9   : > { %v3701_v9 = vmul.f32 1.442695, %v3693_v3  ;;  %v3680_v13 = vpop.xlane.xlu1 %3679  ;;  %3003 = vadd.xlane.f32.xlu1 %v3002_v23  ;;  %v2999_v30 = vsel %vm906_vm12, %v9575_v4, 0.0 }
 0x8da   : > { %7533 = vpow2.f32 %v3703_v62  ;;  %v3696_v14 = vsub.f32 %v9459_v12, %v3680_v13  ;;  %v3677_v16 = vpop.xlane.xlu0 %3676  ;;  %3000 = vadd.xlane.f32.xlu0 %v2999_v30 }
 0x8db   : > { %v9582_v63 = vpop.eup %7525  ;;  %7535 = vpow2.f32 %v3701_v9  ;;  %v3695_v27 = vsub.f32 %v9461_v17, %v3677_v16 }
 0x8dc   : > { %v9585_v10 = vpop.eup %7527  ;;  %v3707_v56 = vmul.f32 1.442695, %v3696_v14  ;;  %v3008_v31 = vsel %vm906_vm12, %v9582_v63, 0.0 }
 0x8dd   : > { %v3705_v39 = vmul.f32 1.442695, %v3695_v27  ;;  %v3686_v18 = vpop.xlane.xlu1 %3685  ;;  %3009 = vadd.xlane.f32.xlu1 %v3008_v31  ;;  %v3005_v53 = vsel %vm906_vm12, %v9585_v10, 0.0 }
 0x8de   : > { %7537 = vpow2.f32 %v3707_v56  ;;  %v3698_v12 = vsub.f32 %v9467_v58, %v3686_v18  ;;  %v3683_v45 = vpop.xlane.xlu0 %3682  ;;  %3006 = vadd.xlane.f32.xlu0 %v3005_v53 }
 0x8df   : > { %v9592_v48 = vpop.eup %7529  ;;  %7539 = vpow2.f32 %v3705_v39  ;;  %v3697_v17 = vsub.f32 %v9469_v34, %v3683_v45 }
 0x8e0   : > { %v9595_v32 = vpop.eup %7531  ;;  %v3711_v33 = vmul.f32 1.442695, %v3698_v12  ;;  %v3014_v0 = vsel %vm906_vm12, %v9592_v48, 0.0 }
 0x8e1   : > { %v3709_v28 = vmul.f32 1.442695, %v3697_v17  ;;  %v3692_v21 = vpop.xlane.xlu1 %3691  ;;  %3015 = vadd.xlane.f32.xlu1 %v3014_v0  ;;  %v3011_v3 = vsel %vm906_vm12, %v9595_v32, 0.0 }
 0x8e2   : > { %7541 = vpow2.f32 %v3711_v33  ;;  %v3700_v58 = vsub.f32 %v9475_v59, %v3692_v21  ;;  %v3689_v62 = vpop.xlane.xlu0 %3688  ;;  %3012 = vadd.xlane.f32.xlu0 %v3011_v3 }
 0x8e3   : > { %7543 = vpow2.f32 %v3709_v28  ;;  %v3699_v34 = vsub.f32 %v9477_v11, %v3689_v62 }
 0x8e4   : > { %v9603_v23 = vpop.eup %7533  ;;  %v3715_v9 = vmul.f32 1.442695, %v3700_v58 }
 0x8e5   : > { %v9605_v13 = vpop.eup %7535  ;;  %v3713_v30 = vmul.f32 1.442695, %v3699_v34  ;;  %v3720_v14 = vsel %vm906_vm12, %v9603_v23, 0.0 }
 0x8e6   : > { %7545 = vpow2.f32 %v3715_v9  ;;  %3721 = vadd.xlane.f32.xlu1 %v3720_v14  ;;  %v3717_v16 = vsel %vm906_vm12, %v9605_v13, 0.0 }
 0x8e7   : > { %7547 = vpow2.f32 %v3713_v30  ;;  %3718 = vadd.xlane.f32.xlu0 %v3717_v16 }
 0x8e8   : > { %v9611_v59 = vpop.eup %7537 }
 0x8e9   : > { %v9613_v27 = vpop.eup %7539  ;;  %v3726_v11 = vsel %vm906_vm12, %v9611_v59, 0.0 }
 0x8ea   : > { %3727 = vadd.xlane.f32.xlu1 %v3726_v11  ;;  %v3723_v56 = vsel %vm906_vm12, %v9613_v27, 0.0 }
 0x8eb   : > { %3724 = vadd.xlane.f32.xlu0 %v3723_v56 }
 0x8ec   : > { %v9619_v31 = vpop.eup %7541 }
 0x8ed   : > { %v9621_v39 = vpop.eup %7543  ;;  %v3732_v18 = vsel %vm906_vm12, %v9619_v31, 0.0 }
 0x8ee   : > { %3733 = vadd.xlane.f32.xlu1 %v3732_v18  ;;  %v3729_v53 = vsel %vm906_vm12, %v9621_v39, 0.0 }
 0x8ef   : > { %3730 = vadd.xlane.f32.xlu0 %v3729_v53 }
 0x8f0   : > { %v9627_v12 = vpop.eup %7545 }
 0x8f1   : > { %v9629_v45 = vpop.eup %7547  ;;  %v3738_v17 = vsel %vm906_vm12, %v9627_v12, 0.0 }
 0x8f2   : > { %3739 = vadd.xlane.f32.xlu1 %v3738_v17  ;;  %v3735_v33 = vsel %vm906_vm12, %v9629_v45, 0.0 }
 0x8f3   : > { %3736 = vadd.xlane.f32.xlu0 %v3735_v33 }
 0x8f5   : > { %v4044_v0 = vpop.xlane.xlu1 %4043 }
 0x8f6   : > { %v4064_v28 = vsub.f32 %v9483_v60, %v4044_v0  ;;  %v4041_v21 = vpop.xlane.xlu0 %4040 }
 0x8f7   : > { %v4063_v3 = vsub.f32 %v9485_v42, %v4041_v21 }
 0x8f8   : > { %v4073_v58 = vmul.f32 1.442695, %v4064_v28 }
 0x8f9   : > { %v4071_v62 = vmul.f32 1.442695, %v4063_v3  ;;  %v4050_v34 = vpop.xlane.xlu1 %4049 }
 0x8fa   : > { %7549 = vpow2.f32 %v4073_v58  ;;  %v4066_v9 = vsub.f32 %v9491_v26, %v4050_v34  ;;  %v4047_v30 = vpop.xlane.xlu0 %4046 }
 0x8fb   : > { %7551 = vpow2.f32 %v4071_v62  ;;  %v4065_v14 = vsub.f32 %v9493_v52, %v4047_v30 }
 0x8fc   : > { %v4077_v16 = vmul.f32 1.442695, %v4066_v9 }
 0x8fd   : > { %v4075_v11 = vmul.f32 1.442695, %v4065_v14  ;;  %v4056_v56 = vpop.xlane.xlu1 %4055 }
 0x8fe   : > { %7553 = vpow2.f32 %v4077_v16  ;;  %v4068_v18 = vsub.f32 %v9499_v46, %v4056_v56  ;;  %v4053_v60 = vpop.xlane.xlu0 %4052 }
 0x8ff   : > { %7555 = vpow2.f32 %v4075_v11  ;;  %v4067_v42 = vsub.f32 %v9501_v22, %v4053_v60 }
 0x900   : > { %v4081_v53 = vmul.f32 1.442695, %v4068_v18  ;;  %v7725_v18 = vld [vmem:[%s7790_s20 + $0x8] sm:$0xff] }
 0x901   : > { %v4079_v17 = vmul.f32 1.442695, %v4067_v42  ;;  %v4062_v33 = vpop.xlane.xlu1 %4061  ;;  %v9673_v60 = vadd.f32 %v7725_v18, %v9109_v61 }
 0x902   : > { %7557 = vpow2.f32 %v4081_v53  ;;  %v4070_v26 = vsub.f32 %v9507_v6, %v4062_v33  ;;  %v4059_v0 = vpop.xlane.xlu0 %4058  ;;  %v7726_v53 = vld [vmem:[%s7790_s20] sm:$0xff] }
 0x903   : > { %7559 = vpow2.f32 %v4079_v17  ;;  %v4069_v52 = vsub.f32 %v9509_v5, %v4059_v0  ;;  %v9679_v17 = vadd.f32 %v7726_v53, %v9107_v54  ;;  %v4418_v61 = vsel %vm242_vm0, %v9673_v60, 0.0 }
 0x904   : > { %v9643_v28 = vpop.eup %7549  ;;  %v4085_v21 = vmul.f32 1.442695, %v4070_v26  ;;  %v7727_v26 = vld [vmem:[%s7790_s20 + $0x18] sm:$0xff] }
 0x905   : > { %v9645_v3 = vpop.eup %7551  ;;  %v4083_v46 = vmul.f32 1.442695, %v4069_v52  ;;  %v4090_v58 = vsel %vm906_vm12, %v9643_v28, 0.0  ;;  %v9685_v0 = vadd.f32 %v7727_v26, %v9117_v24  ;;  %v7728_v52 = vld [vmem:[%s7790_s20 + $0x10] sm:$0xff]  ;;  %v4415_v54 = vsel %vm242_vm0, %v9679_v17, 0.0 }
 0x906   : > { %7561 = vpow2.f32 %v4085_v21  ;;  %4091 = vadd.xlane.f32.xlu1 %v4090_v58  ;;  %v4087_v22 = vsel %vm906_vm12, %v9645_v3, 0.0  ;;  %v9691_v21 = vadd.f32 %v7728_v52, %v9115_v2 }
 0x907   : > { %7563 = vpow2.f32 %v4083_v46  ;;  %4088 = vadd.xlane.f32.xlu0 %v4087_v22  ;;  %v7729_v46 = vld [vmem:[%s7790_s20 + $0x28] sm:$0xff]  ;;  %v4424_v24 = vsel %vm242_vm0, %v9685_v0, 0.0  ;;  %v7730_v22 = vld [vmem:[%s7790_s20 + $0x20] sm:$0xff] }
 0x908   : > { %v9651_v6 = vpop.eup %7553  ;;  %v9697_v58 = vadd.f32 %v7729_v46, %v9125_v8  ;;  %v4421_v2 = vsel %vm242_vm0, %v9691_v21, 0.0 }
 0x909   : > { %v9653_v5 = vpop.eup %7555  ;;  %v4096_v62 = vsel %vm906_vm12, %v9651_v6, 0.0 }
 0x90a   : > { %4097 = vadd.xlane.f32.xlu1 %v4096_v62  ;;  %v4093_v34 = vsel %vm906_vm12, %v9653_v5, 0.0  ;;  %v9703_v62 = vadd.f32 %v7730_v22, %v9123_v29  ;;  %v4430_v8 = vsel %vm242_vm0, %v9697_v58, 0.0 }
 0x90b   : > { %4094 = vadd.xlane.f32.xlu0 %v4093_v34  ;;  %v7731_v34 = vld [vmem:[%s7790_s20 + $0x38] sm:$0xff] }
 0x90c   : > { %v9659_v9 = vpop.eup %7557  ;;  %v4427_v29 = vsel %vm242_vm0, %v9703_v62, 0.0 }
 0x90d   : > { %v9661_v30 = vpop.eup %7559  ;;  %v4102_v14 = vsel %vm906_vm12, %v9659_v9, 0.0 }
 0x90e   : > { %4103 = vadd.xlane.f32.xlu1 %v4102_v14  ;;  %v4099_v16 = vsel %vm906_vm12, %v9661_v30, 0.0  ;;  %v9709_v14 = vadd.f32 %v7731_v34, %v9133_v55 }
 0x90f   : > { %4100 = vadd.xlane.f32.xlu0 %v4099_v16  ;;  %v7732_v16 = vld [vmem:[%s7790_s20 + $0x30] sm:$0xff] }
 0x910   : > { %v9667_v11 = vpop.eup %7561  ;;  %v9715_v18 = vadd.f32 %v7732_v16, %v9131_v37 }
 0x911   : > { %v9669_v56 = vpop.eup %7563  ;;  %v4108_v42 = vsel %vm906_vm12, %v9667_v11, 0.0 }
 0x912   : > { %4109 = vadd.xlane.f32.xlu1 %v4108_v42  ;;  %v4105_v33 = vsel %vm906_vm12, %v9669_v56, 0.0  ;;  %v4436_v42 = vsel %vm242_vm0, %v9709_v14, 0.0  ;;  %v4433_v55 = vsel %vm242_vm0, %v9715_v18, 0.0 }
 0x913   : > { %4106 = vadd.xlane.f32.xlu0 %v4105_v33 }
 0x916   : > { %4419 = vadd.xlane.f32.xlu1 %v4418_v61 }
 0x917   : > { %4416 = vadd.xlane.f32.xlu0 %v4415_v54 }
 0x91a   : > { %4425 = vadd.xlane.f32.xlu1 %v4424_v24 }
 0x91b   : > { %4422 = vadd.xlane.f32.xlu0 %v4421_v2 }
 0x91e   : > { %4431 = vadd.xlane.f32.xlu1 %v4430_v8 }
 0x91f   : > { %4428 = vadd.xlane.f32.xlu0 %v4427_v29 }
 0x922   : > { %4437 = vadd.xlane.f32.xlu1 %v4436_v42 }
 0x923   : > { %4434 = vadd.xlane.f32.xlu0 %v4433_v55 }
 0x952   : > { %v3231_v53 = vpop.xlane.xlu1 %3230 }
 0x953   : > { %7565 = vrcp.f32 %v3231_v53  ;;  %v3228_v33 = vpop.xlane.xlu0 %3227 }
 0x954   : > { %7567 = vrcp.f32 %v3228_v33 }
 0x956   : > { %v3237_v26 = vpop.xlane.xlu1 %3236 }
 0x957   : > { %7569 = vrcp.f32 %v3237_v26  ;;  %v3234_v37 = vpop.xlane.xlu0 %3233 }
 0x958   : > { %7571 = vrcp.f32 %v3234_v37 }
 0x95a   : > { %v3243_v61 = vpop.xlane.xlu1 %3242 }
 0x95b   : > { %7573 = vrcp.f32 %v3243_v61  ;;  %v3240_v52 = vpop.xlane.xlu0 %3239 }
 0x95c   : > { %7575 = vrcp.f32 %v3240_v52 }
 0x95d   : > { %v7566_v54 = vpop.eup %7565 }
 0x95e   : > { %v7568_v46 = vpop.eup %7567  ;;  %v3249_v24 = vpop.xlane.xlu1 %3248  ;;  %v3259_v34 = vmul.f32 %v7566_v54, %v9523_v43 }
 0x95f   : > { %7577 = vrcp.f32 %v3249_v24  ;;  %v3246_v22 = vpop.xlane.xlu0 %3245  ;;  %v3258_v2 = vmul.f32 %v7568_v46, %v9525_v35 }
 0x960   : > { %7579 = vrcp.f32 %v3246_v22 }
 0x961   : > { %v7570_v8 = vpop.eup %7569  ;;  %6529 = vmatprep.mubr.msk.f32.mxu1 %vm906_vm12, %v3258_v2 }
 0x962   : > { %v7572_v16 = vpop.eup %7571  ;;  %v2998_v29 = vpop.xlane.xlu1 %2997  ;;  %6530 = vmatmul.mubr.msk.f32.vlgmr.msra.gmra.mrb[48].mxu1 %vm906_vm12, %v3259_v34  ;;  %v3261_v43 = vmul.f32 %v7570_v8, %v9533_v15 }
 0x963   : > { %7581 = vrcp.f32 %v2998_v29  ;;  %7098 = vmatpush3.bf16.msk.msra.mxu1 %vm8515_vm7, %v9152_v19  ;;  %v2995_v42 = vpop.xlane.xlu0 %2994  ;;  %v3260_v55 = vmul.f32 %v7572_v16, %v9535_v51 }
 0x964   : > { %7101 = vmatprep.subr.msk.bf16.mxu1 %vm8515_vm7, %v9176_v47  ;;  %7583 = vrcp.f32 %v2995_v42 }
 0x965   : > { %v7574_v35 = vpop.eup %7573  ;;  %6532 = vmatprep.mubr.msk.f32.mxu1 %vm906_vm12, %v3260_v55 }
 0x966   : > { %v7576_v53 = vpop.eup %7575  ;;  %v3004_v33 = vpop.xlane.xlu1 %3003  ;;  %6533 = vmatmul.mubr.msk.f32.gmra.mrb[50].mxu1 %vm906_vm12, %v3261_v43  ;;  %v3263_v15 = vmul.f32 %v7574_v35, %v9543_v1 }
 0x967   : > { %7585 = vrcp.f32 %v3004_v33  ;;  %7104 = vmatpush3.bf16.msk.msra.mxu1 %vm8515_vm7, %v9176_v47  ;;  %v3001_v51 = vpop.xlane.xlu0 %3000  ;;  %v3262_v26 = vmul.f32 %v7576_v53, %v9545_v44 }
 0x968   : > { %7107 = vmatprep.subr.msk.bf16.mxu1 %vm8515_vm7, %v9206_v57  ;;  %7587 = vrcp.f32 %v3001_v51 }
 0x969   : > { %v7578_v37 = vpop.eup %7577  ;;  %6535 = vmatprep.mubr.msk.f32.mxu1 %vm906_vm12, %v3262_v26 }
 0x96a   : > { %v7580_v61 = vpop.eup %7579  ;;  %v3010_v52 = vpop.xlane.xlu1 %3009  ;;  %6536 = vmatmul.mubr.msk.f32.gmra.mrb[52].mxu1 %vm906_vm12, %v3263_v15  ;;  %v3265_v1 = vmul.f32 %v7578_v37, %v9553_v38 }
 0x96b   : > { %7589 = vrcp.f32 %v3010_v52  ;;  %7110 = vmatpush3.bf16.msk.msra.mxu1 %vm8515_vm7, %v9206_v57  ;;  %v3007_v44 = vpop.xlane.xlu0 %3006  ;;  %v3264_v54 = vmul.f32 %v7580_v61, %v9555_v49 }
 0x96c   : > { %7113 = vmatprep.subr.msk.bf16.mxu1 %vm8515_vm7, %v9226_v36  ;;  %7591 = vrcp.f32 %v3007_v44 }
 0x96d   : > { %v7582_v46 = vpop.eup %7581  ;;  %6538 = vmatprep.mubr.msk.f32.mxu1 %vm906_vm12, %v3264_v54 }
 0x96e   : > { %v7584_v24 = vpop.eup %7583  ;;  %v3016_v22 = vpop.xlane.xlu1 %3015  ;;  %6539 = vmatmul.mubr.msk.f32.gmra.mrb[54].mxu1 %vm906_vm12, %v3265_v1  ;;  %v3026_v34 = vmul.f32 %v7582_v46, %v9563_v41  ;;  %v5531_v46 = vld [vmem:[%s10320_s2 + $0x48] sm:$0xff] }
 0x96f   : > { %7593 = vrcp.f32 %v3016_v22  ;;  %7116 = vmatpush3.bf16.msk.msra.mxu1 %vm8515_vm7, %v9226_v36  ;;  %v3013_v49 = vpop.xlane.xlu0 %3012  ;;  %v3025_v2 = vmul.f32 %v7584_v24, %v9565_v25 }
 0x970   : > { %7143 = vmatprep.subr.msk.bf16.mxu1 %vm8950_vm15, %v9152_v19  ;;  %7595 = vrcp.f32 %v3013_v49 }
 0x971   : > { %v7586_v38 = vpop.eup %7585  ;;  %6557 = vmatprep.mubr.msk.f32.mxu1 %vm906_vm12, %v3025_v2 }
 0x972   : > { %v7588_v8 = vpop.eup %7587  ;;  %6558 = vmatmul.mubr.msk.f32.vlgmr.msra.gmra.mrb[48].mxu1 %vm906_vm12, %v3026_v34  ;;  %v3028_v25 = vmul.f32 %v7586_v38, %v9572_v7  ;;  %v5532_v38 = vld [vmem:[%s10320_s2 + $0x50] sm:$0xff] }
 0x973   : > { %v3722_v16 = vpop.xlane.xlu1 %3721  ;;  %7146 = vmatpush3.bf16.msk.msra.mxu1 %vm8950_vm15, %v9152_v19  ;;  %v3027_v40 = vmul.f32 %v7588_v8, %v9575_v4 }
 0x974   : > { %7597 = vrcp.f32 %v3722_v16  ;;  %7149 = vmatprep.subr.msk.bf16.mxu1 %vm8950_vm15, %v9176_v47  ;;  %v3719_v41 = vpop.xlane.xlu0 %3718 }
 0x975   : > { %v7590_v29 = vpop.eup %7589  ;;  %7599 = vrcp.f32 %v3719_v41  ;;  %6560 = vmatprep.mubr.msk.f32.mxu1 %vm906_vm12, %v3027_v40 }
 0x976   : > { %v7592_v42 = vpop.eup %7591  ;;  %6561 = vmatmul.mubr.msk.f32.gmra.mrb[50].mxu1 %vm906_vm12, %v3028_v25  ;;  %v3030_v43 = vmul.f32 %v7590_v29, %v9582_v63  ;;  %v7217_v25 = vpack.c.bf16 %v5533_v20, %v5532_v38 }
 0x977   : > { %v3728_v55 = vpop.xlane.xlu1 %3727  ;;  %7152 = vmatpush3.bf16.msk.msra.mxu1 %vm8950_vm15, %v9176_v47  ;;  %v3029_v4 = vmul.f32 %v7592_v42, %v9585_v10  ;;  %v5534_v42 = vld [vmem:[%s10320_s2 + $0x60] sm:$0xff] }
 0x978   : > { %7601 = vrcp.f32 %v3728_v55  ;;  %7155 = vmatprep.subr.msk.bf16.mxu1 %vm8950_vm15, %v9206_v57  ;;  %v3725_v7 = vpop.xlane.xlu0 %3724  ;;  %v5535_v55 = vld [vmem:[%s10320_s2 + $0x68] sm:$0xff] }
 0x979   : > { %v7594_v35 = vpop.eup %7593  ;;  %7603 = vrcp.f32 %v3725_v7  ;;  %6563 = vmatprep.mubr.msk.f32.mxu1 %vm906_vm12, %v3029_v4  ;;  %v7221_v7 = vpack.c.bf16 %v5535_v55, %v5534_v42  ;;  %v7737_v42 = vld [vmem:[%s7790_s20 + $0x68] sm:$0xff] }
 0x97a   : > { %v7596_v53 = vpop.eup %7595  ;;  %6564 = vmatmul.mubr.msk.f32.gmra.mrb[52].mxu1 %vm906_vm12, %v3030_v43  ;;  %v3032_v51 = vmul.f32 %v7594_v35, %v9592_v48  ;;  %v5536_v35 = vld [vmem:[%s10320_s2 + $0x70] sm:$0xff] }
 0x97b   : > { %v3734_v33 = vpop.xlane.xlu1 %3733  ;;  %7158 = vmatpush3.bf16.msk.msra.mxu1 %vm8950_vm15, %v9206_v57  ;;  %v3031_v10 = vmul.f32 %v7596_v53, %v9595_v32  ;;  %v5537_v53 = vld [vmem:[%s10320_s2 + $0x78] sm:$0xff] }
 0x97c   : > { %7605 = vrcp.f32 %v3734_v33  ;;  %7161 = vmatprep.subr.msk.bf16.mxu1 %vm8950_vm15, %v9226_v36  ;;  %v3731_v63 = vpop.xlane.xlu0 %3730 }
 0x97d   : > { %7607 = vrcp.f32 %v3731_v63  ;;  %6566 = vmatprep.mubr.msk.f32.mxu1 %vm906_vm12, %v3031_v10  ;;  %v7225_v10 = vpack.c.bf16 %v5537_v53, %v5536_v35 }
 0x97e   : > { %v7598_v26 = vpop.eup %7597  ;;  %6567 = vmatmul.mubr.msk.f32.gmra.mrb[54].mxu1 %vm906_vm12, %v3032_v51 }
 0x97f   : > { %v7600_v15 = vpop.eup %7599  ;;  %v3740_v37 = vpop.xlane.xlu1 %3739  ;;  %7164 = vmatpush3.bf16.msk.msra.mxu1 %vm8950_vm15, %v9226_v36  ;;  %v3750_v61 = vmul.f32 %v7598_v26, %v9603_v23 }
 0x980   : > { %7609 = vrcp.f32 %v3740_v37  ;;  %7191 = vmatprep.subr.msk.bf16.mxu1 %vm8996_vm8, %v9152_v19  ;;  %v3737_v32 = vpop.xlane.xlu0 %3736  ;;  %v3749_v48 = vmul.f32 %v7600_v15, %v9605_v13 }
 0x981   : > { %7611 = vrcp.f32 %v3737_v32 }
 0x982   : > { %v7602_v52 = vpop.eup %7601  ;;  %6613 = vmatprep.mubr.msk.f32.mxu1 %vm906_vm12, %v3749_v48 }
 0x983   : > { %v7604_v44 = vpop.eup %7603  ;;  %6614 = vmatmul.mubr.msk.f32.vlgmr.msra.gmra.mrb[48].mxu1 %vm906_vm12, %v3750_v61  ;;  %v3752_v13 = vmul.f32 %v7602_v52, %v9611_v59  ;;  %v5530_v59 = vld [vmem:[%s10320_s2 + $0x40] sm:$0xff]  ;;  %v5684_v52 = vld [vmem:[%s10321_s3 + $0xa] ss:$0 sm:$0xff] }
 0x984   : > { %7194 = vmatpush3.bf16.msk.msra.mxu1 %vm8996_vm8, %v9152_v19  ;;  %v3751_v50 = vmul.f32 %v7604_v44, %v9613_v27  ;;  %v7213_v24 = vpack.c.bf16 %v5531_v46, %v5530_v59  ;;  %v7734_v59 = vld [vmem:[%s7790_s20 + $0x40] sm:$0xff] }
 0x985   : > { %7197 = vmatprep.subr.msk.bf16.mxu1 %vm8996_vm8, %v9176_v47 }
 0x986   : > { %v7606_v23 = vpop.eup %7605  ;;  %6616 = vmatprep.mubr.msk.f32.mxu1 %vm906_vm12, %v3751_v50 }
 0x987   : > { %v7608_v54 = vpop.eup %7607  ;;  %6617 = vmatmul.mubr.msk.f32.gmra.mrb[50].mxu1 %vm906_vm12, %v3752_v13  ;;  %v3754_v27 = vmul.f32 %v7606_v23, %v9619_v31 }
 0x988   : > { %7200 = vmatpush3.bf16.msk.msra.mxu1 %vm8996_vm8, %v9176_v47  ;;  %v3753_v19 = vmul.f32 %v7608_v54, %v9621_v39 }
 0x989   : > { %7203 = vmatprep.subr.msk.bf16.mxu1 %vm8996_vm8, %v9206_v57 }
 0x98a   : > { %v7610_v1 = vpop.eup %7609  ;;  %6619 = vmatprep.mubr.msk.f32.mxu1 %vm906_vm12, %v3753_v19 }
 0x98b   : > { %v7612_v47 = vpop.eup %7611  ;;  %6620 = vmatmul.mubr.msk.f32.gmra.mrb[52].mxu1 %vm906_vm12, %v3754_v27  ;;  %v3756_v39 = vmul.f32 %v7610_v1, %v9627_v12  ;;  %v7733_v27 = vld [vmem:[%s7790_s20 + $0x48] sm:$0xff] }
 0x98c   : > { %7206 = vmatpush3.bf16.msk.msra.mxu1 %vm8996_vm8, %v9206_v57  ;;  %v3755_v31 = vmul.f32 %v7612_v47, %v9629_v45 }
 0x98d   : > { %7209 = vmatprep.subr.msk.bf16.mxu1 %vm8996_vm8, %v9226_v36 }
 0x98e   : > { %6622 = vmatprep.mubr.msk.f32.mxu1 %vm906_vm12, %v3755_v31 }
 0x98f   : > { %6623 = vmatmul.mubr.msk.f32.gmra.mrb[54].mxu1 %vm906_vm12, %v3756_v39 }
 0x990   : > { %7212 = vmatpush3.bf16.msk.msra.mxu1 %vm8996_vm8, %v9226_v36 }
 0x991   : > { %7214 = vmatprep.subr.bf16.mxu1 %v7213_v24 }
 0x993   : > { %v4092_v22 = vpop.xlane.xlu1 %4091 }
 0x994   : > { %7613 = vrcp.f32 %v4092_v22  ;;  %v4089_v57 = vpop.xlane.xlu0 %4088 }
 0x995   : > { %7615 = vrcp.f32 %v4089_v57 }
 0x997   : > { %v4098_v45 = vpop.xlane.xlu1 %4097 }
 0x998   : > { %7617 = vrcp.f32 %v4098_v45  ;;  %v4095_v49 = vpop.xlane.xlu0 %4094 }
 0x999   : > { %7619 = vrcp.f32 %v4095_v49 }
 0x99b   : > { %v4104_v2 = vpop.xlane.xlu1 %4103 }
 0x99c   : > { %7621 = vrcp.f32 %v4104_v2  ;;  %v4101_v12 = vpop.xlane.xlu0 %4100  ;;  %v7735_v2 = vld [vmem:[%s7790_s20 + $0x58] sm:$0xff] }
 0x99d   : > { %7623 = vrcp.f32 %v4101_v12 }
 0x99e   : > { %v7614_v34 = vpop.eup %7613 }
 0x99f   : > { %v7616_v36 = vpop.eup %7615  ;;  %v4110_v8 = vpop.xlane.xlu1 %4109  ;;  %v4120_v41 = vmul.f32 %v7614_v34, %v9643_v28  ;;  %v7736_v34 = vld [vmem:[%s7790_s20 + $0x50] sm:$0xff] }
 0x9a0   : > { %7625 = vrcp.f32 %v4110_v8  ;;  %v4107_v16 = vpop.xlane.xlu0 %4106  ;;  %v4119_v40 = vmul.f32 %v7616_v36, %v9645_v3 }
 0x9a1   : > { %7627 = vrcp.f32 %v4107_v16 }
 0x9a2   : > { %v7618_v29 = vpop.eup %7617  ;;  %6669 = vmatprep.mubr.msk.f32.mxu1 %vm906_vm12, %v4119_v40 }
 0x9a3   : > { %v7620_v4 = vpop.eup %7619  ;;  %6670 = vmatmul.mubr.msk.f32.vlgmr.msra.gmra.mrb[48].mxu1 %vm906_vm12, %v4120_v41  ;;  %v4122_v28 = vmul.f32 %v7618_v29, %v9651_v6  ;;  %v4420_v44 = vpop.xlane.xlu1 %4419 }
 0x9a4   : > { %v4121_v3 = vmul.f32 %v7620_v4, %v9653_v5  ;;  %7216 = vmatpush3.bf16.msra.mxu1 %v7213_v24  ;;  %v4417_v13 = vpop.xlane.xlu0 %4416  ;;  %v4464_v36 = vmul.f32 0.03125, %v4420_v44 }
 0x9a5   : > { %7218 = vmatprep.subr.bf16.mxu1 %v7217_v25  ;;  %v4463_v41 = vmul.f32 0.03125, %v4417_v13 }
 0x9a6   : > { %v7622_v43 = vpop.eup %7621  ;;  %6672 = vmatprep.mubr.msk.f32.mxu1 %vm906_vm12, %v4121_v3  ;;  %v7738_v3 = vld [vmem:[%s7790_s20 + $0x60] sm:$0xff] }
 0x9a7   : > { %v7624_v33 = vpop.eup %7623  ;;  %6673 = vmatmul.mubr.msk.f32.gmra.mrb[50].mxu1 %vm906_vm12, %v4122_v28  ;;  %v4124_v6 = vmul.f32 %v7622_v43, %v9659_v9  ;;  %v4426_v22 = vpop.xlane.xlu1 %4425  ;;  %v9918_v43 = vsub.f32 %v9673_v60, %v4464_v36  ;;  %v7740_v60 = vld [vmem:[%s7790_s20 + $0x70] sm:$0xff] }
 0x9a8   : > { %v4123_v5 = vmul.f32 %v7624_v33, %v9661_v30  ;;  %7220 = vmatpush3.bf16.msra.mxu1 %v7217_v25  ;;  %v4423_v49 = vpop.xlane.xlu0 %4422  ;;  %v4466_v35 = vmul.f32 0.03125, %v4426_v22 }
 0x9a9   : > { %7222 = vmatprep.subr.bf16.mxu1 %v7221_v7 }
 0x9aa   : > { %v7626_v63 = vpop.eup %7625  ;;  %6675 = vmatprep.mubr.msk.f32.mxu1 %vm906_vm12, %v4123_v5 }
 0x9ab   : > { %v7628_v51 = vpop.eup %7627  ;;  %6676 = vmatmul.mubr.msk.f32.gmra.mrb[52].mxu1 %vm906_vm12, %v4124_v6  ;;  %v4126_v15 = vmul.f32 %v7626_v63, %v9667_v11  ;;  %v4432_v4 = vpop.xlane.xlu1 %4431  ;;  %v4465_v63 = vmul.f32 0.03125, %v4423_v49 }
 0x9ac   : > { %v4125_v26 = vmul.f32 %v7628_v51, %v9669_v56  ;;  %7224 = vmatpush3.bf16.msra.mxu1 %v7221_v7  ;;  %v4429_v53 = vpop.xlane.xlu0 %4428 }
 0x9ad   : > { %7226 = vmatprep.subr.bf16.mxu1 %v7225_v10 }
 0x9ae   : > { %6678 = vmatprep.mubr.msk.f32.mxu1 %vm906_vm12, %v4125_v26 }
 0x9af   : > { %6679 = vmatmul.mubr.msk.f32.gmra.mrb[54].mxu1 %vm906_vm12, %v4126_v15  ;;  %v7739_v15 = vld [vmem:[%s7790_s20 + $0x78] sm:$0xff] }
 0x9b0   : > { %7228 = vmatpush3.bf16.msra.mxu1 %v7225_v10  ;;  %v9923_v10 = vsub.f32 %v9679_v17, %v4463_v41  ;;  %v4435_v44 = vpop.xlane.xlu0 %4434 }
 0xa76   : > { %v6671_v9 = vpop.f32.mrb[48].mxu1 }
 0xa77   : > { %v4217_v30 = vpop.f32.mrb[49].mxu1 }
 0xa78   : > { %6697 = vmatprep.mubr.msk.f32.mxu1 %vm906_vm12, %v4217_v30 }
 0xa79   : > { %6698 = vmatmul.mubr.msk.f32.vlgmr.msra.gmra.mrb[56].mxu1 %vm906_vm12, %v6671_v9 }
 0xa7a   : > { %v6674_v37 = vpop.f32.mrb[50].mxu1 }
 0xa7b   : > { %v4227_v32 = vpop.f32.mrb[51].mxu1 }
 0xa7c   : > { %6700 = vmatprep.mubr.msk.f32.mxu1 %vm906_vm12, %v4227_v32  ;;  %v4468_v32 = vmul.f32 0.03125, %v4432_v4 }
 0xa7d   : > { %6701 = vmatmul.mubr.msk.f32.gmra.mrb[58].mxu1 %vm906_vm12, %v6674_v37  ;;  %v9934_v37 = vsub.f32 %v9685_v0, %v4466_v35  ;;  %v4495_v0 = vmul.f32 %v9923_v10, %v9923_v10 }
 0xa7e   : > { %v6677_v11 = vpop.f32.mrb[52].mxu1 }
 0xa7f   : > { %v4237_v56 = vpop.f32.mrb[53].mxu1 }
 0xa80   : > { %6703 = vmatprep.mubr.msk.f32.mxu1 %vm906_vm12, %v4237_v56  ;;  %v9941_v56 = vsub.f32 %v9691_v21, %v4465_v63  ;;  %v4498_v21 = vmul.f32 %v9934_v37, %v9934_v37 }
 0xa81   : > { %6704 = vmatmul.mubr.msk.f32.gmra.mrb[60].mxu1 %vm906_vm12, %v6677_v11  ;;  %v4496_v11 = vmul.f32 %v9918_v43, %v9918_v43 }
 0xa82   : > { %v6680_v48 = vpop.f32.mrb[54].mxu1 }
 0xa83   : > { %v4247_v61 = vpop.f32.mrb[55].mxu1 }
 0xa84   : > { %6706 = vmatprep.mubr.msk.f32.mxu1 %vm906_vm12, %v4247_v61  ;;  %v4438_v61 = vpop.xlane.xlu1 %4437 }
 0xa85   : > { %6707 = vmatmul.mubr.msk.f32.gmra.mrb[62].mxu1 %vm906_vm12, %v6680_v48  ;;  %v4467_v48 = vmul.f32 0.03125, %v4429_v53  ;;  %v4470_v13 = vmul.f32 0.03125, %v4438_v61 }
 0xb4c   : > { %v6699_v50 = vpop.f32.mrb[56].mxu1 }
 0xb4d   : > { %v4364_v23 = vadd.f32 %v6699_v50, %v5684_v52  ;;  %v4358_v54 = vpop.f32.mrb[57].mxu1  ;;  %v9948_v50 = vsub.f32 %v9697_v58, %v4468_v32  ;;  %v9960_v58 = vsub.f32 %v9709_v14, %v4470_v13 }
 0xb4e   : > { %v4359_v19 = vadd.f32 %v5684_v52, %v4358_v54  ;;  %v9954_v54 = vsub.f32 %v9703_v62, %v4467_v48 }
 0xb4f   : > { %v9892_v1 = vadd.f32 %v7733_v27, %v4364_v23  ;;  %v4514_v23 = vsel %vm242_vm0, %v4496_v11, 0.0  ;;  %v4511_v27 = vsel %vm242_vm0, %v4495_v0, 0.0  ;;  %v4502_v14 = vmul.f32 %v9960_v58, %v9960_v58 }
 0xb50   : > { %v9895_v46 = vadd.f32 %v7734_v59, %v4359_v19  ;;  %v6702_v47 = vpop.f32.mrb[58].mxu1  ;;  %v4469_v19 = vmul.f32 0.03125, %v4435_v44  ;;  %v4497_v59 = vmul.f32 %v9941_v56, %v9941_v56 }
 0xb51   : > { %v4374_v31 = vadd.f32 %v6702_v47, %v5684_v52  ;;  %v4368_v39 = vpop.f32.mrb[59].mxu1  ;;  %v4442_v24 = vsel %vm242_vm0, %v9892_v1, 0.0  ;;  %v4520_v47 = vsel %vm242_vm0, %v4498_v21, 0.0 }
 0xb52   : > { %v4369_v57 = vadd.f32 %v5684_v52, %v4368_v39  ;;  %4443 = vadd.xlane.f32.xlu1 %v4442_v24  ;;  %v4439_v45 = vsel %vm242_vm0, %v9895_v46, 0.0  ;;  %v9966_v39 = vsub.f32 %v9715_v18, %v4469_v19  ;;  %v4517_v62 = vsel %vm242_vm0, %v4497_v59, 0.0 }
 0xb53   : > { %v9902_v12 = vadd.f32 %v7735_v2, %v4374_v31  ;;  %4440 = vadd.xlane.f32.xlu0 %v4439_v45  ;;  %v4500_v31 = vmul.f32 %v9948_v50, %v9948_v50  ;;  %v4499_v24 = vmul.f32 %v9954_v54, %v9954_v54  ;;  %v4532_v18 = vsel %vm242_vm0, %v4502_v14, 0.0  ;;  %v5695_v2 = vld [vmem:[%s10319_s1 + $0x80] sm:$0xff] }
 0xb54   : > { %v9905_v38 = vadd.f32 %v7736_v34, %v4369_v57  ;;  %v6705_v20 = vpop.f32.mrb[60].mxu1  ;;  %v4501_v45 = vmul.f32 %v9966_v39, %v9966_v39  ;;  %v5696_v34 = vld [vmem:[%s10319_s1 + $0x88] sm:$0xff] }
 0xb55   : > { %v4384_v8 = vadd.f32 %v6705_v20, %v5684_v52  ;;  %v4378_v16 = vpop.f32.mrb[61].mxu1  ;;  %v4448_v40 = vsel %vm242_vm0, %v9902_v12, 0.0  ;;  %v4526_v22 = vsel %vm242_vm0, %v4500_v31, 0.0  ;;  %v4523_v57 = vsel %vm242_vm0, %v4499_v24, 0.0  ;;  %v5697_v20 = vld [vmem:[%s10319_s1 + $0x90] sm:$0xff] }
 0xb56   : > { %v4379_v25 = vadd.f32 %v5684_v52, %v4378_v16  ;;  %4449 = vadd.xlane.f32.xlu1 %v4448_v40  ;;  %v4445_v29 = vsel %vm242_vm0, %v9905_v38, 0.0  ;;  %v4529_v49 = vsel %vm242_vm0, %v4501_v45, 0.0  ;;  %v7229_v36 = vpack.c.bf16 %v5696_v34, %v5695_v2 }
 0xb57   : > { %v9912_v55 = vadd.f32 %v7737_v42, %v4384_v8  ;;  %4446 = vadd.xlane.f32.xlu0 %v4445_v29  ;;  %v5698_v8 = vld [vmem:[%s10319_s1 + $0x98] sm:$0xff] }
 0xb58   : > { %v9915_v28 = vadd.f32 %v7738_v3, %v4379_v25  ;;  %v6708_v7 = vpop.f32.mrb[62].mxu1  ;;  %v7233_v16 = vpack.c.bf16 %v5698_v8, %v5697_v20  ;;  %7230 = vmatprep.subr.bf16.mxu0 %v7229_v36 }
 0xb59   : > { %v4394_v33 = vadd.f32 %v6708_v7, %v5684_v52  ;;  %v4388_v5 = vpop.f32.mrb[63].mxu1  ;;  %v4454_v6 = vsel %vm242_vm0, %v9912_v55, 0.0  ;;  %7232 = vmatpush3.bf16.msra.mxu0 %v7229_v36 }
 0xb5a   : > { %v4389_v51 = vadd.f32 %v5684_v52, %v4388_v5  ;;  %4455 = vadd.xlane.f32.xlu1 %v4454_v6  ;;  %v4451_v26 = vsel %vm242_vm0, %v9915_v28, 0.0  ;;  %7234 = vmatprep.subr.bf16.mxu0 %v7233_v16 }
 0xb5b   : > { %v9928_v9 = vadd.f32 %v7739_v15, %v4394_v33  ;;  %4452 = vadd.xlane.f32.xlu0 %v4451_v26 }
 0xb5c   : > { %v9931_v30 = vadd.f32 %v7740_v60, %v4389_v51 }
 0xb5d   : > { %v4460_v17 = vsel %vm242_vm0, %v9928_v9, 0.0  ;;  %7236 = vmatpush3.bf16.msra.mxu0 %v7233_v16 }
 0xb5e   : > { %4461 = vadd.xlane.f32.xlu1 %v4460_v17  ;;  %v4457_v52 = vsel %vm242_vm0, %v9931_v30, 0.0 }
 0xb5f   : > { %4458 = vadd.xlane.f32.xlu0 %v4457_v52 }
 0xb62   : > { %4515 = vadd.xlane.f32.xlu1 %v4514_v23 }
 0xb63   : > { %4512 = vadd.xlane.f32.xlu0 %v4511_v27 }
 0xb66   : > { %4521 = vadd.xlane.f32.xlu1 %v4520_v47 }
 0xb67   : > { %4518 = vadd.xlane.f32.xlu0 %v4517_v62 }
 0xb6a   : > { %4527 = vadd.xlane.f32.xlu1 %v4526_v22 }
 0xb6b   : > { %4524 = vadd.xlane.f32.xlu0 %v4523_v57 }
 0xb6e   : > { %4533 = vadd.xlane.f32.xlu1 %v4532_v18 }
 0xb6f   : > { %4530 = vadd.xlane.f32.xlu0 %v4529_v49 }
 0xbdf   : > { %v4444_v40 = vpop.xlane.xlu1 %4443 }
 0xbe0   : > { %v4472_v41 = vmul.f32 0.03125, %v4444_v40  ;;  %v4441_v25 = vpop.xlane.xlu0 %4440 }
 0xbe1   : > { %v4471_v29 = vmul.f32 0.03125, %v4441_v25 }
 0xbe2   : > { %v9992_v42 = vsub.f32 %v9892_v1, %v4472_v41  ;;  %v10047_v41 = vld [vmem:[%s10321_s3 + $0x7] ss:$0 sm:$0xff] }
 0xbe3   : > { %v9995_v4 = vsub.f32 %v9895_v46, %v4471_v29  ;;  %v4450_v3 = vpop.xlane.xlu1 %4449 }
 0xbe4   : > { %v4474_v7 = vmul.f32 0.03125, %v4450_v3  ;;  %v4447_v35 = vpop.xlane.xlu0 %4446  ;;  %v4504_v53 = vmul.f32 %v9992_v42, %v9992_v42 }
 0xbe5   : > { %v4473_v33 = vmul.f32 0.03125, %v4447_v35  ;;  %v4503_v5 = vmul.f32 %v9995_v4, %v9995_v4 }
 0xbe6   : > { %v10002_v6 = vsub.f32 %v9902_v12, %v4474_v7  ;;  %v4538_v63 = vsel %vm242_vm0, %v4504_v53, 0.0 }
 0xbe7   : > { %v10006_v1 = vsub.f32 %v9905_v38, %v4473_v33  ;;  %v4456_v46 = vpop.xlane.xlu1 %4455  ;;  %4539 = vadd.xlane.f32.xlu1 %v4538_v63  ;;  %v4535_v51 = vsel %vm242_vm0, %v4503_v5, 0.0  ;;  %v10055_v5 = vmul.f32 %v10047_v41, %v9918_v43 }
 0xbe8   : > { %v4476_v26 = vmul.f32 0.03125, %v4456_v46  ;;  %4536 = vadd.xlane.f32.xlu0 %v4535_v51  ;;  %v4453_v15 = vpop.xlane.xlu0 %4452  ;;  %v4506_v60 = vmul.f32 %v10002_v6, %v10002_v6 }
 0xbe9   : > { %v4475_v32 = vmul.f32 0.03125, %v4453_v15  ;;  %v4505_v12 = vmul.f32 %v10006_v1, %v10006_v1 }
 0xbea   : > { %v10014_v17 = vsub.f32 %v9912_v55, %v4476_v26  ;;  %v4544_v38 = vsel %vm242_vm0, %v4506_v60, 0.0 }
 0xbeb   : > { %v10018_v11 = vsub.f32 %v9915_v28, %v4475_v32  ;;  %4545 = vadd.xlane.f32.xlu1 %v4544_v38  ;;  %v4462_v48 = vpop.xlane.xlu1 %4461  ;;  %v4541_v61 = vsel %vm242_vm0, %v4505_v12, 0.0 }
 0xbec   : > { %v4478_v52 = vmul.f32 0.03125, %v4462_v48  ;;  %4542 = vadd.xlane.f32.xlu0 %v4541_v61  ;;  %v4459_v0 = vpop.xlane.xlu0 %4458  ;;  %v4508_v44 = vmul.f32 %v10014_v17, %v10014_v17 }
 0xbed   : > { %v4477_v13 = vmul.f32 0.03125, %v4459_v0  ;;  %v4507_v55 = vmul.f32 %v10018_v11, %v10018_v11 }
 0xbee   : > { %v10026_v23 = vsub.f32 %v9928_v9, %v4478_v52  ;;  %v4550_v28 = vsel %vm242_vm0, %v4508_v44, 0.0 }
 0xbef   : > { %v10030_v21 = vsub.f32 %v9931_v30, %v4477_v13  ;;  %4551 = vadd.xlane.f32.xlu1 %v4550_v28  ;;  %v4516_v19 = vpop.xlane.xlu1 %4515  ;;  %v4547_v27 = vsel %vm242_vm0, %v4507_v55, 0.0 }
 0xbf0   : > { %v4560_v59 = vmul.f32 0.032258064, %v4516_v19  ;;  %4548 = vadd.xlane.f32.xlu0 %v4547_v27  ;;  %v4513_v47 = vpop.xlane.xlu0 %4512  ;;  %v4510_v31 = vmul.f32 %v10026_v23, %v10026_v23 }
 0xbf1   : > { %v4559_v62 = vmul.f32 0.032258064, %v4513_v47  ;;  %v4509_v9 = vmul.f32 %v10030_v21, %v10030_v21 }
 0xbf2   : > { %7629 = vrsqrt.f32 %v4560_v59  ;;  %v4556_v30 = vsel %vm242_vm0, %v4510_v31, 0.0  ;;  %vm4584_vm9 = vcmp.eq.f32.partialorder %v4560_v59, inf  ;;  %vm4586_vm10 = vcmp.eq.f32.partialorder %v4560_v59, 0.0 }
 0xbf3   : > { %7631 = vrsqrt.f32 %v4559_v62  ;;  %v4522_v24 = vpop.xlane.xlu1 %4521  ;;  %v4553_v14 = vsel %vm242_vm0, %v4509_v9, 0.0  ;;  %4557 = vadd.xlane.f32.xlu1 %v4556_v30  ;;  %v4587_v3 = vand.u32 2147483648, %v4560_v59  ;;  %vm4577_vm11 = vcmp.eq.f32.partialorder %v4559_v62, inf }
 0xbf4   : > { %v4562_v22 = vmul.f32 0.032258064, %v4522_v24  ;;  %v4519_v57 = vpop.xlane.xlu0 %4518  ;;  %4554 = vadd.xlane.f32.xlu0 %v4553_v14  ;;  %v4580_v53 = vand.u32 2147483648, %v4559_v62  ;;  %vm4579_vm14 = vcmp.eq.f32.partialorder %v4559_v62, 0.0 }
 0xbf5   : > { %v4561_v45 = vmul.f32 0.032258064, %v4519_v57 }
 0xbf6   : > { %7633 = vrsqrt.f32 %v4562_v22  ;;  %vm4598_vm13 = vcmp.eq.f32.partialorder %v4562_v22, inf  ;;  %vm4600_vm3 = vcmp.eq.f32.partialorder %v4562_v22, 0.0  ;;  %v4601_v32 = vand.u32 2147483648, %v4562_v22 }
 0xbf7   : > { %7635 = vrsqrt.f32 %v4561_v45  ;;  %v4528_v18 = vpop.xlane.xlu1 %4527  ;;  %vm4591_vm7 = vcmp.eq.f32.partialorder %v4561_v45, inf  ;;  %v4594_v61 = vand.u32 2147483648, %v4561_v45  ;;  %vm4593_vm1 = vcmp.eq.f32.partialorder %v4561_v45, 0.0 }
 0xbf8   : > { %v4564_v49 = vmul.f32 0.032258064, %v4528_v18  ;;  %v4525_v2 = vpop.xlane.xlu0 %4524 }
 0xbf9   : > { %v10039_v34 = vmul.f32 0.032258064, %v4525_v2 }
 0xbfa   : > { %7637 = vrsqrt.f32 %v4564_v49  ;;  %vm4612_vm2 = vcmp.eq.f32.partialorder %v4564_v49, inf  ;;  %vm4614_vm15 = vcmp.eq.f32.partialorder %v4564_v49, 0.0  ;;  %v4615_v19 = vand.u32 2147483648, %v4564_v49 }
 0xbfb   : > { %7639 = vrsqrt.f32 %v10039_v34  ;;  %v4534_v20 = vpop.xlane.xlu1 %4533  ;;  %vm4605_vm4 = vcmp.eq.f32.partialorder %v10039_v34, inf  ;;  %v4608_v31 = vand.u32 2147483648, %v10039_v34  ;;  %vm4607_vm5 = vcmp.eq.f32.partialorder %v10039_v34, 0.0 }
 0xbfc   : > { %v7630_v36 = vpop.eup %7629  ;;  %v10042_v8 = vmul.f32 0.032258064, %v4534_v20  ;;  %v4531_v16 = vpop.xlane.xlu0 %4530 }
 0xbfd   : > { %v7632_v40 = vpop.eup %7631  ;;  %v4583_v25 = vmul.f32 %v7630_v36, %v4560_v59  ;;  %v10049_v29 = vmul.f32 0.032258064, %v4531_v16 }
 0xbfe   : > { %v4576_v7 = vmul.f32 %v7632_v40, %v4559_v62  ;;  %7641 = vrsqrt.f32 %v10042_v8  ;;  %vm4626_vm6 = vcmp.eq.f32.partialorder %v10042_v8, inf  ;;  %vm4628_vm8 = vcmp.eq.f32.partialorder %v10042_v8, 0.0 }
 0xbff   : > { %v4585_v35 = vsel %vm4584_vm9, %v4560_v59, %v4583_v25  ;;  %7643 = vrsqrt.f32 %v10049_v29  ;;  %vm4619_vm9 = vcmp.eq.f32.partialorder %v10049_v29, inf  ;;  %v4691_v40 = vmul.f32 %v10047_v41, %v9923_v10 }
 0xc00   : > { %v7634_v33 = vpop.eup %7633  ;;  %v4588_v63 = vsel %vm4586_vm10, %v4587_v3, %v4585_v35  ;;  %v4578_v46 = vsel %vm4577_vm11, %v4559_v62, %v4576_v7  ;;  %vm4621_vm10 = vcmp.eq.f32.partialorder %v10049_v29, 0.0  ;;  %v4693_v10 = vmul.f32 %v10047_v41, %v9941_v56 }
 0xc01   : > { %v7636_v51 = vpop.eup %7635  ;;  %v4708_v26 = vadd.f32 1e-06, %v4588_v63  ;;  %v4581_v15 = vsel %vm4579_vm14, %v4580_v53, %v4578_v46  ;;  %v4597_v60 = vmul.f32 %v7634_v33, %v4562_v22  ;;  %v4695_v56 = vmul.f32 %v10047_v41, %v9954_v54 }
 0xc02   : > { %v4590_v12 = vmul.f32 %v7636_v51, %v4561_v45  ;;  %v4707_v38 = vadd.f32 1e-06, %v4581_v15  ;;  %v4697_v54 = vmul.f32 %v10047_v41, %v9966_v39 }
 0xc03   : > { %7645 = vrcp.f32 %v4708_v26  ;;  %v4599_v48 = vsel %vm4598_vm13, %v4562_v22, %v4597_v60 }
 0xc04   : > { %v7638_v52 = vpop.eup %7637  ;;  %v4602_v0 = vsel %vm4600_vm3, %v4601_v32, %v4599_v48  ;;  %v4592_v43 = vsel %vm4591_vm7, %v4561_v45, %v4590_v12  ;;  %7647 = vrcp.f32 %v4707_v38  ;;  %v4629_v45 = vand.u32 2147483648, %v10042_v8 }
 0xc05   : > { %v7640_v44 = vpop.eup %7639  ;;  %v4595_v13 = vsel %vm4593_vm1, %v4594_v61, %v4592_v43  ;;  %v4611_v55 = vmul.f32 %v7638_v52, %v4564_v49  ;;  %v4710_v28 = vadd.f32 1e-06, %v4602_v0 }
 0xc06   : > { %v4604_v27 = vmul.f32 %v7640_v44, %v10039_v34  ;;  %v4709_v59 = vadd.f32 1e-06, %v4595_v13 }
 0xc07   : > { %v4613_v47 = vsel %vm4612_vm2, %v4564_v49, %v4611_v55  ;;  %7649 = vrcp.f32 %v4710_v28  ;;  %v5716_v28 = vld [vmem:[%s10320_s2 + $0x80] sm:$0xff] }
 0xc08   : > { %v7642_v62 = vpop.eup %7641  ;;  %v4616_v9 = vsel %vm4614_vm15, %v4615_v19, %v4613_v47  ;;  %v4606_v24 = vsel %vm4605_vm4, %v10039_v34, %v4604_v27  ;;  %7651 = vrcp.f32 %v4709_v59  ;;  %v4622_v34 = vand.u32 2147483648, %v10049_v29  ;;  %v5717_v19 = vld [vmem:[%s10320_s2 + $0x88] sm:$0xff]  ;;  %v5718_v47 = vld [vmem:[%s10320_s2 + $0x90] sm:$0xff] }
 0xc09   : > { %v7644_v30 = vpop.eup %7643  ;;  %v4609_v22 = vsel %vm4607_vm5, %v4608_v31, %v4606_v24  ;;  %v4625_v14 = vmul.f32 %v7642_v62, %v10042_v8  ;;  %v4712_v57 = vadd.f32 1e-06, %v4616_v9  ;;  %v7237_v27 = vpack.c.bf16 %v5717_v19, %v5716_v28  ;;  %v5719_v31 = vld [vmem:[%s10320_s2 + $0x98] sm:$0xff] }
 0xc0a   : > { %v4618_v18 = vmul.f32 %v7644_v30, %v10049_v29  ;;  %v4711_v49 = vadd.f32 1e-06, %v4609_v22  ;;  %v7241_v24 = vpack.c.bf16 %v5719_v31, %v5718_v47 }
 0xc0b   : > { %v4627_v2 = vsel %vm4626_vm6, %v10042_v8, %v4625_v14  ;;  %7653 = vrcp.f32 %v4712_v57  ;;  %v10077_v8 = vld [vmem:[%s10321_s3 + $0x8] ss:$0 sm:$0xff]  ;;  %7238 = vmatprep.subr.bf16.mxu1 %v7237_v27  ;;  %v5720_v14 = vld [vmem:[%s10320_s2 + $0xa0] sm:$0xff] }
 0xc0c   : > { %v4630_v20 = vsel %vm4628_vm8, %v4629_v45, %v4627_v2  ;;  %v4620_v36 = vsel %vm4619_vm9, %v10049_v29, %v4618_v18  ;;  %7655 = vrcp.f32 %v4711_v49  ;;  %v4694_v29 = vmul.f32 %v10047_v41, %v9934_v37  ;;  %7240 = vmatpush3.bf16.msra.mxu1 %v7237_v27  ;;  %v5721_v57 = vld [vmem:[%s10320_s2 + $0xa8] sm:$0xff] }
 0xc0d   : > { %v7646_v16 = vpop.eup %7645  ;;  %v4623_v25 = vsel %vm4621_vm10, %v4622_v34, %v4620_v36  ;;  %v4714_v3 = vadd.f32 1e-06, %v4630_v20  ;;  %v4696_v37 = vmul.f32 %v10047_v41, %v9948_v50  ;;  %v4698_v50 = vmul.f32 %v10047_v41, %v9960_v58  ;;  %7242 = vmatprep.subr.bf16.mxu1 %v7241_v24  ;;  %v5722_v20 = vld [vmem:[%s10320_s2 + $0xb0] sm:$0xff]  ;;  %v5723_v36 = vld [vmem:[%s10320_s2 + $0xb8] sm:$0xff] }
 0xc0e   : > { %v7648_v7 = vpop.eup %7647  ;;  %v4740_v35 = vmul.f32 %v7646_v16, %v10055_v5  ;;  %v4713_v53 = vadd.f32 1e-06, %v4623_v25  ;;  %v7245_v49 = vpack.c.bf16 %v5721_v57, %v5720_v14  ;;  %v7249_v25 = vpack.c.bf16 %v5723_v36, %v5722_v20 }
 0xc0f   : > { %v4739_v33 = vmul.f32 %v7648_v7, %v4691_v40  ;;  %7657 = vrcp.f32 %v4714_v3 }
 0xc10   : > { %7659 = vrcp.f32 %v4713_v53  ;;  %v10088_v26 = vadd.f32 %v10077_v8, %v4740_v35  ;;  %7244 = vmatpush3.bf16.msra.mxu1 %v7241_v24 }
 0xc11   : > { %v7650_v63 = vpop.eup %7649  ;;  %v10085_v46 = vadd.f32 %v10077_v8, %v4739_v33  ;;  %7246 = vmatprep.subr.bf16.mxu1 %v7245_v49 }
 0xc12   : > { %v7652_v51 = vpop.eup %7651  ;;  %v4742_v15 = vmul.f32 %v7650_v63, %v4694_v29 }
 0xc13   : > { %6717 = vmatprep.mubr.msk.f32.mxu0 %vm242_vm0, %v10085_v46  ;;  %v4741_v5 = vmul.f32 %v7652_v51, %v4693_v10 }
 0xc14   : > { %6718 = vmatmul.mubr.msk.f32.vlgmr.msra.gmra.mrb[64].mxu0 %vm242_vm0, %v10088_v26  ;;  %v10102_v38 = vadd.f32 %v10077_v8, %v4742_v15  ;;  %7248 = vmatpush3.bf16.msra.mxu1 %v7245_v49 }
 0xc15   : > { %v7654_v60 = vpop.eup %7653  ;;  %v10099_v32 = vadd.f32 %v10077_v8, %v4741_v5  ;;  %7250 = vmatprep.subr.bf16.mxu1 %v7249_v25 }
 0xc16   : > { %v7656_v12 = vpop.eup %7655  ;;  %v4744_v48 = vmul.f32 %v7654_v60, %v4696_v37 }
 0xc17   : > { %6720 = vmatprep.mubr.msk.f32.mxu0 %vm242_vm0, %v10099_v32  ;;  %v4743_v61 = vmul.f32 %v7656_v12, %v4695_v56 }
 0xc18   : > { %6721 = vmatmul.mubr.msk.f32.gmra.mrb[66].mxu0 %vm242_vm0, %v10102_v38  ;;  %v10116_v44 = vadd.f32 %v10077_v8, %v4744_v48  ;;  %7252 = vmatpush3.bf16.msra.mxu1 %v7249_v25 }
 0xc19   : > { %v7658_v52 = vpop.eup %7657  ;;  %v10113_v0 = vadd.f32 %v10077_v8, %v4743_v61 }
 0xc1a   : > { %v7660_v43 = vpop.eup %7659  ;;  %v4746_v13 = vmul.f32 %v7658_v52, %v4698_v50 }
 0xc1b   : > { %6723 = vmatprep.mubr.msk.f32.mxu0 %vm242_vm0, %v10113_v0  ;;  %v4745_v55 = vmul.f32 %v7660_v43, %v4697_v54 }
 0xc1c   : > { %6724 = vmatmul.mubr.msk.f32.gmra.mrb[68].mxu0 %vm242_vm0, %v10116_v44  ;;  %v10126_v39 = vadd.f32 %v10077_v8, %v4746_v13 }
 0xc1d   : > { %v10123_v58 = vadd.f32 %v10077_v8, %v4745_v55 }
 0xc1f   : > { %6726 = vmatprep.mubr.msk.f32.mxu0 %vm242_vm0, %v10123_v58 }
 0xc20   : > { %6727 = vmatmul.mubr.msk.f32.gmra.mrb[70].mxu0 %vm242_vm0, %v10126_v39 }
 0xc74   : > { %v4540_v59 = vpop.xlane.xlu1 %4539 }
 0xc75   : > { %v4568_v62 = vmul.f32 0.032258064, %v4540_v59  ;;  %v4537_v9 = vpop.xlane.xlu0 %4536 }
 0xc76   : > { %v4567_v30 = vmul.f32 0.032258064, %v4537_v9 }
 0xc77   : > { %7661 = vrsqrt.f32 %v4568_v62  ;;  %vm4640_vm11 = vcmp.eq.f32.partialorder %v4568_v62, inf  ;;  %vm4642_vm14 = vcmp.eq.f32.partialorder %v4568_v62, 0.0  ;;  %v4643_v63 = vand.u32 2147483648, %v4568_v62 }
 0xc78   : > { %7663 = vrsqrt.f32 %v4567_v30  ;;  %v4546_v22 = vpop.xlane.xlu1 %4545  ;;  %vm4633_vm13 = vcmp.eq.f32.partialorder %v4567_v30, inf  ;;  %vm4635_vm3 = vcmp.eq.f32.partialorder %v4567_v30, 0.0  ;;  %v4636_v37 = vand.u32 2147483648, %v4567_v30 }
 0xc79   : > { %v4570_v45 = vmul.f32 0.032258064, %v4546_v22  ;;  %v4543_v18 = vpop.xlane.xlu0 %4542 }
 0xc7a   : > { %v4569_v2 = vmul.f32 0.032258064, %v4543_v18 }
 0xc7b   : > { %7665 = vrsqrt.f32 %v4570_v45  ;;  %vm4654_vm7 = vcmp.eq.f32.partialorder %v4570_v45, inf  ;;  %vm4656_vm1 = vcmp.eq.f32.partialorder %v4570_v45, 0.0  ;;  %v4657_v52 = vand.u32 2147483648, %v4570_v45 }
 0xc7c   : > { %7667 = vrsqrt.f32 %v4569_v2  ;;  %v4552_v34 = vpop.xlane.xlu1 %4551  ;;  %vm4647_vm2 = vcmp.eq.f32.partialorder %v4569_v2, inf  ;;  %vm4649_vm15 = vcmp.eq.f32.partialorder %v4569_v2, 0.0  ;;  %v4650_v13 = vand.u32 2147483648, %v4569_v2 }
 0xc7d   : > { %v4572_v16 = vmul.f32 0.032258064, %v4552_v34  ;;  %v4549_v40 = vpop.xlane.xlu0 %4548 }
 0xc7e   : > { %v4571_v3 = vmul.f32 0.032258064, %v4549_v40 }
 0xc7f   : > { %7669 = vrsqrt.f32 %v4572_v16  ;;  %vm4668_vm4 = vcmp.eq.f32.partialorder %v4572_v16, inf  ;;  %vm4670_vm5 = vcmp.eq.f32.partialorder %v4572_v16, 0.0  ;;  %v4671_v24 = vand.u32 2147483648, %v4572_v16 }
 0xc80   : > { %7671 = vrsqrt.f32 %v4571_v3  ;;  %v4558_v33 = vpop.xlane.xlu1 %4557  ;;  %vm4661_vm6 = vcmp.eq.f32.partialorder %v4571_v3, inf  ;;  %v4664_v57 = vand.u32 2147483648, %v4571_v3  ;;  %vm4663_vm8 = vcmp.eq.f32.partialorder %v4571_v3, 0.0 }
 0xc81   : > { %v7662_v7 = vpop.eup %7661  ;;  %v4555_v29 = vpop.xlane.xlu0 %4554  ;;  %v4574_v51 = vmul.f32 0.032258064, %v4558_v33 }
 0xc82   : > { %v7664_v35 = vpop.eup %7663  ;;  %v4639_v53 = vmul.f32 %v7662_v7, %v4568_v62  ;;  %v10156_v15 = vmul.f32 0.032258064, %v4555_v29  ;;  %v4700_v29 = vmul.f32 %v10047_v41, %v9992_v42 }
 0xc83   : > { %v4632_v10 = vmul.f32 %v7664_v35, %v4567_v30  ;;  %7673 = vrsqrt.f32 %v4574_v51  ;;  %vm4682_vm9 = vcmp.eq.f32.partialorder %v4574_v51, inf  ;;  %v4685_v25 = vand.u32 2147483648, %v4574_v51 }
 0xc84   : > { %v4641_v5 = vsel %vm4640_vm11, %v4568_v62, %v4639_v53  ;;  %7675 = vrsqrt.f32 %v10156_v15  ;;  %vm4684_vm10 = vcmp.eq.f32.partialorder %v4574_v51, 0.0  ;;  %v4699_v35 = vmul.f32 %v10047_v41, %v9995_v4 }
 0xc85   : > { %v7666_v60 = vpop.eup %7665  ;;  %v4644_v56 = vsel %vm4642_vm14, %v4643_v63, %v4641_v5  ;;  %v4634_v12 = vsel %vm4633_vm13, %v4567_v30, %v4632_v10  ;;  %vm4675_vm11 = vcmp.eq.f32.partialorder %v10156_v15, inf  ;;  %vm4677_vm14 = vcmp.eq.f32.partialorder %v10156_v15, 0.0 }
 0xc86   : > { %v7668_v48 = vpop.eup %7667  ;;  %v4637_v61 = vsel %vm4635_vm3, %v4636_v37, %v4634_v12  ;;  %v4653_v50 = vmul.f32 %v7666_v60, %v4570_v45  ;;  %v4716_v28 = vadd.f32 1e-06, %v4644_v56  ;;  %v4702_v5 = vmul.f32 %v10047_v41, %v10002_v6 }
 0xc87   : > { %v4646_v54 = vmul.f32 %v7668_v48, %v4569_v2  ;;  %v4715_v55 = vadd.f32 1e-06, %v4637_v61  ;;  %v4701_v56 = vmul.f32 %v10047_v41, %v10006_v1  ;;  %v4704_v1 = vmul.f32 %v10047_v41, %v10014_v17 }
 0xc88   : > { %v4655_v43 = vsel %vm4654_vm7, %v4570_v45, %v4653_v50 }
 0xc89   : > { %v7670_v19 = vpop.eup %7669  ;;  %v4658_v27 = vsel %vm4656_vm1, %v4657_v52, %v4655_v43  ;;  %v4648_v59 = vsel %vm4647_vm2, %v4569_v2, %v4646_v54  ;;  %7677 = vrcp.f32 %v4715_v55  ;;  %v4703_v54 = vmul.f32 %v10047_v41, %v10018_v11 }
 0xc8a   : > { %v7672_v47 = vpop.eup %7671  ;;  %v4651_v31 = vsel %vm4649_vm15, %v4650_v13, %v4648_v59  ;;  %v4667_v62 = vmul.f32 %v7670_v19, %v4572_v16  ;;  %v4718_v9 = vadd.f32 1e-06, %v4658_v27  ;;  %7679 = vrcp.f32 %v4716_v28 }
 0xc8b   : > { %v4660_v30 = vmul.f32 %v7672_v47, %v4571_v3  ;;  %v4717_v22 = vadd.f32 1e-06, %v4651_v31  ;;  %v4706_v27 = vmul.f32 %v10047_v41, %v10026_v23  ;;  %v4705_v47 = vmul.f32 %v10047_v41, %v10030_v21  ;;  %v10223_v21 = vld [vmem:[%s10321_s3 + $0x4] ss:$0 sm:$0xff] }
 0xc8c   : > { %v4669_v14 = vsel %vm4668_vm4, %v4572_v16, %v4667_v62  ;;  %7681 = vrcp.f32 %v4718_v9 }
 0xc8d   : > { %v4672_v45 = vsel %vm4670_vm5, %v4671_v24, %v4669_v14  ;;  %v4662_v18 = vsel %vm4661_vm6, %v4571_v3, %v4660_v30  ;;  %7683 = vrcp.f32 %v4717_v22  ;;  %v7674_v34 = vpop.eup %7673  ;;  %v4678_v3 = vand.u32 2147483648, %v10156_v15 }
 0xc8e   : > { %v4665_v49 = vsel %vm4663_vm8, %v4664_v57, %v4662_v18  ;;  %v4720_v2 = vadd.f32 1e-06, %v4672_v45  ;;  %v4681_v36 = vmul.f32 %v7674_v34, %v4574_v51  ;;  %v7676_v40 = vpop.eup %7675 }
 0xc8f   : > { %v4719_v20 = vadd.f32 1e-06, %v4665_v49  ;;  %v4674_v16 = vmul.f32 %v7676_v40, %v10156_v15 }
 0xc90   : > { %7685 = vrcp.f32 %v4720_v2  ;;  %v4683_v7 = vsel %vm4682_vm9, %v4574_v51, %v4681_v36 }
 0xc91   : > { %7687 = vrcp.f32 %v4719_v20  ;;  %v4686_v53 = vsel %vm4684_vm10, %v4685_v25, %v4683_v7  ;;  %v4676_v10 = vsel %vm4675_vm11, %v10156_v15, %v4674_v16 }
 0xc92   : > { %v4722_v63 = vadd.f32 1e-06, %v4686_v53  ;;  %v4679_v37 = vsel %vm4677_vm14, %v4678_v3, %v4676_v10 }
 0xc93   : > { %v7678_v33 = vpop.eup %7677  ;;  %v4721_v12 = vadd.f32 1e-06, %v4679_v37 }
 0xc94   : > { %v7680_v51 = vpop.eup %7679  ;;  %v4747_v4 = vmul.f32 %v7678_v33, %v4699_v35  ;;  %7689 = vrcp.f32 %v4722_v63 }
 0xc95   : > { %v4748_v48 = vmul.f32 %v7680_v51, %v4700_v29  ;;  %7691 = vrcp.f32 %v4721_v12 }
 0xc96   : > { %v7682_v60 = vpop.eup %7681  ;;  %v10173_v42 = vadd.f32 %v10077_v8, %v4747_v4 }
 0xc97   : > { %v7684_v61 = vpop.eup %7683  ;;  %v10176_v50 = vadd.f32 %v10077_v8, %v4748_v48  ;;  %v4750_v52 = vmul.f32 %v7682_v60, %v4702_v5 }
 0xc98   : > { %v4749_v15 = vmul.f32 %v7684_v61, %v4701_v56  ;;  %6729 = vmatprep.mubr.msk.f32.mxu0 %vm242_vm0, %v10173_v42 }
 0xc99   : > { %6730 = vmatmul.mubr.msk.f32.gmra.mrb[72].mxu0 %vm242_vm0, %v10176_v50  ;;  %v10192_v55 = vadd.f32 %v10077_v8, %v4750_v52 }
 0xc9a   : > { %v7686_v6 = vpop.eup %7685  ;;  %v10187_v43 = vadd.f32 %v10077_v8, %v4749_v15 }
 0xc9b   : > { %v7688_v13 = vpop.eup %7687  ;;  %v4752_v19 = vmul.f32 %v7686_v6, %v4704_v1 }
 0xc9c   : > { %6732 = vmatprep.mubr.msk.f32.mxu0 %vm242_vm0, %v10187_v43  ;;  %v4751_v28 = vmul.f32 %v7688_v13, %v4703_v54 }
 0xc9d   : > { %6733 = vmatmul.mubr.msk.f32.gmra.mrb[74].mxu0 %vm242_vm0, %v10192_v55  ;;  %v10204_v59 = vadd.f32 %v10077_v8, %v4752_v19 }
 0xc9e   : > { %v10197_v17 = vadd.f32 %v10077_v8, %v4751_v28  ;;  %v7690_v11 = vpop.eup %7689 }
 0xc9f   : > { %v7692_v31 = vpop.eup %7691  ;;  %v4754_v62 = vmul.f32 %v7690_v11, %v4706_v27 }
 0xca0   : > { %6735 = vmatprep.mubr.msk.f32.mxu0 %vm242_vm0, %v10197_v17  ;;  %v4753_v9 = vmul.f32 %v7692_v31, %v4705_v47 }
 0xca1   : > { %6736 = vmatmul.mubr.msk.f32.gmra.mrb[76].mxu0 %vm242_vm0, %v10204_v59  ;;  %v10214_v23 = vadd.f32 %v10077_v8, %v4754_v62 }
 0xca2   : > { %v10211_v24 = vadd.f32 %v10077_v8, %v4753_v9 }
 0xca4   : > { %6738 = vmatprep.mubr.msk.f32.mxu0 %vm242_vm0, %v10211_v24 }
 0xca5   : > { %6739 = vmatmul.mubr.msk.f32.gmra.mrb[78].mxu0 %vm242_vm0, %v10214_v23 }
 0xce7   : > { %v6719_v41 = vpop.f32.mrb[64].mxu0 }
 0xce8   : > { %v4905_v30 = vadd.f32 %v6719_v41, %v10223_v21  ;;  %v4899_v22 = vpop.f32.mrb[65].mxu0 }
 0xce9   : > { %v4900_v14 = vadd.f32 %v10223_v21, %v4899_v22 }
 0xcea   : > { %v4995_v57 = vmul.f32 0.70710677, %v4905_v30  ;;  %v4979_v56 = vmul.f32 0.5, %v4905_v30 }
 0xceb   : > { %v4994_v8 = vmul.f32 0.70710677, %v4900_v14  ;;  %v6722_v45 = vpop.f32.mrb[66].mxu0  ;;  %v4978_v4 = vmul.f32 0.5, %v4900_v14 }
 0xcec   : > { %7693 = verf.f32 %v4995_v57  ;;  %v4915_v18 = vadd.f32 %v6722_v45, %v10223_v21  ;;  %v4909_v49 = vpop.f32.mrb[67].mxu0 }
 0xced   : > { %7695 = verf.f32 %v4994_v8  ;;  %v4910_v2 = vadd.f32 %v10223_v21, %v4909_v49 }
 0xcee   : > { %v4997_v34 = vmul.f32 0.70710677, %v4915_v18  ;;  %v4981_v54 = vmul.f32 0.5, %v4915_v18 }
 0xcef   : > { %v4996_v20 = vmul.f32 0.70710677, %v4910_v2  ;;  %v6725_v36 = vpop.f32.mrb[68].mxu0  ;;  %v4980_v6 = vmul.f32 0.5, %v4910_v2 }
 0xcf0   : > { %7697 = verf.f32 %v4997_v34  ;;  %v4925_v40 = vadd.f32 %v6725_v36, %v10223_v21  ;;  %v4919_v25 = vpop.f32.mrb[69].mxu0 }
 0xcf1   : > { %7699 = verf.f32 %v4996_v20  ;;  %v4920_v7 = vadd.f32 %v10223_v21, %v4919_v25 }
 0xcf2   : > { %v4999_v16 = vmul.f32 0.70710677, %v4925_v40  ;;  %v4983_v62 = vmul.f32 0.5, %v4925_v40 }
 0xcf3   : > { %v4998_v35 = vmul.f32 0.70710677, %v4920_v7  ;;  %v6728_v53 = vpop.f32.mrb[70].mxu0  ;;  %v4982_v47 = vmul.f32 0.5, %v4920_v7 }
 0xcf4   : > { %7701 = verf.f32 %v4999_v16  ;;  %v4935_v3 = vadd.f32 %v6728_v53, %v10223_v21  ;;  %v4929_v33 = vpop.f32.mrb[71].mxu0 }
 0xcf5   : > { %7703 = verf.f32 %v4998_v35  ;;  %v4930_v29 = vadd.f32 %v10223_v21, %v4929_v33 }
 0xcf6   : > { %v7694_v63 = vpop.eup %7693  ;;  %v5001_v10 = vmul.f32 0.70710677, %v4935_v3  ;;  %v4985_v45 = vmul.f32 0.5, %v4935_v3 }
 0xcf7   : > { %v7696_v51 = vpop.eup %7695  ;;  %v5027_v5 = vadd.f32 1.0, %v7694_v63  ;;  %v5000_v37 = vmul.f32 0.70710677, %v4930_v29  ;;  %v4984_v57 = vmul.f32 0.5, %v4930_v29 }
 0xcf8   : > { %v5026_v60 = vadd.f32 1.0, %v7696_v51  ;;  %7705 = verf.f32 %v5001_v10 }
 0xcf9   : > { %7707 = verf.f32 %v5000_v37  ;;  %v5043_v15 = vmul.f32 %v5027_v5, %v4979_v56 }
 0xcfa   : > { %v7698_v12 = vpop.eup %7697  ;;  %v5042_v48 = vmul.f32 %v5026_v60, %v4978_v4 }
 0xcfb   : > { %v7700_v61 = vpop.eup %7699  ;;  %v5029_v52 = vadd.f32 1.0, %v7698_v12 }
 0xcfc   : > { %v5028_v1 = vadd.f32 1.0, %v7700_v61  ;;  %6757 = vmatprep.mubr.msk.f32.mxu1 %vm906_vm12, %v5042_v48 }
 0xcfd   : > { %6758 = vmatmul.mubr.msk.f32.vlgmr.msra.gmra.mrb[64].mxu1 %vm906_vm12, %v5043_v15  ;;  %v5045_v11 = vmul.f32 %v5029_v52, %v4981_v54 }
 0xcfe   : > { %v7702_v13 = vpop.eup %7701  ;;  %v5044_v28 = vmul.f32 %v5028_v1, %v4980_v6 }
 0xcff   : > { %v7704_v19 = vpop.eup %7703  ;;  %v5031_v27 = vadd.f32 1.0, %v7702_v13 }
 0xd00   : > { %v5030_v31 = vadd.f32 1.0, %v7704_v19  ;;  %6760 = vmatprep.mubr.msk.f32.mxu1 %vm906_vm12, %v5044_v28 }
 0xd01   : > { %6761 = vmatmul.mubr.msk.f32.gmra.mrb[66].mxu1 %vm906_vm12, %v5045_v11  ;;  %v5047_v22 = vmul.f32 %v5031_v27, %v4983_v62 }
 0xd02   : > { %v7706_v9 = vpop.eup %7705  ;;  %v5046_v41 = vmul.f32 %v5030_v31, %v4982_v47 }
 0xd03   : > { %v7708_v30 = vpop.eup %7707  ;;  %v5033_v14 = vadd.f32 1.0, %v7706_v9 }
 0xd04   : > { %v5032_v8 = vadd.f32 1.0, %v7708_v30  ;;  %6763 = vmatprep.mubr.msk.f32.mxu1 %vm906_vm12, %v5046_v41 }
 0xd05   : > { %6764 = vmatmul.mubr.msk.f32.gmra.mrb[68].mxu1 %vm906_vm12, %v5047_v22  ;;  %v5049_v49 = vmul.f32 %v5033_v14, %v4985_v45 }
 0xd06   : > { %v5048_v18 = vmul.f32 %v5032_v8, %v4984_v57 }
 0xd08   : > { %6766 = vmatprep.mubr.msk.f32.mxu1 %vm906_vm12, %v5048_v18 }
 0xd09   : > { %6767 = vmatmul.mubr.msk.f32.gmra.mrb[70].mxu1 %vm906_vm12, %v5049_v49 }
 0xd6c   : > { %v6731_v2 = vpop.f32.mrb[72].mxu0 }
 0xd6d   : > { %v4945_v34 = vadd.f32 %v6731_v2, %v10223_v21  ;;  %v4939_v20 = vpop.f32.mrb[73].mxu0 }
 0xd6e   : > { %v4940_v36 = vadd.f32 %v10223_v21, %v4939_v20 }
 0xd6f   : > { %v5003_v40 = vmul.f32 0.70710677, %v4945_v34  ;;  %v4987_v54 = vmul.f32 0.5, %v4945_v34 }
 0xd70   : > { %v5002_v25 = vmul.f32 0.70710677, %v4940_v36  ;;  %v6734_v7 = vpop.f32.mrb[74].mxu0  ;;  %v4986_v52 = vmul.f32 0.5, %v4940_v36 }
 0xd71   : > { %7709 = verf.f32 %v5003_v40  ;;  %v4955_v16 = vadd.f32 %v6734_v7, %v10223_v21  ;;  %v4949_v35 = vpop.f32.mrb[75].mxu0 }
 0xd72   : > { %7711 = verf.f32 %v5002_v25  ;;  %v4950_v53 = vadd.f32 %v10223_v21, %v4949_v35  ;;  %v5724_v35 = vld [vmem:[%s10321_s3 + $0xb] ss:$0 sm:$0xff] }
 0xd73   : > { %v5005_v3 = vmul.f32 0.70710677, %v4955_v16  ;;  %v4989_v9 = vmul.f32 0.5, %v4955_v16 }
 0xd74   : > { %v5004_v33 = vmul.f32 0.70710677, %v4950_v53  ;;  %v6737_v29 = vpop.f32.mrb[76].mxu0  ;;  %v4988_v31 = vmul.f32 0.5, %v4950_v53 }
 0xd75   : > { %7713 = verf.f32 %v5005_v3  ;;  %v4965_v63 = vadd.f32 %v6737_v29, %v10223_v21  ;;  %v4959_v10 = vpop.f32.mrb[77].mxu0 }
 0xd76   : > { %7715 = verf.f32 %v5004_v33  ;;  %v4960_v51 = vadd.f32 %v10223_v21, %v4959_v10 }
 0xd77   : > { %v5007_v5 = vmul.f32 0.70710677, %v4965_v63  ;;  %v4991_v45 = vmul.f32 0.5, %v4965_v63 }
 0xd78   : > { %v5006_v37 = vmul.f32 0.70710677, %v4960_v51  ;;  %v6740_v4 = vpop.f32.mrb[78].mxu0  ;;  %v4990_v57 = vmul.f32 0.5, %v4960_v51 }
 0xd79   : > { %7717 = verf.f32 %v5007_v5  ;;  %v4975_v56 = vadd.f32 %v6740_v4, %v10223_v21  ;;  %v4969_v12 = vpop.f32.mrb[79].mxu0 }
 0xd7a   : > { %7719 = verf.f32 %v5006_v37  ;;  %v4970_v15 = vadd.f32 %v10223_v21, %v4969_v12 }
 0xd7b   : > { %v7710_v60 = vpop.eup %7709  ;;  %v5009_v1 = vmul.f32 0.70710677, %v4975_v56  ;;  %v4993_v25 = vmul.f32 0.5, %v4975_v56 }
 0xd7c   : > { %v7712_v48 = vpop.eup %7711  ;;  %v5035_v61 = vadd.f32 1.0, %v7710_v60  ;;  %v5008_v13 = vmul.f32 0.70710677, %v4970_v15  ;;  %v4992_v36 = vmul.f32 0.5, %v4970_v15 }
 0xd7d   : > { %v5034_v6 = vadd.f32 1.0, %v7712_v48  ;;  %7721 = verf.f32 %v5009_v1 }
 0xd7e   : > { %v5051_v27 = vmul.f32 %v5035_v61, %v4987_v54  ;;  %7723 = verf.f32 %v5008_v13 }
 0xd7f   : > { %v7714_v28 = vpop.eup %7713  ;;  %v5050_v19 = vmul.f32 %v5034_v6, %v4986_v52 }
 0xd80   : > { %v7716_v11 = vpop.eup %7715  ;;  %v5037_v47 = vadd.f32 1.0, %v7714_v28 }
 0xd81   : > { %v5036_v62 = vadd.f32 1.0, %v7716_v11  ;;  %6769 = vmatprep.mubr.msk.f32.mxu1 %vm906_vm12, %v5050_v19 }
 0xd82   : > { %6770 = vmatmul.mubr.msk.f32.gmra.mrb[72].mxu1 %vm906_vm12, %v5051_v27  ;;  %v5053_v22 = vmul.f32 %v5037_v47, %v4989_v9 }
 0xd83   : > { %v7718_v21 = vpop.eup %7717  ;;  %v5052_v41 = vmul.f32 %v5036_v62, %v4988_v31 }
 0xd84   : > { %v7720_v30 = vpop.eup %7719  ;;  %v5039_v14 = vadd.f32 1.0, %v7718_v21 }
 0xd85   : > { %v5038_v8 = vadd.f32 1.0, %v7720_v30  ;;  %6772 = vmatprep.mubr.msk.f32.mxu1 %vm906_vm12, %v5052_v41 }
 0xd86   : > { %6773 = vmatmul.mubr.msk.f32.gmra.mrb[74].mxu1 %vm906_vm12, %v5053_v22  ;;  %v5055_v49 = vmul.f32 %v5039_v14, %v4991_v45 }
 0xd87   : > { %v5054_v18 = vmul.f32 %v5038_v8, %v4990_v57  ;;  %v7722_v2 = vpop.eup %7721 }
 0xd88   : > { %v7724_v34 = vpop.eup %7723  ;;  %v5041_v20 = vadd.f32 1.0, %v7722_v2 }
 0xd89   : > { %6775 = vmatprep.mubr.msk.f32.mxu1 %vm906_vm12, %v5054_v18  ;;  %v5040_v40 = vadd.f32 1.0, %v7724_v34 }
 0xd8a   : > { %6776 = vmatmul.mubr.msk.f32.gmra.mrb[76].mxu1 %vm906_vm12, %v5055_v49  ;;  %v5057_v16 = vmul.f32 %v5041_v20, %v4993_v25 }
 0xd8b   : > { %v5056_v7 = vmul.f32 %v5040_v40, %v4992_v36 }
 0xd8d   : > { %6778 = vmatprep.mubr.msk.f32.mxu1 %vm906_vm12, %v5056_v7 }
 0xd8e   : > { %6779 = vmatmul.mubr.msk.f32.gmra.mrb[78].mxu1 %vm906_vm12, %v5057_v16 }
 0xdd0   : > { %v6759_v53 = vpop.f32.mrb[64].mxu1 }
 0xdd1   : > { %v5192_v3 = vadd.f32 %v6759_v53, %v5724_v35  ;;  %v5186_v33 = vpop.f32.mrb[65].mxu1 }
 0xdd2   : > { %v5187_v29 = vadd.f32 %v5724_v35, %v5186_v33 }
 0xdd3   : > { %v5266_v63 = vadd.f32 %v5192_v3, %v10088_v26 }
 0xdd4   : > { %v5265_v10 = vadd.f32 %v5187_v29, %v10085_v46  ;;  %v6762_v51 = vpop.f32.mrb[66].mxu1 }
 0xdd5   : > { %5282 = vst.msk [vmem:[%s10265_s23 + $0x8] sm:$0xff] %vm242_vm0, %v5266_v63  ;;  %v5202_v5 = vadd.f32 %v6762_v51, %v5724_v35  ;;  %v5196_v37 = vpop.f32.mrb[67].mxu1 }
 0xdd6   : > { %5281 = vst.msk [vmem:[%s10265_s23] sm:$0xff] %vm242_vm0, %v5265_v10  ;;  %v5197_v4 = vadd.f32 %v5724_v35, %v5196_v37 }
 0xdd7   : > { %v5268_v60 = vadd.f32 %v5202_v5, %v10102_v38 }
 0xdd8   : > { %v5267_v56 = vadd.f32 %v5197_v4, %v10099_v32  ;;  %v6765_v12 = vpop.f32.mrb[68].mxu1 }
 0xdd9   : > { %5284 = vst.msk [vmem:[%s10265_s23 + $0x18] sm:$0xff] %vm242_vm0, %v5268_v60  ;;  %v5212_v46 = vadd.f32 %v6765_v12, %v5724_v35  ;;  %v5206_v26 = vpop.f32.mrb[69].mxu1 }
 0xdda   : > { %5283 = vst.msk [vmem:[%s10265_s23 + $0x10] sm:$0xff] %vm242_vm0, %v5267_v56  ;;  %v5207_v48 = vadd.f32 %v5724_v35, %v5206_v26 }
 0xddb   : > { %v5270_v61 = vadd.f32 %v5212_v46, %v10116_v44 }
 0xddc   : > { %v5269_v15 = vadd.f32 %v5207_v48, %v10113_v0  ;;  %v6768_v52 = vpop.f32.mrb[70].mxu1 }
 0xddd   : > { %5286 = vst.msk [vmem:[%s10265_s23 + $0x28] sm:$0xff] %vm242_vm0, %v5270_v61  ;;  %v5222_v38 = vadd.f32 %v6768_v52, %v5724_v35  ;;  %v5216_v32 = vpop.f32.mrb[71].mxu1 }
 0xdde   : > { %5285 = vst.msk [vmem:[%s10265_s23 + $0x20] sm:$0xff] %vm242_vm0, %v5269_v15  ;;  %v5217_v6 = vadd.f32 %v5724_v35, %v5216_v32 }
 0xddf   : > { %v5272_v1 = vadd.f32 %v5222_v38, %v10126_v39 }
 0xde0   : > { %v5271_v54 = vadd.f32 %v5217_v6, %v10123_v58 }
 0xde1   : > { %5288 = vst.msk [vmem:[%s10265_s23 + $0x38] sm:$0xff] %vm242_vm0, %v5272_v1 }
 0xde2   : > { %5287 = vst.msk [vmem:[%s10265_s23 + $0x30] sm:$0xff] %vm242_vm0, %v5271_v54 }
 0xe55   : > { %v6771_v0 = vpop.f32.mrb[72].mxu1 }
 0xe56   : > { %v5232_v44 = vadd.f32 %v6771_v0, %v5724_v35  ;;  %v5226_v13 = vpop.f32.mrb[73].mxu1 }
 0xe57   : > { %v5227_v28 = vadd.f32 %v5724_v35, %v5226_v13 }
 0xe58   : > { %v5274_v19 = vadd.f32 %v5232_v44, %v10176_v50 }
 0xe59   : > { %v5273_v11 = vadd.f32 %v5227_v28, %v10173_v42  ;;  %v6774_v27 = vpop.f32.mrb[74].mxu1 }
 0xe5a   : > { %5290 = vst.msk [vmem:[%s10265_s23 + $0x48] sm:$0xff] %vm242_vm0, %v5274_v19  ;;  %v5242_v58 = vadd.f32 %v6774_v27, %v5724_v35  ;;  %v5236_v39 = vpop.f32.mrb[75].mxu1 }
 0xe5b   : > { %5289 = vst.msk [vmem:[%s10265_s23 + $0x40] sm:$0xff] %vm242_vm0, %v5273_v11  ;;  %v5237_v47 = vadd.f32 %v5724_v35, %v5236_v39 }
 0xe5c   : > { %v5276_v31 = vadd.f32 %v5242_v58, %v10192_v55 }
 0xe5d   : > { %v5275_v62 = vadd.f32 %v5237_v47, %v10187_v43  ;;  %v6777_v9 = vpop.f32.mrb[76].mxu1 }
 0xe5e   : > { %5292 = vst.msk [vmem:[%s10265_s23 + $0x58] sm:$0xff] %vm242_vm0, %v5276_v31  ;;  %v5252_v42 = vadd.f32 %v6777_v9, %v5724_v35  ;;  %v5246_v50 = vpop.f32.mrb[77].mxu1 }
 0xe5f   : > { %5291 = vst.msk [vmem:[%s10265_s23 + $0x50] sm:$0xff] %vm242_vm0, %v5275_v62  ;;  %v5247_v21 = vadd.f32 %v5724_v35, %v5246_v50 }
 0xe60   : > { %v5278_v41 = vadd.f32 %v5252_v42, %v10204_v59 }
 0xe61   : > { %v5277_v30 = vadd.f32 %v5247_v21, %v10197_v17  ;;  %v6780_v55 = vpop.f32.mrb[78].mxu1 }
 0xe62   : > { %5294 = vst.msk [vmem:[%s10265_s23 + $0x68] sm:$0xff] %vm242_vm0, %v5278_v41  ;;  %v5262_v43 = vadd.f32 %v6780_v55, %v5724_v35  ;;  %v5256_v22 = vpop.f32.mrb[79].mxu1 }
 0xe63   : > { %5293 = vst.msk [vmem:[%s10265_s23 + $0x60] sm:$0xff] %vm242_vm0, %v5277_v30  ;;  %v5257_v14 = vadd.f32 %v5724_v35, %v5256_v22 }
 0xe64   : > { %v5280_v57 = vadd.f32 %v5262_v43, %v10214_v23 }
 0xe65   : > { %v5279_v8 = vadd.f32 %v5257_v14, %v10211_v24 }
 0xe66   : > { %5296 = vst.msk [vmem:[%s10265_s23 + $0x78] sm:$0xff] %vm242_vm0, %v5280_v57 }
 0xe67   : > { %5295 = vst.msk [vmem:[%s10265_s23 + $0x70] sm:$0xff] %vm242_vm0, %v5279_v8 }
 0xe68 PF: > { %s14_s15 = sadd.s32 1, %s7747_s15  }
 0xe69   : > { %p11_p4 = scmp.ge.s32.totalorder %s14_s15, 4  }
 0xe6b   :  { %13 = sbr.rel (!%p11_p4) target bundleno = 1 (0x1), region = 72 }

</bundles_post_ra>
